<compile_context>
chip_gen: v7x
topology: tpu7x:2x2x1
jax: 0.10.0
libtpu: 0.0.40
codegen_flags: <defaults>
</compile_context>

<pallas_src>
import functools

import jax
import jax.numpy as jnp
from jax.experimental import pallas as pl
from jax.experimental.pallas import tpu as pltpu


# --------------------------------------------------------------------------- kernels


def _lstm_merged_kernel(x_ref, w_ref, b_ref, o_ref, *, hidden, normalize, eps,
                        compute_dtype):
    """Both LSTM directions in one MXU pass: x (B,D) @ w (D,6H) + b -> h (B,2H) [+ LN]."""
    H = hidden
    x = x_ref[...].astype(compute_dtype)                       # bf16 cast folded in-kernel
    g = jnp.dot(x, w_ref[...], preferred_element_type=jnp.float32) + b_ref[...]

    def direction(off):
        i = jax.nn.sigmoid(g[:, off:off + H])                  # input gate
        gg = jnp.tanh(g[:, off + H:off + 2 * H])               # cell candidate
        o = jax.nn.sigmoid(g[:, off + 2 * H:off + 3 * H])      # output gate
        # c = i * gg (forget-gate term vanishes since c0 == 0); h = o * tanh(c)
        return o * jnp.tanh(i * gg)

    h = jnp.concatenate([direction(0), direction(3 * H)], axis=-1)   # (B, 2H) f32

    if normalize:
        # Non-affine LayerNormalization: torch.std is unbiased (N-1), eps added to sigma.
        n = h.shape[-1]
        mu = jnp.mean(h, axis=-1, keepdims=True)
        var = jnp.sum((h - mu) ** 2, axis=-1, keepdims=True) / (n - 1)
        h = (h - mu) / (jnp.sqrt(var) + eps)

    o_ref[...] = h.astype(o_ref.dtype)


def _lstm_dir_kernel(x_ref, w_ref, b_ref, o_ref, *, hidden, compute_dtype):
    """One LSTM direction (grid step d): x (B,D) @ w (D,3H) + b -> h (B,H)."""
    H = hidden
    x = x_ref[...].astype(compute_dtype)
    g = jnp.dot(x, w_ref[...], preferred_element_type=jnp.float32) + b_ref[...]
    i = jax.nn.sigmoid(g[:, 0:H])
    gg = jnp.tanh(g[:, H:2 * H])
    o = jax.nn.sigmoid(g[:, 2 * H:3 * H])
    o_ref[...] = (o * jnp.tanh(i * gg)).astype(o_ref.dtype)


# --------------------------------------------------------------------------- wrappers


def pack_character_lstm_params(w_ih_fwd, w_ih_rev, b_fwd, b_rev, *,
                               compute_dtype=jnp.bfloat16):
    """One-time, SETUP-time packing (do NOT call per forward):
    drop the forget gate (it multiplies c0 == 0), pre-transpose to (D, 3H), concatenate
    both directions into a single lane-dense (D, 6H) compute-dtype block, pre-cast bias
    to f32.  Column layout: [fwd_i | fwd_g | fwd_o | rev_i | rev_g | rev_o]."""
    H = w_ih_fwd.shape[0] // 4

    def one(w_ih, b):
        w = jnp.concatenate([w_ih[0:H], w_ih[2 * H:3 * H], w_ih[3 * H:4 * H]], axis=0)
        bb = jnp.concatenate([b[0:H], b[2 * H:3 * H], b[3 * H:4 * H]], axis=0)
        return w.T, bb                                          # (D, 3H), (3H,)

    w_f, b_f = one(w_ih_fwd, b_fwd)
    w_r, b_r = one(w_ih_rev, b_rev)
    w_packed = jnp.concatenate([w_f, w_r], axis=1).astype(compute_dtype)          # (D, 6H)
    b_packed = jnp.concatenate([b_f, b_r], axis=0).reshape(1, 6 * H).astype(jnp.float32)
    return w_packed, b_packed


def _has_two_tensorcores():
    """True on v7x-class chips (2 TensorCores per chip) where the direction-parallel
    grid can be sharded; everywhere else the merged single-shot kernel is used."""
    try:
        kind = jax.devices()[0].device_kind.lower()
    except Exception:
        return False
    return "v7" in kind


def character_lstm_forward(x, w_packed, b_packed, *, normalize=False, eps=1e-3,
                           direction_parallel=None):
    """x: (B, d_embedding) f32; w_packed: (D, 6H); b_packed: (1, 6H) f32
    (both produced once by pack_character_lstm_params).  Returns (B, 2H)."""
    B, D = x.shape
    H = w_packed.shape[1] // 6
    out_dtype = x.dtype
    compute_dtype = w_packed.dtype

    if direction_parallel is None:
        direction_parallel = _has_two_tensorcores()

    wb = jnp.dtype(compute_dtype).itemsize
    cost = pl.CostEstimate(
        flops=2 * B * D * 6 * H,                  # one (B,D)x(D,6H) worth of MACs
        transcendentals=8 * B * H,                # 2 sigmoid + 2 tanh per dir per element
        bytes_accessed=(B * D * x.dtype.itemsize  # x fetched once (const index_map)
                        + D * 6 * H * wb          # packed weights
                        + 6 * H * 4               # bias
                        + B * 2 * H * jnp.dtype(out_dtype).itemsize),
    )

    if not direction_parallel:
        # Single-TC chips (v5e/v6e): one whole-K, whole-N matmul; LN fused in the epilogue.
        # Weight block is 3 MiB bf16 (double-buffered 6 MiB) -- fits every generation's
        # default scoped VMEM, no vmem_limit_bytes override needed.
        return pl.pallas_call(
            functools.partial(_lstm_merged_kernel, hidden=H, normalize=normalize,
                              eps=eps, compute_dtype=compute_dtype),
            out_shape=jax.ShapeDtypeStruct((B, 2 * H), out_dtype),
            cost_estimate=cost,
        )(x, w_packed, b_packed)

    # v7x: shard the two independent directions across the two TensorCores.
    h = pl.pallas_call(
        functools.partial(_lstm_dir_kernel, hidden=H, compute_dtype=compute_dtype),
        out_shape=jax.ShapeDtypeStruct((B, 2 * H), out_dtype),
        grid_spec=pltpu.PrefetchScalarGridSpec(
            num_scalar_prefetch=0,
            grid=(2,),                                              # LSTM direction
            in_specs=[
                pl.BlockSpec((B, D), lambda d: (0, 0)),             # x (fetched once)
                pl.BlockSpec((D, 3 * H), lambda d: (0, d)),         # per-dir weight slab
                pl.BlockSpec((1, 3 * H), lambda d: (0, d)),         # per-dir bias
            ],
            out_specs=pl.BlockSpec((B, H), lambda d: (0, d)),       # direct half write
        ),
        compiler_params=pltpu.CompilerParams(
            dimension_semantics=("parallel",)),
        cost_estimate=cost,
    )(x, w_packed, b_packed)

    if not normalize:
        return h

    # LN mixes the two directions, so it cannot live inside the direction-parallel kernel;
    # the (B, 2H) slab is tiny -> fused XLA, not a second Pallas launch.
    h32 = h.astype(jnp.float32)
    mu = jnp.mean(h32, axis=-1, keepdims=True)
    var = jnp.sum((h32 - mu) ** 2, axis=-1, keepdims=True) / (h.shape[-1] - 1)
    return ((h32 - mu) / (jnp.sqrt(var) + eps)).astype(out_dtype)


# --------------------------------------------------------------------------- test


if __name__ == "__main__":
    key = jax.random.PRNGKey(0)

    B = 8                 # batch (chars_padded_np.size(0))
    D_EMB = 2048          # hardcoded self.d_embedding in the module
    D_OUT = 256           # d_out (small but lane-aligned)
    H = D_OUT // 2        # per-direction hidden size
    EPS = 1e-3

    k1, k2, k3, k4, k5, k6, k7 = jax.random.split(key, 7)
    scale = float(1.0 / jnp.sqrt(H))   # nn.LSTM default init range

    x = jax.random.normal(k1, (B, D_EMB), jnp.float32)
    w_ih_fwd = jax.random.uniform(k2, (4 * H, D_EMB), jnp.float32, -scale, scale)
    w_ih_rev = jax.random.uniform(k3, (4 * H, D_EMB), jnp.float32, -scale, scale)
    b_ih_fwd = jax.random.uniform(k4, (4 * H,), jnp.float32, -scale, scale)
    b_hh_fwd = jax.random.uniform(k5, (4 * H,), jnp.float32, -scale, scale)
    b_ih_rev = jax.random.uniform(k6, (4 * H,), jnp.float32, -scale, scale)
    b_hh_rev = jax.random.uniform(k7, (4 * H,), jnp.float32, -scale, scale)
    # nn.LSTM also has weight_hh_l0 / weight_hh_l0_reverse, but they multiply h0 == 0
    # and therefore cannot affect the single-step forward output.
    b_fwd = b_ih_fwd + b_hh_fwd
    b_rev = b_ih_rev + b_hh_rev

    # ---- setup-time packing: done ONCE, reused for every forward call ----
    w_packed, b_packed = pack_character_lstm_params(w_ih_fwd, w_ih_rev, b_fwd, b_rev)
    w_packed, b_packed = jax.block_until_ready((w_packed, b_packed))

    # Pure-JAX reference for the same single-step bidirectional LSTM, with matching
    # precision (bf16 inputs/weights, f32 accumulation).
    def ref_h(x):
        xb = x.astype(jnp.bfloat16)
        def cell(w, b):
            g = jnp.dot(xb, w.astype(jnp.bfloat16).T,
                        preferred_element_type=jnp.float32) + b
            i = jax.nn.sigmoid(g[:, 0:H])
            gg = jnp.tanh(g[:, 2 * H:3 * H])
            o = jax.nn.sigmoid(g[:, 3 * H:4 * H])
            return o * jnp.tanh(i * gg)
        return jnp.concatenate([cell(w_ih_fwd, b_fwd), cell(w_ih_rev, b_rev)], axis=-1)

    expected = ref_h(x)
    mu = jnp.mean(expected, axis=-1, keepdims=True)
    var = jnp.sum((expected - mu) ** 2, axis=-1, keepdims=True) / (D_OUT - 1)
    expected_ln = (expected - mu) / (jnp.sqrt(var) + EPS)

    # ---- default (auto-selected) variant ----
    out = jax.block_until_ready(
        character_lstm_forward(x, w_packed, b_packed, normalize=False))
    assert out.shape == (B, D_OUT)
    assert jnp.allclose(out, expected, atol=1e-3, rtol=1e-3), "mismatch vs reference"

    out_ln = jax.block_until_ready(
        character_lstm_forward(x, w_packed, b_packed, normalize=True, eps=EPS))
    assert jnp.allclose(out_ln, expected_ln, atol=1e-3, rtol=1e-3), "LN mismatch vs reference"

    # ---- cross-check both variants regardless of chip (both are correct anywhere) ----
    for dp in (False, True):
        o1 = jax.block_until_ready(
            character_lstm_forward(x, w_packed, b_packed,
                                   normalize=False, direction_parallel=dp))
        o2 = jax.block_until_ready(
            character_lstm_forward(x, w_packed, b_packed,
                                   normalize=True, eps=EPS, direction_parallel=dp))
        assert jnp.allclose(o1, expected, atol=1e-3, rtol=1e-3), f"mismatch (dp={dp})"
        assert jnp.allclose(o2, expected_ln, atol=1e-3, rtol=1e-3), f"LN mismatch (dp={dp})"

    print("KERNEL_OK")
</pallas_src>

<mosaic_0001>
module attributes {stable_mosaic.version = 11 : i64} {
  func.func @_lstm_merged_kernel(%arg0: memref<8x2048xf32, #tpu.memory_space<vmem>>, %arg1: memref<2048x768xbf16, #tpu.memory_space<vmem>>, %arg2: memref<1x768xf32, #tpu.memory_space<vmem>>, %arg3: memref<8x256xf32, #tpu.memory_space<vmem>>) attributes {dimension_semantics = [], scalar_prefetch = 0 : i64, scratch_operands = 0 : i64, tpu.core_type = #tpu.core_type<tc>} {
    %c0 = arith.constant 0 : index
    %c0_0 = arith.constant 0 : index
    %0 = vector.load %arg0[%c0, %c0_0] : memref<8x2048xf32, #tpu.memory_space<vmem>>, vector<8x2048xf32>
    %1 = arith.truncf %0 : vector<8x2048xf32> to vector<8x2048xbf16>
    %c0_1 = arith.constant 0 : index
    %c0_2 = arith.constant 0 : index
    %2 = vector.load %arg1[%c0_1, %c0_2] : memref<2048x768xbf16, #tpu.memory_space<vmem>>, vector<2048x768xbf16>
    %cst = arith.constant dense<0.000000e+00> : vector<8x768xf32>
    %3 = tpu.matmul %1, %2, %cst {dimension_numbers = #tpu.dot_dimension_numbers<[1], [0], [0], [1], [0, 0, 1, 1], [], []>} : vector<8x2048xbf16>, vector<2048x768xbf16>, vector<8x768xf32> -> vector<8x768xf32>
    %c0_3 = arith.constant 0 : index
    %c0_4 = arith.constant 0 : index
    %4 = vector.load %arg2[%c0_3, %c0_4] : memref<1x768xf32, #tpu.memory_space<vmem>>, vector<1x768xf32>
    %5 = vector.broadcast %4 : vector<1x768xf32> to vector<8x768xf32>
    %6 = arith.addf %3, %5 : vector<8x768xf32>
    %7 = vector.extract_strided_slice %6 {offsets = [0, 0], sizes = [8, 128], strides = [1, 1]} : vector<8x768xf32> to vector<8x128xf32>
    %8 = arith.negf %7 : vector<8x128xf32>
    %9 = math.exp %8 : vector<8x128xf32>
    %cst_5 = arith.constant 1.000000e+00 : f32
    %10 = vector.broadcast %cst_5 : f32 to vector<8x128xf32>
    %11 = arith.addf %10, %9 : vector<8x128xf32>
    %12 = arith.divf %10, %11 : vector<8x128xf32>
    %13 = vector.extract_strided_slice %6 {offsets = [0, 128], sizes = [8, 128], strides = [1, 1]} : vector<8x768xf32> to vector<8x128xf32>
    %14 = math.tanh %13 : vector<8x128xf32>
    %15 = vector.extract_strided_slice %6 {offsets = [0, 256], sizes = [8, 128], strides = [1, 1]} : vector<8x768xf32> to vector<8x128xf32>
    %16 = arith.negf %15 : vector<8x128xf32>
    %17 = math.exp %16 : vector<8x128xf32>
    %cst_6 = arith.constant 1.000000e+00 : f32
    %18 = vector.broadcast %cst_6 : f32 to vector<8x128xf32>
    %19 = arith.addf %18, %17 : vector<8x128xf32>
    %20 = arith.divf %18, %19 : vector<8x128xf32>
    %21 = arith.mulf %12, %14 : vector<8x128xf32>
    %22 = math.tanh %21 : vector<8x128xf32>
    %23 = arith.mulf %20, %22 : vector<8x128xf32>
    %24 = vector.extract_strided_slice %6 {offsets = [0, 384], sizes = [8, 128], strides = [1, 1]} : vector<8x768xf32> to vector<8x128xf32>
    %25 = arith.negf %24 : vector<8x128xf32>
    %26 = math.exp %25 : vector<8x128xf32>
    %cst_7 = arith.constant 1.000000e+00 : f32
    %27 = vector.broadcast %cst_7 : f32 to vector<8x128xf32>
    %28 = arith.addf %27, %26 : vector<8x128xf32>
    %29 = arith.divf %27, %28 : vector<8x128xf32>
    %30 = vector.extract_strided_slice %6 {offsets = [0, 512], sizes = [8, 128], strides = [1, 1]} : vector<8x768xf32> to vector<8x128xf32>
    %31 = math.tanh %30 : vector<8x128xf32>
    %32 = vector.extract_strided_slice %6 {offsets = [0, 640], sizes = [8, 128], strides = [1, 1]} : vector<8x768xf32> to vector<8x128xf32>
    %33 = arith.negf %32 : vector<8x128xf32>
    %34 = math.exp %33 : vector<8x128xf32>
    %cst_8 = arith.constant 1.000000e+00 : f32
    %35 = vector.broadcast %cst_8 : f32 to vector<8x128xf32>
    %36 = arith.addf %35, %34 : vector<8x128xf32>
    %37 = arith.divf %35, %36 : vector<8x128xf32>
    %38 = arith.mulf %29, %31 : vector<8x128xf32>
    %39 = math.tanh %38 : vector<8x128xf32>
    %40 = arith.mulf %37, %39 : vector<8x128xf32>
    %41 = tpu.concatenate %23, %40 in 1 : vector<8x128xf32>, vector<8x128xf32> -> vector<8x256xf32>
    %c0_9 = arith.constant 0 : index
    %c0_10 = arith.constant 0 : index
    %42 = vector.load %arg3[%c0_9, %c0_10] : memref<8x256xf32, #tpu.memory_space<vmem>>, vector<8x256xf32>
    tpu.vector_store %arg3[%c0_9, %c0_10], %41 {strides = array<i32>} : memref<8x256xf32, #tpu.memory_space<vmem>>, vector<8x256xf32>,
    return
  }
}

</mosaic_0001>

<bundles_post_ra>
// kernel: tpu_custom_call.1
= control target key start
LH: loop header
LB: loop body
LE: loop exit
PB: predicated region body
PF: predicated region fallthrough
CT: control target
= control target key end

     0   :  { %8 = vsyncpa [#allocation3], 0  ;;  %s8060_s0 = inlined_call_operand.hbm [shape: f32[8,2048], index: 0, kind: input, shape index: {}]   ;;  %s8061_s1 = inlined_call_operand.hbm [shape: bf16[2048,768], index: 1, kind: input, shape index: {}]   ;;  %s8062_s2 = inlined_call_operand.hbm [shape: f32[1,768], index: 2, kind: input, shape index: {}]   ;;  %s8063_s3 = inlined_call_operand.hbm [shape: f32[8,256], index: 3, kind: output, shape index: {}]  }
   0x1   :  { %9 = vsyncpa [#allocation6], 0 }
   0x2   :  { %10 = vsyncpa [#allocation4], 0  ;;  %s7895_s12 = smov [#allocation5]   ;;  %s7801_s16 = scalar_lea.hbm %s8061_s1, 98304 }
   0x3   :  { %s26_s13 = sshll.u32 %s7895_s12, 4  ;;  %p7802_p0 = scmp.ne.s32.totalorder %s8061_s1, %s7801_s16  ;;  %s27_s13 = int_to_ptr.vmem [resolvable:$true] %s26_s13 }
   0x4   :  { %p7805_p1 = scmp.lt.u32.totalorder %s7801_s16, %s8061_s1 }
   0x6   :  { %p7807_p2 = pnand %p7805_p1, %p7802_p0 }
   0x8   :  { %7810 = shalt.err (!%p7807_p2)
}
   0x9   :  { %s7811_s21 = scalar_lea.vmem %s27_s13, 98304  ;;  %p7816_p4 = scmp.lt.s32.totalorder %s27_s13, %s27_s13 }
   0xa   :  { %p7812_p3 = scmp.ne.s32.totalorder %s27_s13, %s7811_s21  ;;  %p7817_p5 = scmp.lt.s32.totalorder %s7811_s21, %s7811_s21 }
   0xc   :  { %p7818_p6 = por %p7817_p5, %p7816_p4 }
   0xe   :  { %p7819_p7 = pnand %p7818_p6, %p7812_p3 }
  0x10   :  { %7822 = shalt.err (!%p7819_p7)
}
  0x11   :  { %s7896_s22 = smov 384   ;;  %s7897_s23 = smov 24  }
  0x12   :  { %32 = dma.hbm_to_vmem [thread:$0]  %s8061_s1, 98304, %s27_s13, [#allocation6], %s7896_s22, %s7896_s22, %s7897_s23  }
  0x13   :  { %s7898_s26 = smov [#allocation2]   ;;  %s7899_s28 = smov [#allocation7]  }
  0x14   :  { %s17_s27 = sshll.u32 %s7898_s26, 4  ;;  %s39_s29 = sshll.u32 %s7899_s28, 4  ;;  %s18_s27 = int_to_ptr.vmem [resolvable:$true] %s17_s27  ;;  %s40_s29 = int_to_ptr.vmem [resolvable:$true] %s39_s29 }
  0x15   :  { %s7823_s5 = scalar_lea.hbm %s8060_s0, 2048 }
  0x16   :  { %p7824_p8 = scmp.ne.s32.totalorder %s8060_s0, %s7823_s5  ;;  %p7827_p9 = scmp.lt.u32.totalorder %s7823_s5, %s8060_s0 }
  0x18   :  { %p7829_p10 = pnand %p7827_p9, %p7824_p8 }
  0x1a   :  { %7832 = shalt.err (!%p7829_p10)
}
  0x1b   :  { %s7833_s1 = scalar_lea.vmem %s18_s27, 2048  ;;  %p7838_p12 = scmp.lt.s32.totalorder %s18_s27, %s18_s27 }
  0x1c   :  { %p7834_p11 = scmp.ne.s32.totalorder %s18_s27, %s7833_s1  ;;  %p7839_p13 = scmp.lt.s32.totalorder %s7833_s1, %s7833_s1 }
  0x1e   :  { %p7840_p0 = por %p7839_p13, %p7838_p12 }
  0x20   :  { %p7841_p1 = pnand %p7840_p0, %p7834_p11 }
  0x22   :  { %7844 = shalt.err (!%p7841_p1)
}
  0x23   :  { %20 = dma.hbm_to_vmem [thread:$0]  %s8060_s0, 2048, %s18_s27, [#allocation3]  }
  0x24   :  { %s7845_s14 = scalar_lea.hbm %s8062_s2, 96 }
  0x25   :  { %p7846_p2 = scmp.ne.s32.totalorder %s8062_s2, %s7845_s14  ;;  %p7849_p3 = scmp.lt.u32.totalorder %s7845_s14, %s8062_s2 }
  0x27   :  { %p7851_p4 = pnand %p7849_p3, %p7846_p2 }
  0x29   :  { %7854 = shalt.err (!%p7851_p4)
}
  0x2a   :  { %s7855_s19 = scalar_lea.vmem %s40_s29, 96  ;;  %p7860_p6 = scmp.lt.s32.totalorder %s40_s29, %s40_s29 }
  0x2b   :  { %p7856_p5 = scmp.ne.s32.totalorder %s40_s29, %s7855_s19  ;;  %p7861_p7 = scmp.lt.s32.totalorder %s7855_s19, %s7855_s19 }
  0x2d   :  { %p7862_p8 = por %p7861_p7, %p7860_p6 }
  0x2f   :  { %p7863_p9 = pnand %p7862_p8, %p7856_p5 }
  0x31   :  { %7866 = shalt.err (!%p7863_p9)
}
  0x32   :  { %42 = dma.hbm_to_vmem [thread:$0]  %s8062_s2, 96, %s40_s29, [#allocation6]  }
  0x33   :  { %7889 = dma.done.wait [#allocation3], 2048  }
  0x34   :  { %7890 = vsyncadd [#allocation3], 4294965248 }
  0x35   :  { %7891 = dma.done.wait [#allocation6], 98400  }
  0x36   :  { %7892 = vsyncadd [#allocation6], 4294868896  ;;  %v6624_v0 = vld [vmem:[#allocation5 + $0x4] ss:$24 sps:$4 sm:$0xff]   ;;  %v6628_v2 = vld [vmem:[#allocation5] ss:$24 sps:$4 sm:$0xff]  }
  0x37   :  { %v6626_v1 = vld [vmem:[#allocation5 + $0xc04] ss:$24 sps:$4 sm:$0xff]   ;;  %4724 = vmatprep.subr.bf16.mxu1 %v6624_v0  ;;  %v6629_v3 = vld [vmem:[#allocation5 + $0xc00] ss:$24 sps:$4 sm:$0xff]   ;;  %v6630_v4 = vld [vmem:[#allocation5 + $0x34] ss:$24 sps:$4 sm:$0xff]  }
  0x38   :  { %4888 = vmatprep.subr.bf16.mxu0 %v6626_v1  ;;  %4725 = vmatpush1.bf16.msra.mxu1 %v6628_v2  ;;  %v6632_v5 = vld [vmem:[#allocation5 + $0xc34] ss:$24 sps:$4 sm:$0xff]   ;;  %v6634_v6 = vld [vmem:[#allocation5 + $0x30] ss:$24 sps:$4 sm:$0xff]   ;;  %v6636_v8 = vld [vmem:[#allocation5 + $0x64] ss:$24 sps:$4 sm:$0xff]  }
  0x39   :  { %4889 = vmatpush1.bf16.msra.mxu0 %v6629_v3  ;;  %4726 = vmatprep.subr.bf16.mxu1 %v6630_v4  ;;  %v6635_v7 = vld [vmem:[#allocation5 + $0xc30] ss:$24 sps:$4 sm:$0xff]   ;;  %v6638_v9 = vld [vmem:[#allocation5 + $0xc64] ss:$24 sps:$4 sm:$0xff]   ;;  %v6640_v10 = vld [vmem:[#allocation5 + $0x60] ss:$24 sps:$4 sm:$0xff]  }
  0x3a   :  { %4890 = vmatprep.subr.bf16.mxu0 %v6632_v5  ;;  %v6641_v11 = vld [vmem:[#allocation5 + $0xc60] ss:$24 sps:$4 sm:$0xff]   ;;  %v6642_v12 = vld [vmem:[#allocation5 + $0x94] ss:$24 sps:$4 sm:$0xff]   ;;  %v6646_v14 = vld [vmem:[#allocation5 + $0x90] ss:$24 sps:$4 sm:$0xff]  }
  0x3b   :  { %v6644_v13 = vld [vmem:[#allocation5 + $0xc94] ss:$24 sps:$4 sm:$0xff]   ;;  %v6647_v15 = vld [vmem:[#allocation5 + $0xc90] ss:$24 sps:$4 sm:$0xff]   ;;  %v6648_v16 = vld [vmem:[#allocation5 + $0xc4] ss:$24 sps:$4 sm:$0xff]  }
  0x3c   :  { %4727 = vmatpush1.bf16.msra.mxu1 %v6634_v6  ;;  %v6650_v17 = vld [vmem:[#allocation5 + $0xcc4] ss:$24 sps:$4 sm:$0xff]   ;;  %v6652_v18 = vld [vmem:[#allocation5 + $0xc0] ss:$24 sps:$4 sm:$0xff]   ;;  %v6654_v20 = vld [vmem:[#allocation5 + $0xf4] ss:$24 sps:$4 sm:$0xff]  }
  0x3d   :  { %4891 = vmatpush1.bf16.msra.mxu0 %v6635_v7  ;;  %4728 = vmatprep.subr.bf16.mxu1 %v6636_v8  ;;  %v6653_v19 = vld [vmem:[#allocation5 + $0xcc0] ss:$24 sps:$4 sm:$0xff]   ;;  %v6656_v21 = vld [vmem:[#allocation5 + $0xcf4] ss:$24 sps:$4 sm:$0xff]   ;;  %v6658_v22 = vld [vmem:[#allocation5 + $0xf0] ss:$24 sps:$4 sm:$0xff]  }
  0x3e   :  { %4892 = vmatprep.subr.bf16.mxu0 %v6638_v9  ;;  %v6659_v23 = vld [vmem:[#allocation5 + $0xcf0] ss:$24 sps:$4 sm:$0xff]   ;;  %v6660_v24 = vld [vmem:[#allocation5 + $0x124] ss:$24 sps:$4 sm:$0xff]   ;;  %v6664_v26 = vld [vmem:[#allocation5 + $0x120] ss:$24 sps:$4 sm:$0xff]  }
  0x3f   :  { %v6662_v25 = vld [vmem:[#allocation5 + $0xd24] ss:$24 sps:$4 sm:$0xff]   ;;  %v6665_v27 = vld [vmem:[#allocation5 + $0xd20] ss:$24 sps:$4 sm:$0xff]   ;;  %v6666_v28 = vld [vmem:[#allocation5 + $0x154] ss:$24 sps:$4 sm:$0xff]  }
  0x40   :  { %4729 = vmatpush1.bf16.msra.mxu1 %v6640_v10  ;;  %v6668_v29 = vld [vmem:[#allocation5 + $0xd54] ss:$24 sps:$4 sm:$0xff]   ;;  %v6670_v30 = vld [vmem:[#allocation5 + $0x150] ss:$24 sps:$4 sm:$0xff]   ;;  %v6672_v32 = vld [vmem:[#allocation5 + $0x184] ss:$24 sps:$4 sm:$0xff]  }
  0x41   :  { %4893 = vmatpush1.bf16.msra.mxu0 %v6641_v11  ;;  %4730 = vmatprep.subr.bf16.mxu1 %v6642_v12  ;;  %v6671_v31 = vld [vmem:[#allocation5 + $0xd50] ss:$24 sps:$4 sm:$0xff]   ;;  %v6674_v33 = vld [vmem:[#allocation5 + $0xd84] ss:$24 sps:$4 sm:$0xff]   ;;  %v6676_v34 = vld [vmem:[#allocation5 + $0x180] ss:$24 sps:$4 sm:$0xff]  }
  0x42   :  { %4894 = vmatprep.subr.bf16.mxu0 %v6644_v13  ;;  %v6677_v35 = vld [vmem:[#allocation5 + $0xd80] ss:$24 sps:$4 sm:$0xff]   ;;  %v6678_v36 = vld [vmem:[#allocation5 + $0x1b4] ss:$24 sps:$4 sm:$0xff]   ;;  %v6682_v38 = vld [vmem:[#allocation5 + $0x1b0] ss:$24 sps:$4 sm:$0xff]  }
  0x43   :  { %v6680_v37 = vld [vmem:[#allocation5 + $0xdb4] ss:$24 sps:$4 sm:$0xff]   ;;  %v6683_v39 = vld [vmem:[#allocation5 + $0xdb0] ss:$24 sps:$4 sm:$0xff]   ;;  %v6684_v40 = vld [vmem:[#allocation5 + $0x1e4] ss:$24 sps:$4 sm:$0xff]  }
  0x44   :  { %4731 = vmatpush1.bf16.msra.mxu1 %v6646_v14  ;;  %v6686_v41 = vld [vmem:[#allocation5 + $0xde4] ss:$24 sps:$4 sm:$0xff]   ;;  %v6688_v42 = vld [vmem:[#allocation5 + $0x1e0] ss:$24 sps:$4 sm:$0xff]   ;;  %v6690_v44 = vld [vmem:[#allocation5 + $0x214] ss:$24 sps:$4 sm:$0xff]  }
  0x45   :  { %4895 = vmatpush1.bf16.msra.mxu0 %v6647_v15  ;;  %4732 = vmatprep.subr.bf16.mxu1 %v6648_v16  ;;  %v6689_v43 = vld [vmem:[#allocation5 + $0xde0] ss:$24 sps:$4 sm:$0xff]   ;;  %v6692_v45 = vld [vmem:[#allocation5 + $0xe14] ss:$24 sps:$4 sm:$0xff]   ;;  %v6694_v47 = vld [vmem:[#allocation5 + $0x210] ss:$24 sps:$4 sm:$0xff]  }
  0x46   :  { %4896 = vmatprep.subr.bf16.mxu0 %v6650_v17  ;;  %v53_v46 = vld [vmem:[#allocation2 + $0x8] sm:$0xff]  ;;  %v6696_v51 = vld [vmem:[#allocation5 + $0x244] ss:$24 sps:$4 sm:$0xff]   ;;  %v6700_v54 = vld [vmem:[#allocation5 + $0x240] ss:$24 sps:$4 sm:$0xff]   ;;  %s7900_s2 = smov [#allocation8]  }
  0x47   :  { %v7957_v48 = vpack.c.bf16 %v53_v46, %v53_v46  ;;  %v6695_v49 = vld [vmem:[#allocation5 + $0xe10] ss:$24 sps:$4 sm:$0xff]   ;;  %v6698_v52 = vld [vmem:[#allocation5 + $0xe44] ss:$24 sps:$4 sm:$0xff]   ;;  %v6701_v55 = vld [vmem:[#allocation5 + $0xe40] ss:$24 sps:$4 sm:$0xff]  }
  0x48   :  { %4733 = vmatpush1.bf16.msra.mxu1 %v6652_v18  ;;  %v61_v50 = vld [vmem:[#allocation2 + $0x48] sm:$0xff]  ;;  %v6708_v60 = vld [vmem:[#allocation5 + $0x2a4] ss:$24 sps:$4 sm:$0xff]   ;;  %v6712_v62 = vld [vmem:[#allocation5 + $0x2a0] ss:$24 sps:$4 sm:$0xff]   ;;  %s5748_s21 = sshll.u32 %s7900_s2, 4  ;;  %s5749_s21 = int_to_ptr.vmem [resolvable:$true] %s5748_s21 }
  0x49   :  { %4897 = vmatpush1.bf16.msra.mxu0 %v6653_v19  ;;  %4734 = vmatprep.subr.bf16.mxu1 %v6654_v20  ;;  %v7959_v53 = vpack.c.bf16 %v61_v50, %v61_v50  ;;  %v6702_v56 = vld [vmem:[#allocation5 + $0x274] ss:$24 sps:$4 sm:$0xff]   ;;  %v6706_v58 = vld [vmem:[#allocation5 + $0x270] ss:$24 sps:$4 sm:$0xff]   ;;  %v6710_v61 = vld [vmem:[#allocation5 + $0xea4] ss:$24 sps:$4 sm:$0xff]   ;;  %p7872_p11 = scmp.lt.s32.totalorder %s5749_s21, %s5749_s21 }
  0x4a   :  { %4898 = vmatprep.subr.bf16.mxu0 %v6656_v21  ;;  %4756 = vmatprep.mubr.bf16.mxu1 %v7957_v48  ;;  %v6704_v57 = vld [vmem:[#allocation5 + $0xe74] ss:$24 sps:$4 sm:$0xff]   ;;  %v6707_v59 = vld [vmem:[#allocation5 + $0xe70] ss:$24 sps:$4 sm:$0xff]   ;;  %v6713_v63 = vld [vmem:[#allocation5 + $0xea0] ss:$24 sps:$4 sm:$0xff]  }
  0x4b   :  { %4920 = vmatprep.mubr.bf16.mxu0 %v7959_v53  ;;  %v6714_v0 = vld [vmem:[#allocation5 + $0x2d4] ss:$24 sps:$4 sm:$0xff]   ;;  %v6718_v2 = vld [vmem:[#allocation5 + $0x2d0] ss:$24 sps:$4 sm:$0xff]   ;;  %v6722_v4 = vld [vmem:[#allocation5 + $0x304] ss:$24 sps:$4 sm:$0xff]  }
  0x4c   :  { %4735 = vmatpush1.bf16.msra.mxu1 %v6658_v22  ;;  %v6716_v1 = vld [vmem:[#allocation5 + $0xed4] ss:$24 sps:$4 sm:$0xff]   ;;  %v6719_v3 = vld [vmem:[#allocation5 + $0xed0] ss:$24 sps:$4 sm:$0xff]   ;;  %v52_v5 = vld [vmem:[#allocation2] sm:$0xff]  ;;  %s7867_s22 = scalar_lea.vmem %s5749_s21, 256 }
  0x4d   :  { %4899 = vmatpush1.bf16.msra.mxu0 %v6659_v23  ;;  %4736 = vmatprep.subr.bf16.mxu1 %v6660_v24  ;;  %v60_v6 = vld [vmem:[#allocation2 + $0x40] sm:$0xff]  ;;  %v7963_v10 = vpack.c.bf16 %v52_v5, %v52_v5  ;;  %v6728_v12 = vld [vmem:[#allocation5 + $0x334] ss:$24 sps:$4 sm:$0xff]   ;;  %v6726_v14 = vld [vmem:[#allocation5 + $0x330] ss:$24 sps:$4 sm:$0xff]   ;;  %p7868_p10 = scmp.ne.s32.totalorder %s5749_s21, %s7867_s22  ;;  %p7873_p12 = scmp.lt.s32.totalorder %s7867_s22, %s7867_s22 }
  0x4e   :  { %4900 = vmatprep.subr.bf16.mxu0 %v6662_v25  ;;  %v6725_v7 = vld [vmem:[#allocation5 + $0xf04] ss:$24 sps:$4 sm:$0xff]   ;;  %v6720_v8 = vld [vmem:[#allocation5 + $0x300] ss:$24 sps:$4 sm:$0xff]   ;;  %v7965_v11 = vpack.c.bf16 %v60_v6, %v60_v6  ;;  %v6731_v13 = vld [vmem:[#allocation5 + $0xf34] ss:$24 sps:$4 sm:$0xff]  }
  0x4f   :  { %v6723_v9 = vld [vmem:[#allocation5 + $0xf00] ss:$24 sps:$4 sm:$0xff]   ;;  %v6729_v15 = vld [vmem:[#allocation5 + $0xf30] ss:$24 sps:$4 sm:$0xff]   ;;  %v6734_v16 = vld [vmem:[#allocation5 + $0x364] ss:$24 sps:$4 sm:$0xff]   ;;  %p7874_p13 = por %p7873_p12, %p7872_p11 }
  0x50   :  { %4737 = vmatpush1.bf16.msra.mxu1 %v6664_v26  ;;  %v6737_v17 = vld [vmem:[#allocation5 + $0xf64] ss:$24 sps:$4 sm:$0xff]   ;;  %v6732_v18 = vld [vmem:[#allocation5 + $0x360] ss:$24 sps:$4 sm:$0xff]   ;;  %v6740_v20 = vld [vmem:[#allocation5 + $0x394] ss:$24 sps:$4 sm:$0xff]  }
  0x51   :  { %4901 = vmatpush1.bf16.msra.mxu0 %v6665_v27  ;;  %4738 = vmatprep.subr.bf16.mxu1 %v6666_v28  ;;  %v6735_v19 = vld [vmem:[#allocation5 + $0xf60] ss:$24 sps:$4 sm:$0xff]   ;;  %v6743_v21 = vld [vmem:[#allocation5 + $0xf94] ss:$24 sps:$4 sm:$0xff]   ;;  %v6738_v22 = vld [vmem:[#allocation5 + $0x390] ss:$24 sps:$4 sm:$0xff]   ;;  %p7875_p0 = pnand %p7874_p13, %p7868_p10 }
  0x52   :  { %4902 = vmatprep.subr.bf16.mxu0 %v6668_v29  ;;  %v6741_v23 = vld [vmem:[#allocation5 + $0xf90] ss:$24 sps:$4 sm:$0xff]   ;;  %v6746_v24 = vld [vmem:[#allocation5 + $0x3c4] ss:$24 sps:$4 sm:$0xff]   ;;  %v6744_v26 = vld [vmem:[#allocation5 + $0x3c0] ss:$24 sps:$4 sm:$0xff]  }
  0x53   :  { %v6749_v25 = vld [vmem:[#allocation5 + $0xfc4] ss:$24 sps:$4 sm:$0xff]   ;;  %v6747_v27 = vld [vmem:[#allocation5 + $0xfc0] ss:$24 sps:$4 sm:$0xff]   ;;  %v6752_v28 = vld [vmem:[#allocation5 + $0x3f4] ss:$24 sps:$4 sm:$0xff]  }
  0x54   :  { %4739 = vmatpush1.bf16.msra.mxu1 %v6670_v30  ;;  %v6755_v29 = vld [vmem:[#allocation5 + $0xff4] ss:$24 sps:$4 sm:$0xff]   ;;  %v6750_v30 = vld [vmem:[#allocation5 + $0x3f0] ss:$24 sps:$4 sm:$0xff]   ;;  %v6768_v46 = vld [vmem:[#allocation5 + $0x480] ss:$24 sps:$4 sm:$0xff]  }
  0x55   :  { %4903 = vmatpush1.bf16.msra.mxu0 %v6671_v31  ;;  %4740 = vmatprep.subr.bf16.mxu1 %v6672_v32  ;;  %v6753_v31 = vld [vmem:[#allocation5 + $0xff0] ss:$24 sps:$4 sm:$0xff]   ;;  %v6758_v32 = vld [vmem:[#allocation5 + $0x424] ss:$24 sps:$4 sm:$0xff]   ;;  %v6779_v50 = vld [vmem:[#allocation5 + $0x10b4] ss:$24 sps:$4 sm:$0xff]  }
  0x56   :  { %4904 = vmatprep.subr.bf16.mxu0 %v6674_v33  ;;  %v6761_v33 = vld [vmem:[#allocation5 + $0x1024] ss:$24 sps:$4 sm:$0xff]   ;;  %v6801_v5 = vld [vmem:[#allocation5 + $0x1170] ss:$24 sps:$4 sm:$0xff]  }
  0x57   :  { %v6806_v6 = vld [vmem:[#allocation5 + $0x5a4] ss:$24 sps:$4 sm:$0xff]  }
  0x58   :  { %4741 = vmatpush1.bf16.msra.mxu1 %v6676_v34  ;;  %v55_v34 = vld [vmem:[#allocation2 + $0x18] sm:$0xff] }
  0x59   :  { %4905 = vmatpush1.bf16.msra.mxu0 %v6677_v35  ;;  %4742 = vmatprep.subr.bf16.mxu1 %v6678_v36  ;;  %v6756_v35 = vld [vmem:[#allocation5 + $0x420] ss:$24 sps:$4 sm:$0xff]   ;;  %v7969_v36 = vpack.c.bf16 %v55_v34, %v55_v34 }
  0x5a   :  { %4906 = vmatprep.subr.bf16.mxu0 %v6680_v37  ;;  %v6759_v37 = vld [vmem:[#allocation5 + $0x1020] ss:$24 sps:$4 sm:$0xff]  }
  0x5b   :  { %v6828_v34 = vld [vmem:[#allocation5 + $0x660] ss:$24 sps:$4 sm:$0xff]  }
  0x5c   :  { %4743 = vmatpush1.bf16.msra.mxu1 %v6682_v38  ;;  %v63_v38 = vld [vmem:[#allocation2 + $0x58] sm:$0xff] }
  0x5d   :  { %4907 = vmatpush1.bf16.msra.mxu0 %v6683_v39  ;;  %4744 = vmatprep.subr.bf16.mxu1 %v6684_v40  ;;  %v6764_v39 = vld [vmem:[#allocation5 + $0x454] ss:$24 sps:$4 sm:$0xff]  }
  0x5e   :  { %4908 = vmatprep.subr.bf16.mxu0 %v6686_v41  ;;  %v6767_v40 = vld [vmem:[#allocation5 + $0x1054] ss:$24 sps:$4 sm:$0xff]   ;;  %v7971_v41 = vpack.c.bf16 %v63_v38, %v63_v38 }
  0x5f   :  { %v6839_v38 = vld [vmem:[#allocation5 + $0x1294] ss:$24 sps:$4 sm:$0xff]  }
  0x60   :  { %4745 = vmatpush1.bf16.msra.mxu1 %v6688_v42  ;;  %v6762_v42 = vld [vmem:[#allocation5 + $0x450] ss:$24 sps:$4 sm:$0xff]  }
  0x61   :  { %4909 = vmatpush1.bf16.msra.mxu0 %v6689_v43  ;;  %4746 = vmatprep.subr.bf16.mxu1 %v6690_v44  ;;  %v6765_v43 = vld [vmem:[#allocation5 + $0x1050] ss:$24 sps:$4 sm:$0xff]   ;;  %v6770_v44 = vld [vmem:[#allocation5 + $0x484] ss:$24 sps:$4 sm:$0xff]  }
  0x62   :  { %4910 = vmatprep.subr.bf16.mxu0 %v6692_v45  ;;  %v6773_v45 = vld [vmem:[#allocation5 + $0x1084] ss:$24 sps:$4 sm:$0xff]  }
  0x64   :  { %4747 = vmatpush1.bf16.msra.mxu1 %v6694_v47  ;;  %v6771_v47 = vld [vmem:[#allocation5 + $0x1080] ss:$24 sps:$4 sm:$0xff]  }
  0x65   :  { %4911 = vmatpush1.bf16.msra.mxu0 %v6695_v49  ;;  %4748 = vmatprep.subr.bf16.mxu1 %v6696_v51  ;;  %v6776_v49 = vld [vmem:[#allocation5 + $0x4b4] ss:$24 sps:$4 sm:$0xff]   ;;  %v6774_v51 = vld [vmem:[#allocation5 + $0x4b0] ss:$24 sps:$4 sm:$0xff]  }
  0x66   :  { %4912 = vmatprep.subr.bf16.mxu0 %v6698_v52  ;;  %v6777_v52 = vld [vmem:[#allocation5 + $0x10b0] ss:$24 sps:$4 sm:$0xff]  }
  0x68   :  { %4749 = vmatpush1.bf16.msra.mxu1 %v6700_v54  ;;  %v6782_v54 = vld [vmem:[#allocation5 + $0x4e4] ss:$24 sps:$4 sm:$0xff]  }
  0x69   :  { %4913 = vmatpush1.bf16.msra.mxu0 %v6701_v55  ;;  %4750 = vmatprep.subr.bf16.mxu1 %v6702_v56  ;;  %v6785_v55 = vld [vmem:[#allocation5 + $0x10e4] ss:$24 sps:$4 sm:$0xff]   ;;  %v6780_v56 = vld [vmem:[#allocation5 + $0x4e0] ss:$24 sps:$4 sm:$0xff]  }
  0x6a   :  { %4914 = vmatprep.subr.bf16.mxu0 %v6704_v57  ;;  %v6783_v57 = vld [vmem:[#allocation5 + $0x10e0] ss:$24 sps:$4 sm:$0xff]  }
  0x6c   :  { %4751 = vmatpush1.bf16.msra.mxu1 %v6706_v58  ;;  %v6788_v58 = vld [vmem:[#allocation5 + $0x514] ss:$24 sps:$4 sm:$0xff]  }
  0x6d   :  { %4915 = vmatpush1.bf16.msra.mxu0 %v6707_v59  ;;  %4752 = vmatprep.subr.bf16.mxu1 %v6708_v60  ;;  %v6791_v59 = vld [vmem:[#allocation5 + $0x1114] ss:$24 sps:$4 sm:$0xff]   ;;  %v6786_v60 = vld [vmem:[#allocation5 + $0x510] ss:$24 sps:$4 sm:$0xff]  }
  0x6e   :  { %4916 = vmatprep.subr.bf16.mxu0 %v6710_v61  ;;  %v6789_v61 = vld [vmem:[#allocation5 + $0x1110] ss:$24 sps:$4 sm:$0xff]  }
  0x70   :  { %4753 = vmatpush1.bf16.msra.mxu1 %v6712_v62  ;;  %v6794_v62 = vld [vmem:[#allocation5 + $0x544] ss:$24 sps:$4 sm:$0xff]  }
  0x71   :  { %4917 = vmatpush1.bf16.msra.mxu0 %v6713_v63  ;;  %4754 = vmatprep.subr.bf16.mxu1 %v6714_v0  ;;  %v6797_v63 = vld [vmem:[#allocation5 + $0x1144] ss:$24 sps:$4 sm:$0xff]   ;;  %v6792_v0 = vld [vmem:[#allocation5 + $0x540] ss:$24 sps:$4 sm:$0xff]  }
  0x72   :  { %4918 = vmatprep.subr.bf16.mxu0 %v6716_v1  ;;  %v6795_v1 = vld [vmem:[#allocation5 + $0x1140] ss:$24 sps:$4 sm:$0xff]  }
  0x74   :  { %4755 = vmatpush1.bf16.msra.mxu1 %v6718_v2  ;;  %v6800_v2 = vld [vmem:[#allocation5 + $0x574] ss:$24 sps:$4 sm:$0xff]  }
  0x75   :  { %4919 = vmatpush1.bf16.msra.mxu0 %v6719_v3  ;;  %4765 = vmatprep.subr.bf16.mxu1 %v6722_v4  ;;  %v6803_v3 = vld [vmem:[#allocation5 + $0x1174] ss:$24 sps:$4 sm:$0xff]   ;;  %v6798_v4 = vld [vmem:[#allocation5 + $0x570] ss:$24 sps:$4 sm:$0xff]  }
  0x76   :  { %4929 = vmatprep.subr.bf16.mxu0 %v6725_v7  ;;  %v6809_v7 = vld [vmem:[#allocation5 + $0x11a4] ss:$24 sps:$4 sm:$0xff]  }
  0x77   :  { %4757 = vmatmul.mubr.bf16.vlgmr.msra.gmra.mrb[0].mxu1 %v7963_v10 }
  0x78   :  { %4921 = vmatmul.mubr.bf16.vlgmr.msra.gmra.mrb[0].mxu0 %v7965_v11  ;;  %4766 = vmatpush1.bf16.msra.mxu1 %v6720_v8  ;;  %v6804_v8 = vld [vmem:[#allocation5 + $0x5a0] ss:$24 sps:$4 sm:$0xff]  }
  0x79   :  { %4930 = vmatpush1.bf16.msra.mxu0 %v6723_v9  ;;  %4767 = vmatprep.subr.bf16.mxu1 %v6728_v12  ;;  %v6807_v9 = vld [vmem:[#allocation5 + $0x11a0] ss:$24 sps:$4 sm:$0xff]   ;;  %v6812_v12 = vld [vmem:[#allocation5 + $0x5d4] ss:$24 sps:$4 sm:$0xff]  }
  0x7a   :  { %4931 = vmatprep.subr.bf16.mxu0 %v6731_v13  ;;  %4797 = vmatprep.mubr.bf16.mxu1 %v7969_v36  ;;  %v6815_v13 = vld [vmem:[#allocation5 + $0x11d4] ss:$24 sps:$4 sm:$0xff]  }
  0x7b   :  { %4961 = vmatprep.mubr.bf16.mxu0 %v7971_v41 }
  0x7c   :  { %4768 = vmatpush1.bf16.msra.mxu1 %v6726_v14  ;;  %v6810_v14 = vld [vmem:[#allocation5 + $0x5d0] ss:$24 sps:$4 sm:$0xff]  }
  0x7d   :  { %4932 = vmatpush1.bf16.msra.mxu0 %v6729_v15  ;;  %4769 = vmatprep.subr.bf16.mxu1 %v6734_v16  ;;  %v6813_v15 = vld [vmem:[#allocation5 + $0x11d0] ss:$24 sps:$4 sm:$0xff]   ;;  %v6818_v16 = vld [vmem:[#allocation5 + $0x604] ss:$24 sps:$4 sm:$0xff]  }
  0x7e   :  { %4933 = vmatprep.subr.bf16.mxu0 %v6737_v17  ;;  %v54_v17 = vld [vmem:[#allocation2 + $0x10] sm:$0xff] }
  0x80   :  { %4770 = vmatpush1.bf16.msra.mxu1 %v6732_v18  ;;  %v62_v18 = vld [vmem:[#allocation2 + $0x50] sm:$0xff] }
  0x81   :  { %4934 = vmatpush1.bf16.msra.mxu0 %v6735_v19  ;;  %4771 = vmatprep.subr.bf16.mxu1 %v6740_v20  ;;  %v6821_v19 = vld [vmem:[#allocation5 + $0x1204] ss:$24 sps:$4 sm:$0xff]   ;;  %v6816_v20 = vld [vmem:[#allocation5 + $0x600] ss:$24 sps:$4 sm:$0xff]  }
  0x82   :  { %4935 = vmatprep.subr.bf16.mxu0 %v6743_v21  ;;  %v6819_v21 = vld [vmem:[#allocation5 + $0x1200] ss:$24 sps:$4 sm:$0xff]  }
  0x84   :  { %4772 = vmatpush1.bf16.msra.mxu1 %v6738_v22  ;;  %v7975_v22 = vpack.c.bf16 %v54_v17, %v54_v17  ;;  %v6891_v17 = vld [vmem:[#allocation5 + $0x1440] ss:$24 sps:$4 sm:$0xff]  }
  0x85   :  { %4936 = vmatpush1.bf16.msra.mxu0 %v6741_v23  ;;  %4773 = vmatprep.subr.bf16.mxu1 %v6746_v24  ;;  %v7977_v23 = vpack.c.bf16 %v62_v18, %v62_v18  ;;  %v6824_v24 = vld [vmem:[#allocation5 + $0x634] ss:$24 sps:$4 sm:$0xff]  }
  0x86   :  { %4937 = vmatprep.subr.bf16.mxu0 %v6749_v25  ;;  %v6827_v25 = vld [vmem:[#allocation5 + $0x1234] ss:$24 sps:$4 sm:$0xff]  }
  0x87   :  { %v6896_v18 = vld [vmem:[#allocation5 + $0x874] ss:$24 sps:$4 sm:$0xff]  }
  0x88   :  { %4774 = vmatpush1.bf16.msra.mxu1 %v6744_v26  ;;  %v57_v26 = vld [vmem:[#allocation2 + $0x28] sm:$0xff] }
  0x89   :  { %4938 = vmatpush1.bf16.msra.mxu0 %v6747_v27  ;;  %4775 = vmatprep.subr.bf16.mxu1 %v6752_v28  ;;  %v6822_v27 = vld [vmem:[#allocation5 + $0x630] ss:$24 sps:$4 sm:$0xff]   ;;  %v7981_v28 = vpack.c.bf16 %v57_v26, %v57_v26  ;;  %v6900_v26 = vld [vmem:[#allocation5 + $0x8a0] ss:$24 sps:$4 sm:$0xff]  }
  0x8a   :  { %4939 = vmatprep.subr.bf16.mxu0 %v6755_v29  ;;  %v6825_v29 = vld [vmem:[#allocation5 + $0x1230] ss:$24 sps:$4 sm:$0xff]  }
  0x8c   :  { %4776 = vmatpush1.bf16.msra.mxu1 %v6750_v30  ;;  %v65_v30 = vld [vmem:[#allocation2 + $0x68] sm:$0xff] }
  0x8d   :  { %4940 = vmatpush1.bf16.msra.mxu0 %v6753_v31  ;;  %4777 = vmatprep.subr.bf16.mxu1 %v6758_v32  ;;  %v6830_v31 = vld [vmem:[#allocation5 + $0x664] ss:$24 sps:$4 sm:$0xff]  }
  0x8e   :  { %4941 = vmatprep.subr.bf16.mxu0 %v6761_v33  ;;  %v6833_v32 = vld [vmem:[#allocation5 + $0x1264] ss:$24 sps:$4 sm:$0xff]   ;;  %v7983_v33 = vpack.c.bf16 %v65_v30, %v65_v30  ;;  %v6911_v30 = vld [vmem:[#allocation5 + $0x14d4] ss:$24 sps:$4 sm:$0xff]  }
  0x90   :  { %4778 = vmatpush1.bf16.msra.mxu1 %v6756_v35  ;;  %v6831_v35 = vld [vmem:[#allocation5 + $0x1260] ss:$24 sps:$4 sm:$0xff]  }
  0x91   :  { %4942 = vmatpush1.bf16.msra.mxu0 %v6759_v37  ;;  %4779 = vmatprep.subr.bf16.mxu1 %v6764_v39  ;;  %v6836_v37 = vld [vmem:[#allocation5 + $0x694] ss:$24 sps:$4 sm:$0xff]   ;;  %v6834_v39 = vld [vmem:[#allocation5 + $0x690] ss:$24 sps:$4 sm:$0xff]  }
  0x92   :  { %4943 = vmatprep.subr.bf16.mxu0 %v6767_v40  ;;  %v6837_v40 = vld [vmem:[#allocation5 + $0x1290] ss:$24 sps:$4 sm:$0xff]  }
  0x94   :  { %4780 = vmatpush1.bf16.msra.mxu1 %v6762_v42  ;;  %v6842_v42 = vld [vmem:[#allocation5 + $0x6c4] ss:$24 sps:$4 sm:$0xff]  }
  0x95   :  { %4944 = vmatpush1.bf16.msra.mxu0 %v6765_v43  ;;  %4781 = vmatprep.subr.bf16.mxu1 %v6770_v44  ;;  %v6845_v43 = vld [vmem:[#allocation5 + $0x12c4] ss:$24 sps:$4 sm:$0xff]   ;;  %v6840_v44 = vld [vmem:[#allocation5 + $0x6c0] ss:$24 sps:$4 sm:$0xff]  }
  0x96   :  { %4945 = vmatprep.subr.bf16.mxu0 %v6773_v45  ;;  %v6843_v45 = vld [vmem:[#allocation5 + $0x12c0] ss:$24 sps:$4 sm:$0xff]  }
  0x98   :  { %4782 = vmatpush1.bf16.msra.mxu1 %v6768_v46  ;;  %v6848_v46 = vld [vmem:[#allocation5 + $0x6f4] ss:$24 sps:$4 sm:$0xff]  }
  0x99   :  { %4946 = vmatpush1.bf16.msra.mxu0 %v6771_v47  ;;  %4783 = vmatprep.subr.bf16.mxu1 %v6776_v49  ;;  %v6851_v47 = vld [vmem:[#allocation5 + $0x12f4] ss:$24 sps:$4 sm:$0xff]   ;;  %v6846_v49 = vld [vmem:[#allocation5 + $0x6f0] ss:$24 sps:$4 sm:$0xff]  }
  0x9a   :  { %4947 = vmatprep.subr.bf16.mxu0 %v6779_v50  ;;  %v6849_v50 = vld [vmem:[#allocation5 + $0x12f0] ss:$24 sps:$4 sm:$0xff]  }
  0x9c   :  { %4784 = vmatpush1.bf16.msra.mxu1 %v6774_v51  ;;  %v6854_v51 = vld [vmem:[#allocation5 + $0x724] ss:$24 sps:$4 sm:$0xff]  }
  0x9d   :  { %4948 = vmatpush1.bf16.msra.mxu0 %v6777_v52  ;;  %4785 = vmatprep.subr.bf16.mxu1 %v6782_v54  ;;  %v6857_v52 = vld [vmem:[#allocation5 + $0x1324] ss:$24 sps:$4 sm:$0xff]   ;;  %v6852_v54 = vld [vmem:[#allocation5 + $0x720] ss:$24 sps:$4 sm:$0xff]  }
  0x9e   :  { %4949 = vmatprep.subr.bf16.mxu0 %v6785_v55  ;;  %v6855_v55 = vld [vmem:[#allocation5 + $0x1320] ss:$24 sps:$4 sm:$0xff]  }
  0xa0   :  { %4786 = vmatpush1.bf16.msra.mxu1 %v6780_v56  ;;  %v6860_v56 = vld [vmem:[#allocation5 + $0x754] ss:$24 sps:$4 sm:$0xff]  }
  0xa1   :  { %4950 = vmatpush1.bf16.msra.mxu0 %v6783_v57  ;;  %4787 = vmatprep.subr.bf16.mxu1 %v6788_v58  ;;  %v6863_v57 = vld [vmem:[#allocation5 + $0x1354] ss:$24 sps:$4 sm:$0xff]   ;;  %v6858_v58 = vld [vmem:[#allocation5 + $0x750] ss:$24 sps:$4 sm:$0xff]  }
  0xa2   :  { %4951 = vmatprep.subr.bf16.mxu0 %v6791_v59  ;;  %v6861_v59 = vld [vmem:[#allocation5 + $0x1350] ss:$24 sps:$4 sm:$0xff]  }
  0xa4   :  { %4788 = vmatpush1.bf16.msra.mxu1 %v6786_v60  ;;  %v6866_v60 = vld [vmem:[#allocation5 + $0x784] ss:$24 sps:$4 sm:$0xff]  }
  0xa5   :  { %4952 = vmatpush1.bf16.msra.mxu0 %v6789_v61  ;;  %4789 = vmatprep.subr.bf16.mxu1 %v6794_v62  ;;  %v6869_v61 = vld [vmem:[#allocation5 + $0x1384] ss:$24 sps:$4 sm:$0xff]   ;;  %v6864_v62 = vld [vmem:[#allocation5 + $0x780] ss:$24 sps:$4 sm:$0xff]  }
  0xa6   :  { %4953 = vmatprep.subr.bf16.mxu0 %v6797_v63  ;;  %v6867_v63 = vld [vmem:[#allocation5 + $0x1380] ss:$24 sps:$4 sm:$0xff]  }
  0xa8   :  { %4790 = vmatpush1.bf16.msra.mxu1 %v6792_v0  ;;  %v6872_v0 = vld [vmem:[#allocation5 + $0x7b4] ss:$24 sps:$4 sm:$0xff]  }
  0xa9   :  { %4954 = vmatpush1.bf16.msra.mxu0 %v6795_v1  ;;  %4791 = vmatprep.subr.bf16.mxu1 %v6800_v2  ;;  %v6875_v1 = vld [vmem:[#allocation5 + $0x13b4] ss:$24 sps:$4 sm:$0xff]   ;;  %v6870_v2 = vld [vmem:[#allocation5 + $0x7b0] ss:$24 sps:$4 sm:$0xff]  }
  0xaa   :  { %4955 = vmatprep.subr.bf16.mxu0 %v6803_v3  ;;  %v6873_v3 = vld [vmem:[#allocation5 + $0x13b0] ss:$24 sps:$4 sm:$0xff]  }
  0xac   :  { %4792 = vmatpush1.bf16.msra.mxu1 %v6798_v4  ;;  %v6878_v4 = vld [vmem:[#allocation5 + $0x7e4] ss:$24 sps:$4 sm:$0xff]  }
  0xad   :  { %4956 = vmatpush1.bf16.msra.mxu0 %v6801_v5  ;;  %4793 = vmatprep.subr.bf16.mxu1 %v6806_v6  ;;  %v6881_v5 = vld [vmem:[#allocation5 + $0x13e4] ss:$24 sps:$4 sm:$0xff]   ;;  %v6876_v6 = vld [vmem:[#allocation5 + $0x7e0] ss:$24 sps:$4 sm:$0xff]  }
  0xae   :  { %4957 = vmatprep.subr.bf16.mxu0 %v6809_v7  ;;  %v6879_v7 = vld [vmem:[#allocation5 + $0x13e0] ss:$24 sps:$4 sm:$0xff]  }
  0xb0   :  { %4794 = vmatpush1.bf16.msra.mxu1 %v6804_v8  ;;  %v6884_v8 = vld [vmem:[#allocation5 + $0x814] ss:$24 sps:$4 sm:$0xff]  }
  0xb1   :  { %4958 = vmatpush1.bf16.msra.mxu0 %v6807_v9  ;;  %4795 = vmatprep.subr.bf16.mxu1 %v6812_v12  ;;  %v6887_v9 = vld [vmem:[#allocation5 + $0x1414] ss:$24 sps:$4 sm:$0xff]   ;;  %v6882_v12 = vld [vmem:[#allocation5 + $0x810] ss:$24 sps:$4 sm:$0xff]  }
  0xb2   :  { %4959 = vmatprep.subr.bf16.mxu0 %v6815_v13  ;;  %v6885_v13 = vld [vmem:[#allocation5 + $0x1410] ss:$24 sps:$4 sm:$0xff]  }
  0xb4   :  { %4796 = vmatpush1.bf16.msra.mxu1 %v6810_v14  ;;  %v6890_v14 = vld [vmem:[#allocation5 + $0x844] ss:$24 sps:$4 sm:$0xff]  }
  0xb5   :  { %4960 = vmatpush1.bf16.msra.mxu0 %v6813_v15  ;;  %4806 = vmatprep.subr.bf16.mxu1 %v6818_v16  ;;  %v6893_v15 = vld [vmem:[#allocation5 + $0x1444] ss:$24 sps:$4 sm:$0xff]   ;;  %v6888_v16 = vld [vmem:[#allocation5 + $0x840] ss:$24 sps:$4 sm:$0xff]  }
  0xb6   :  { %4970 = vmatprep.subr.bf16.mxu0 %v6821_v19  ;;  %v6899_v19 = vld [vmem:[#allocation5 + $0x1474] ss:$24 sps:$4 sm:$0xff]  }
  0xb7   :  { %4798 = vmatmul.mubr.bf16.vlgmr.msra.gmra.mrb[0].mxu1 %v7975_v22 }
  0xb8   :  { %4962 = vmatmul.mubr.bf16.vlgmr.msra.gmra.mrb[0].mxu0 %v7977_v23  ;;  %4807 = vmatpush1.bf16.msra.mxu1 %v6816_v20  ;;  %v6894_v20 = vld [vmem:[#allocation5 + $0x870] ss:$24 sps:$4 sm:$0xff]  }
  0xb9   :  { %4971 = vmatpush1.bf16.msra.mxu0 %v6819_v21  ;;  %4808 = vmatprep.subr.bf16.mxu1 %v6824_v24  ;;  %v6897_v21 = vld [vmem:[#allocation5 + $0x1470] ss:$24 sps:$4 sm:$0xff]   ;;  %v6902_v24 = vld [vmem:[#allocation5 + $0x8a4] ss:$24 sps:$4 sm:$0xff]  }
  0xba   :  { %4972 = vmatprep.subr.bf16.mxu0 %v6827_v25  ;;  %4838 = vmatprep.mubr.bf16.mxu1 %v7981_v28  ;;  %v6905_v25 = vld [vmem:[#allocation5 + $0x14a4] ss:$24 sps:$4 sm:$0xff]  }
  0xbb   :  { %5002 = vmatprep.mubr.bf16.mxu0 %v7983_v33 }
  0xbc   :  { %4809 = vmatpush1.bf16.msra.mxu1 %v6822_v27  ;;  %v6903_v27 = vld [vmem:[#allocation5 + $0x14a0] ss:$24 sps:$4 sm:$0xff]  }
  0xbd   :  { %4973 = vmatpush1.bf16.msra.mxu0 %v6825_v29  ;;  %4810 = vmatprep.subr.bf16.mxu1 %v6830_v31  ;;  %v6908_v29 = vld [vmem:[#allocation5 + $0x8d4] ss:$24 sps:$4 sm:$0xff]   ;;  %v6906_v31 = vld [vmem:[#allocation5 + $0x8d0] ss:$24 sps:$4 sm:$0xff]  }
  0xbe   :  { %4974 = vmatprep.subr.bf16.mxu0 %v6833_v32  ;;  %v6909_v32 = vld [vmem:[#allocation5 + $0x14d0] ss:$24 sps:$4 sm:$0xff]  }
  0xc0   :  { %4811 = vmatpush1.bf16.msra.mxu1 %v6828_v34  ;;  %v6914_v34 = vld [vmem:[#allocation5 + $0x904] ss:$24 sps:$4 sm:$0xff]  }
  0xc1   :  { %4975 = vmatpush1.bf16.msra.mxu0 %v6831_v35  ;;  %4812 = vmatprep.subr.bf16.mxu1 %v6836_v37  ;;  %v56_v35 = vld [vmem:[#allocation2 + $0x20] sm:$0xff] }
  0xc2   :  { %4976 = vmatprep.subr.bf16.mxu0 %v6839_v38  ;;  %v64_v37 = vld [vmem:[#allocation2 + $0x60] sm:$0xff] }
  0xc3   :  { %v6917_v38 = vld [vmem:[#allocation5 + $0x1504] ss:$24 sps:$4 sm:$0xff]  }
  0xc4   :  { %4813 = vmatpush1.bf16.msra.mxu1 %v6834_v39  ;;  %v6912_v39 = vld [vmem:[#allocation5 + $0x900] ss:$24 sps:$4 sm:$0xff]  }
  0xc5   :  { %4977 = vmatpush1.bf16.msra.mxu0 %v6837_v40  ;;  %4814 = vmatprep.subr.bf16.mxu1 %v6842_v42  ;;  %v6915_v40 = vld [vmem:[#allocation5 + $0x1500] ss:$24 sps:$4 sm:$0xff]   ;;  %v7987_v42 = vpack.c.bf16 %v56_v35, %v56_v35  ;;  %v6981_v35 = vld [vmem:[#allocation5 + $0x1710] ss:$24 sps:$4 sm:$0xff]  }
  0xc6   :  { %4978 = vmatprep.subr.bf16.mxu0 %v6845_v43  ;;  %v7989_v43 = vpack.c.bf16 %v64_v37, %v64_v37  ;;  %v6986_v37 = vld [vmem:[#allocation5 + $0xb44] ss:$24 sps:$4 sm:$0xff]  }
  0xc8   :  { %4815 = vmatpush1.bf16.msra.mxu1 %v6840_v44  ;;  %v59_v44 = vld [vmem:[#allocation2 + $0x38] sm:$0xff] }
  0xc9   :  { %4979 = vmatpush1.bf16.msra.mxu0 %v6843_v45  ;;  %4816 = vmatprep.subr.bf16.mxu1 %v6848_v46  ;;  %v67_v45 = vld [vmem:[#allocation2 + $0x78] sm:$0xff]  ;;  %v6920_v46 = vld [vmem:[#allocation5 + $0x934] ss:$24 sps:$4 sm:$0xff]  }
  0xca   :  { %4980 = vmatprep.subr.bf16.mxu0 %v6851_v47  ;;  %v6923_v47 = vld [vmem:[#allocation5 + $0x1534] ss:$24 sps:$4 sm:$0xff]  }
  0xcc   :  { %4817 = vmatpush1.bf16.msra.mxu1 %v6846_v49  ;;  %v7991_v49 = vpack.c.bf16 %v59_v44, %v59_v44  ;;  %v6992_v44 = vld [vmem:[#allocation5 + $0xb74] ss:$24 sps:$4 sm:$0xff]  }
  0xcd   :  { %4981 = vmatpush1.bf16.msra.mxu0 %v6849_v50  ;;  %4818 = vmatprep.subr.bf16.mxu1 %v6854_v51  ;;  %v7993_v50 = vpack.c.bf16 %v67_v45, %v67_v45  ;;  %v6918_v51 = vld [vmem:[#allocation5 + $0x930] ss:$24 sps:$4 sm:$0xff]   ;;  %v6995_v45 = vld [vmem:[#allocation5 + $0x1774] ss:$24 sps:$4 sm:$0xff]  }
  0xce   :  { %4982 = vmatprep.subr.bf16.mxu0 %v6857_v52  ;;  %v6921_v52 = vld [vmem:[#allocation5 + $0x1530] ss:$24 sps:$4 sm:$0xff]  }
  0xd0   :  { %4819 = vmatpush1.bf16.msra.mxu1 %v6852_v54  ;;  %v6926_v54 = vld [vmem:[#allocation5 + $0x964] ss:$24 sps:$4 sm:$0xff]  }
  0xd1   :  { %4983 = vmatpush1.bf16.msra.mxu0 %v6855_v55  ;;  %4820 = vmatprep.subr.bf16.mxu1 %v6860_v56  ;;  %v6929_v55 = vld [vmem:[#allocation5 + $0x1564] ss:$24 sps:$4 sm:$0xff]   ;;  %v6924_v56 = vld [vmem:[#allocation5 + $0x960] ss:$24 sps:$4 sm:$0xff]  }
  0xd2   :  { %4984 = vmatprep.subr.bf16.mxu0 %v6863_v57  ;;  %v6927_v57 = vld [vmem:[#allocation5 + $0x1560] ss:$24 sps:$4 sm:$0xff]  }
  0xd4   :  { %4821 = vmatpush1.bf16.msra.mxu1 %v6858_v58  ;;  %v6932_v58 = vld [vmem:[#allocation5 + $0x994] ss:$24 sps:$4 sm:$0xff]  }
  0xd5   :  { %4985 = vmatpush1.bf16.msra.mxu0 %v6861_v59  ;;  %4822 = vmatprep.subr.bf16.mxu1 %v6866_v60  ;;  %v6935_v59 = vld [vmem:[#allocation5 + $0x1594] ss:$24 sps:$4 sm:$0xff]   ;;  %v6930_v60 = vld [vmem:[#allocation5 + $0x990] ss:$24 sps:$4 sm:$0xff]  }
  0xd6   :  { %4986 = vmatprep.subr.bf16.mxu0 %v6869_v61  ;;  %v6933_v61 = vld [vmem:[#allocation5 + $0x1590] ss:$24 sps:$4 sm:$0xff]  }
  0xd8   :  { %4823 = vmatpush1.bf16.msra.mxu1 %v6864_v62  ;;  %v6938_v62 = vld [vmem:[#allocation5 + $0x9c4] ss:$24 sps:$4 sm:$0xff]  }
  0xd9   :  { %4987 = vmatpush1.bf16.msra.mxu0 %v6867_v63  ;;  %4824 = vmatprep.subr.bf16.mxu1 %v6872_v0  ;;  %v6941_v63 = vld [vmem:[#allocation5 + $0x15c4] ss:$24 sps:$4 sm:$0xff]   ;;  %v6936_v0 = vld [vmem:[#allocation5 + $0x9c0] ss:$24 sps:$4 sm:$0xff]  }
  0xda   :  { %4988 = vmatprep.subr.bf16.mxu0 %v6875_v1  ;;  %v6939_v1 = vld [vmem:[#allocation5 + $0x15c0] ss:$24 sps:$4 sm:$0xff]  }
  0xdc   :  { %4825 = vmatpush1.bf16.msra.mxu1 %v6870_v2  ;;  %v6944_v2 = vld [vmem:[#allocation5 + $0x9f4] ss:$24 sps:$4 sm:$0xff]  }
  0xdd   :  { %4989 = vmatpush1.bf16.msra.mxu0 %v6873_v3  ;;  %4826 = vmatprep.subr.bf16.mxu1 %v6878_v4  ;;  %v6947_v3 = vld [vmem:[#allocation5 + $0x15f4] ss:$24 sps:$4 sm:$0xff]   ;;  %v6942_v4 = vld [vmem:[#allocation5 + $0x9f0] ss:$24 sps:$4 sm:$0xff]  }
  0xde   :  { %4990 = vmatprep.subr.bf16.mxu0 %v6881_v5  ;;  %v6945_v5 = vld [vmem:[#allocation5 + $0x15f0] ss:$24 sps:$4 sm:$0xff]  }
  0xe0   :  { %4827 = vmatpush1.bf16.msra.mxu1 %v6876_v6  ;;  %v6950_v6 = vld [vmem:[#allocation5 + $0xa24] ss:$24 sps:$4 sm:$0xff]  }
  0xe1   :  { %4991 = vmatpush1.bf16.msra.mxu0 %v6879_v7  ;;  %4828 = vmatprep.subr.bf16.mxu1 %v6884_v8  ;;  %v6953_v7 = vld [vmem:[#allocation5 + $0x1624] ss:$24 sps:$4 sm:$0xff]   ;;  %v6948_v8 = vld [vmem:[#allocation5 + $0xa20] ss:$24 sps:$4 sm:$0xff]  }
  0xe2   :  { %4992 = vmatprep.subr.bf16.mxu0 %v6887_v9  ;;  %v6951_v9 = vld [vmem:[#allocation5 + $0x1620] ss:$24 sps:$4 sm:$0xff]  }
  0xe4   :  { %4829 = vmatpush1.bf16.msra.mxu1 %v6882_v12  ;;  %v6956_v12 = vld [vmem:[#allocation5 + $0xa54] ss:$24 sps:$4 sm:$0xff]  }
  0xe5   :  { %4993 = vmatpush1.bf16.msra.mxu0 %v6885_v13  ;;  %4830 = vmatprep.subr.bf16.mxu1 %v6890_v14  ;;  %v6959_v13 = vld [vmem:[#allocation5 + $0x1654] ss:$24 sps:$4 sm:$0xff]   ;;  %v6954_v14 = vld [vmem:[#allocation5 + $0xa50] ss:$24 sps:$4 sm:$0xff]  }
  0xe6   :  { %4994 = vmatprep.subr.bf16.mxu0 %v6893_v15  ;;  %v6957_v15 = vld [vmem:[#allocation5 + $0x1650] ss:$24 sps:$4 sm:$0xff]  }
  0xe8   :  { %4831 = vmatpush1.bf16.msra.mxu1 %v6888_v16  ;;  %v6962_v16 = vld [vmem:[#allocation5 + $0xa84] ss:$24 sps:$4 sm:$0xff]  }
  0xe9   :  { %4995 = vmatpush1.bf16.msra.mxu0 %v6891_v17  ;;  %4832 = vmatprep.subr.bf16.mxu1 %v6896_v18  ;;  %v6965_v17 = vld [vmem:[#allocation5 + $0x1684] ss:$24 sps:$4 sm:$0xff]   ;;  %v6960_v18 = vld [vmem:[#allocation5 + $0xa80] ss:$24 sps:$4 sm:$0xff]  }
  0xea   :  { %4996 = vmatprep.subr.bf16.mxu0 %v6899_v19  ;;  %v6963_v19 = vld [vmem:[#allocation5 + $0x1680] ss:$24 sps:$4 sm:$0xff]  }
  0xec   :  { %4833 = vmatpush1.bf16.msra.mxu1 %v6894_v20  ;;  %v6968_v20 = vld [vmem:[#allocation5 + $0xab4] ss:$24 sps:$4 sm:$0xff]  }
  0xed   :  { %4997 = vmatpush1.bf16.msra.mxu0 %v6897_v21  ;;  %4834 = vmatprep.subr.bf16.mxu1 %v6902_v24  ;;  %v6971_v21 = vld [vmem:[#allocation5 + $0x16b4] ss:$24 sps:$4 sm:$0xff]   ;;  %v6966_v24 = vld [vmem:[#allocation5 + $0xab0] ss:$24 sps:$4 sm:$0xff]  }
  0xee   :  { %4998 = vmatprep.subr.bf16.mxu0 %v6905_v25  ;;  %v6969_v25 = vld [vmem:[#allocation5 + $0x16b0] ss:$24 sps:$4 sm:$0xff]  }
  0xf0   :  { %4835 = vmatpush1.bf16.msra.mxu1 %v6900_v26  ;;  %v6974_v26 = vld [vmem:[#allocation5 + $0xae4] ss:$24 sps:$4 sm:$0xff]  }
  0xf1   :  { %4999 = vmatpush1.bf16.msra.mxu0 %v6903_v27  ;;  %4836 = vmatprep.subr.bf16.mxu1 %v6908_v29  ;;  %v6977_v27 = vld [vmem:[#allocation5 + $0x16e4] ss:$24 sps:$4 sm:$0xff]   ;;  %v6972_v29 = vld [vmem:[#allocation5 + $0xae0] ss:$24 sps:$4 sm:$0xff]  }
  0xf2   :  { %5000 = vmatprep.subr.bf16.mxu0 %v6911_v30  ;;  %v6975_v30 = vld [vmem:[#allocation5 + $0x16e0] ss:$24 sps:$4 sm:$0xff]  }
  0xf4   :  { %4837 = vmatpush1.bf16.msra.mxu1 %v6906_v31  ;;  %v6980_v31 = vld [vmem:[#allocation5 + $0xb14] ss:$24 sps:$4 sm:$0xff]  }
  0xf5   :  { %5001 = vmatpush1.bf16.msra.mxu0 %v6909_v32  ;;  %4847 = vmatprep.subr.bf16.mxu1 %v6914_v34  ;;  %v6983_v32 = vld [vmem:[#allocation5 + $0x1714] ss:$24 sps:$4 sm:$0xff]   ;;  %v6978_v34 = vld [vmem:[#allocation5 + $0xb10] ss:$24 sps:$4 sm:$0xff]  }
  0xf6   :  { %5011 = vmatprep.subr.bf16.mxu0 %v6917_v38  ;;  %v6989_v38 = vld [vmem:[#allocation5 + $0x1744] ss:$24 sps:$4 sm:$0xff]  }
  0xf7   :  { %4839 = vmatmul.mubr.bf16.vlgmr.msra.gmra.mrb[0].mxu1 %v7987_v42 }
  0xf8   :  { %5003 = vmatmul.mubr.bf16.vlgmr.msra.gmra.mrb[0].mxu0 %v7989_v43  ;;  %4848 = vmatpush1.bf16.msra.mxu1 %v6912_v39  ;;  %v6984_v39 = vld [vmem:[#allocation5 + $0xb40] ss:$24 sps:$4 sm:$0xff]  }
  0xf9   :  { %5012 = vmatpush1.bf16.msra.mxu0 %v6915_v40  ;;  %4849 = vmatprep.subr.bf16.mxu1 %v6920_v46  ;;  %v6987_v40 = vld [vmem:[#allocation5 + $0x1740] ss:$24 sps:$4 sm:$0xff]   ;;  %v6990_v46 = vld [vmem:[#allocation5 + $0xb70] ss:$24 sps:$4 sm:$0xff]  }
  0xfa   :  { %5013 = vmatprep.subr.bf16.mxu0 %v6923_v47  ;;  %4879 = vmatprep.mubr.bf16.mxu1 %v7991_v49  ;;  %v6993_v47 = vld [vmem:[#allocation5 + $0x1770] ss:$24 sps:$4 sm:$0xff]  }
  0xfb   :  { %5043 = vmatprep.mubr.bf16.mxu0 %v7993_v50 }
  0xfc   :  { %4850 = vmatpush1.bf16.msra.mxu1 %v6918_v51  ;;  %v6998_v51 = vld [vmem:[#allocation5 + $0xba4] ss:$24 sps:$4 sm:$0xff]  }
  0xfd   :  { %5014 = vmatpush1.bf16.msra.mxu0 %v6921_v52  ;;  %4851 = vmatprep.subr.bf16.mxu1 %v6926_v54  ;;  %v7001_v52 = vld [vmem:[#allocation5 + $0x17a4] ss:$24 sps:$4 sm:$0xff]   ;;  %v6996_v54 = vld [vmem:[#allocation5 + $0xba0] ss:$24 sps:$4 sm:$0xff]  }
  0xfe   :  { %5015 = vmatprep.subr.bf16.mxu0 %v6929_v55  ;;  %v6999_v55 = vld [vmem:[#allocation5 + $0x17a0] ss:$24 sps:$4 sm:$0xff]  }
 0x100   :  { %4852 = vmatpush1.bf16.msra.mxu1 %v6924_v56  ;;  %v7004_v56 = vld [vmem:[#allocation5 + $0xbd4] ss:$24 sps:$4 sm:$0xff]  }
 0x101   :  { %5016 = vmatpush1.bf16.msra.mxu0 %v6927_v57  ;;  %4853 = vmatprep.subr.bf16.mxu1 %v6932_v58  ;;  %v7007_v57 = vld [vmem:[#allocation5 + $0x17d4] ss:$24 sps:$4 sm:$0xff]   ;;  %v7002_v58 = vld [vmem:[#allocation5 + $0xbd0] ss:$24 sps:$4 sm:$0xff]  }
 0x102   :  { %5017 = vmatprep.subr.bf16.mxu0 %v6935_v59  ;;  %v7005_v59 = vld [vmem:[#allocation5 + $0x17d0] ss:$24 sps:$4 sm:$0xff]  }
 0x104   :  { %4854 = vmatpush1.bf16.msra.mxu1 %v6930_v60  ;;  %v58_v60 = vld [vmem:[#allocation2 + $0x30] sm:$0xff] }
 0x105   :  { %5018 = vmatpush1.bf16.msra.mxu0 %v6933_v61  ;;  %4855 = vmatprep.subr.bf16.mxu1 %v6938_v62  ;;  %v66_v61 = vld [vmem:[#allocation2 + $0x70] sm:$0xff]  ;;  %v7010_v62 = vld [vmem:[#allocation5 + $0xc] ss:$24 sps:$4 sm:$0xff]  }
 0x106   :  { %5019 = vmatprep.subr.bf16.mxu0 %v6941_v63  ;;  %v7013_v63 = vld [vmem:[#allocation5 + $0x14] ss:$24 sps:$4 sm:$0xff]  }
 0x108   :  { %4856 = vmatpush1.bf16.msra.mxu1 %v6936_v0  ;;  %v7999_v0 = vpack.c.bf16 %v58_v60, %v58_v60  ;;  %v7077_v60 = vld [vmem:[#allocation5 + $0x220] ss:$24 sps:$4 sm:$0xff]  }
 0x109   :  { %5020 = vmatpush1.bf16.msra.mxu0 %v6939_v1  ;;  %4857 = vmatprep.subr.bf16.mxu1 %v6944_v2  ;;  %v8001_v1 = vpack.c.bf16 %v66_v61, %v66_v61  ;;  %v7008_v2 = vld [vmem:[#allocation5 + $0x8] ss:$24 sps:$4 sm:$0xff]   ;;  %v7082_v61 = vld [vmem:[#allocation5 + $0x24c] ss:$24 sps:$4 sm:$0xff]  }
 0x10a   :  { %5021 = vmatprep.subr.bf16.mxu0 %v6947_v3  ;;  %v7011_v3 = vld [vmem:[#allocation5 + $0x10] ss:$24 sps:$4 sm:$0xff]  }
 0x10c   :  { %4858 = vmatpush1.bf16.msra.mxu1 %v6942_v4  ;;  %v7016_v4 = vld [vmem:[#allocation5 + $0x3c] ss:$24 sps:$4 sm:$0xff]  }
 0x10d   :  { %5022 = vmatpush1.bf16.msra.mxu0 %v6945_v5  ;;  %4859 = vmatprep.subr.bf16.mxu1 %v6950_v6  ;;  %v7019_v5 = vld [vmem:[#allocation5 + $0x44] ss:$24 sps:$4 sm:$0xff]   ;;  %v7014_v6 = vld [vmem:[#allocation5 + $0x38] ss:$24 sps:$4 sm:$0xff]  }
 0x10e   :  { %5023 = vmatprep.subr.bf16.mxu0 %v6953_v7  ;;  %v7017_v7 = vld [vmem:[#allocation5 + $0x40] ss:$24 sps:$4 sm:$0xff]  }
 0x110   :  { %4860 = vmatpush1.bf16.msra.mxu1 %v6948_v8  ;;  %v7022_v8 = vld [vmem:[#allocation5 + $0x6c] ss:$24 sps:$4 sm:$0xff]  }
 0x111   :  { %5024 = vmatpush1.bf16.msra.mxu0 %v6951_v9  ;;  %4861 = vmatprep.subr.bf16.mxu1 %v6956_v12  ;;  %v7025_v9 = vld [vmem:[#allocation5 + $0x74] ss:$24 sps:$4 sm:$0xff]   ;;  %v7020_v12 = vld [vmem:[#allocation5 + $0x68] ss:$24 sps:$4 sm:$0xff]  }
 0x112   :  { %5025 = vmatprep.subr.bf16.mxu0 %v6959_v13  ;;  %v7023_v13 = vld [vmem:[#allocation5 + $0x70] ss:$24 sps:$4 sm:$0xff]  }
 0x114   :  { %4862 = vmatpush1.bf16.msra.mxu1 %v6954_v14  ;;  %v7028_v14 = vld [vmem:[#allocation5 + $0x9c] ss:$24 sps:$4 sm:$0xff]  }
 0x115   :  { %5026 = vmatpush1.bf16.msra.mxu0 %v6957_v15  ;;  %4863 = vmatprep.subr.bf16.mxu1 %v6962_v16  ;;  %v7031_v15 = vld [vmem:[#allocation5 + $0xa4] ss:$24 sps:$4 sm:$0xff]   ;;  %v7026_v16 = vld [vmem:[#allocation5 + $0x98] ss:$24 sps:$4 sm:$0xff]  }
 0x116   :  { %5027 = vmatprep.subr.bf16.mxu0 %v6965_v17  ;;  %v7029_v17 = vld [vmem:[#allocation5 + $0xa0] ss:$24 sps:$4 sm:$0xff]  }
 0x118   :  { %4864 = vmatpush1.bf16.msra.mxu1 %v6960_v18  ;;  %v7034_v18 = vld [vmem:[#allocation5 + $0xcc] ss:$24 sps:$4 sm:$0xff]  }
 0x119   :  { %5028 = vmatpush1.bf16.msra.mxu0 %v6963_v19  ;;  %4865 = vmatprep.subr.bf16.mxu1 %v6968_v20  ;;  %v7037_v19 = vld [vmem:[#allocation5 + $0xd4] ss:$24 sps:$4 sm:$0xff]   ;;  %v7032_v20 = vld [vmem:[#allocation5 + $0xc8] ss:$24 sps:$4 sm:$0xff]  }
 0x11a   :  { %5029 = vmatprep.subr.bf16.mxu0 %v6971_v21  ;;  %v7035_v21 = vld [vmem:[#allocation5 + $0xd0] ss:$24 sps:$4 sm:$0xff]  }
 0x11c   :  { %4866 = vmatpush1.bf16.msra.mxu1 %v6966_v24  ;;  %v7043_v24 = vld [vmem:[#allocation5 + $0x104] ss:$24 sps:$4 sm:$0xff]  }
 0x11d   :  { %5030 = vmatpush1.bf16.msra.mxu0 %v6969_v25  ;;  %4867 = vmatprep.subr.bf16.mxu1 %v6974_v26  ;;  %v7038_v25 = vld [vmem:[#allocation5 + $0xf8] ss:$24 sps:$4 sm:$0xff]  }
 0x11e   :  { %5031 = vmatprep.subr.bf16.mxu0 %v6977_v27  ;;  %v7041_v26 = vld [vmem:[#allocation5 + $0x100] ss:$24 sps:$4 sm:$0xff]   ;;  %v7046_v27 = vld [vmem:[#allocation5 + $0x12c] ss:$24 sps:$4 sm:$0xff]  }
 0x120   :  { %4868 = vmatpush1.bf16.msra.mxu1 %v6972_v29  ;;  %v7049_v29 = vld [vmem:[#allocation5 + $0x134] ss:$24 sps:$4 sm:$0xff]  }
 0x121   :  { %5032 = vmatpush1.bf16.msra.mxu0 %v6975_v30  ;;  %4869 = vmatprep.subr.bf16.mxu1 %v6980_v31  ;;  %v7044_v30 = vld [vmem:[#allocation5 + $0x128] ss:$24 sps:$4 sm:$0xff]  }
 0x122   :  { %5033 = vmatprep.subr.bf16.mxu0 %v6983_v32  ;;  %v7047_v31 = vld [vmem:[#allocation5 + $0x130] ss:$24 sps:$4 sm:$0xff]   ;;  %v7052_v32 = vld [vmem:[#allocation5 + $0x15c] ss:$24 sps:$4 sm:$0xff]  }
 0x124   :  { %4870 = vmatpush1.bf16.msra.mxu1 %v6978_v34  ;;  %v7055_v34 = vld [vmem:[#allocation5 + $0x164] ss:$24 sps:$4 sm:$0xff]  }
 0x125   :  { %5034 = vmatpush1.bf16.msra.mxu0 %v6981_v35  ;;  %4871 = vmatprep.subr.bf16.mxu1 %v6986_v37  ;;  %v7050_v35 = vld [vmem:[#allocation5 + $0x158] ss:$24 sps:$4 sm:$0xff]  }
 0x126   :  { %5035 = vmatprep.subr.bf16.mxu0 %v6989_v38  ;;  %v7053_v37 = vld [vmem:[#allocation5 + $0x160] ss:$24 sps:$4 sm:$0xff]   ;;  %v7058_v38 = vld [vmem:[#allocation5 + $0x18c] ss:$24 sps:$4 sm:$0xff]  }
 0x128   :  { %4872 = vmatpush1.bf16.msra.mxu1 %v6984_v39  ;;  %v7061_v39 = vld [vmem:[#allocation5 + $0x194] ss:$24 sps:$4 sm:$0xff]  }
 0x129   :  { %5036 = vmatpush1.bf16.msra.mxu0 %v6987_v40  ;;  %4873 = vmatprep.subr.bf16.mxu1 %v6992_v44  ;;  %v7056_v40 = vld [vmem:[#allocation5 + $0x188] ss:$24 sps:$4 sm:$0xff]  }
 0x12a   :  { %5037 = vmatprep.subr.bf16.mxu0 %v6995_v45  ;;  %v7059_v44 = vld [vmem:[#allocation5 + $0x190] ss:$24 sps:$4 sm:$0xff]   ;;  %v7064_v45 = vld [vmem:[#allocation5 + $0x1bc] ss:$24 sps:$4 sm:$0xff]  }
 0x12c   :  { %4874 = vmatpush1.bf16.msra.mxu1 %v6990_v46  ;;  %v7067_v46 = vld [vmem:[#allocation5 + $0x1c4] ss:$24 sps:$4 sm:$0xff]  }
 0x12d   :  { %5038 = vmatpush1.bf16.msra.mxu0 %v6993_v47  ;;  %4875 = vmatprep.subr.bf16.mxu1 %v6998_v51  ;;  %v7062_v47 = vld [vmem:[#allocation5 + $0x1b8] ss:$24 sps:$4 sm:$0xff]  }
 0x12e   :  { %5039 = vmatprep.subr.bf16.mxu0 %v7001_v52  ;;  %v7065_v51 = vld [vmem:[#allocation5 + $0x1c0] ss:$24 sps:$4 sm:$0xff]   ;;  %v7070_v52 = vld [vmem:[#allocation5 + $0x1ec] ss:$24 sps:$4 sm:$0xff]  }
 0x130   :  { %4876 = vmatpush1.bf16.msra.mxu1 %v6996_v54  ;;  %v7073_v54 = vld [vmem:[#allocation5 + $0x1f4] ss:$24 sps:$4 sm:$0xff]  }
 0x131   :  { %5040 = vmatpush1.bf16.msra.mxu0 %v6999_v55  ;;  %4877 = vmatprep.subr.bf16.mxu1 %v7004_v56  ;;  %v7068_v55 = vld [vmem:[#allocation5 + $0x1e8] ss:$24 sps:$4 sm:$0xff]  }
 0x132   :  { %5041 = vmatprep.subr.bf16.mxu0 %v7007_v57  ;;  %v7071_v56 = vld [vmem:[#allocation5 + $0x1f0] ss:$24 sps:$4 sm:$0xff]   ;;  %v7076_v57 = vld [vmem:[#allocation5 + $0x21c] ss:$24 sps:$4 sm:$0xff]  }
 0x134   :  { %4878 = vmatpush1.bf16.msra.mxu1 %v7002_v58  ;;  %v7079_v58 = vld [vmem:[#allocation5 + $0x224] ss:$24 sps:$4 sm:$0xff]  }
 0x135   :  { %5042 = vmatpush1.bf16.msra.mxu0 %v7005_v59  ;;  %5052 = vmatprep.subr.bf16.mxu1 %v7010_v62  ;;  %v7074_v59 = vld [vmem:[#allocation5 + $0x218] ss:$24 sps:$4 sm:$0xff]   ;;  %v7085_v62 = vld [vmem:[#allocation5 + $0x254] ss:$24 sps:$4 sm:$0xff]  }
 0x136   :  { %5380 = vmatprep.subr.bf16.mxu0 %v7013_v63  ;;  %v7080_v63 = vld [vmem:[#allocation5 + $0x248] ss:$24 sps:$4 sm:$0xff]  }
 0x137   :  { %4880 = vmatmul.mubr.bf16.vlgmr.msra.gmra.mrb[0].mxu1 %v7999_v0 }
 0x138   :  { %5044 = vmatmul.mubr.bf16.vlgmr.msra.gmra.mrb[0].mxu0 %v8001_v1  ;;  %5053 = vmatpush1.bf16.msra.mxu1 %v7008_v2  ;;  %v7083_v2 = vld [vmem:[#allocation5 + $0x250] ss:$24 sps:$4 sm:$0xff]  }
 0x139   :  { %5381 = vmatpush1.bf16.msra.mxu0 %v7011_v3  ;;  %5054 = vmatprep.subr.bf16.mxu1 %v7016_v4  ;;  %v7088_v3 = vld [vmem:[#allocation5 + $0x27c] ss:$24 sps:$4 sm:$0xff]  }
 0x13a   :  { %5382 = vmatprep.subr.bf16.mxu0 %v7019_v5  ;;  %5084 = vmatprep.mubr.bf16.mxu1 %v7957_v48  ;;  %v7091_v4 = vld [vmem:[#allocation5 + $0x284] ss:$24 sps:$4 sm:$0xff]   ;;  %v7086_v5 = vld [vmem:[#allocation5 + $0x278] ss:$24 sps:$4 sm:$0xff]  }
 0x13b   :  { %5412 = vmatprep.mubr.bf16.mxu0 %v7957_v48  ;;  %v7040_v48 = vld [vmem:[#allocation5 + $0xfc] ss:$24 sps:$4 sm:$0xff]  }
 0x13c   :  { %5055 = vmatpush1.bf16.msra.mxu1 %v7014_v6  ;;  %v7089_v6 = vld [vmem:[#allocation5 + $0x280] ss:$24 sps:$4 sm:$0xff]  }
 0x13d   :  { %5383 = vmatpush1.bf16.msra.mxu0 %v7017_v7  ;;  %5056 = vmatprep.subr.bf16.mxu1 %v7022_v8  ;;  %v7094_v7 = vld [vmem:[#allocation5 + $0x2ac] ss:$24 sps:$4 sm:$0xff]  }
 0x13e   :  { %5384 = vmatprep.subr.bf16.mxu0 %v7025_v9  ;;  %v7097_v8 = vld [vmem:[#allocation5 + $0x2b4] ss:$24 sps:$4 sm:$0xff]   ;;  %v7092_v9 = vld [vmem:[#allocation5 + $0x2a8] ss:$24 sps:$4 sm:$0xff]  }
 0x140   :  { %5057 = vmatpush1.bf16.msra.mxu1 %v7020_v12  ;;  %v7095_v12 = vld [vmem:[#allocation5 + $0x2b0] ss:$24 sps:$4 sm:$0xff]  }
 0x141   :  { %5385 = vmatpush1.bf16.msra.mxu0 %v7023_v13  ;;  %5058 = vmatprep.subr.bf16.mxu1 %v7028_v14  ;;  %v7100_v13 = vld [vmem:[#allocation5 + $0x2dc] ss:$24 sps:$4 sm:$0xff]  }
 0x142   :  { %5386 = vmatprep.subr.bf16.mxu0 %v7031_v15  ;;  %v7103_v14 = vld [vmem:[#allocation5 + $0x2e4] ss:$24 sps:$4 sm:$0xff]   ;;  %v7098_v15 = vld [vmem:[#allocation5 + $0x2d8] ss:$24 sps:$4 sm:$0xff]  }
 0x144   :  { %5059 = vmatpush1.bf16.msra.mxu1 %v7026_v16  ;;  %v7101_v16 = vld [vmem:[#allocation5 + $0x2e0] ss:$24 sps:$4 sm:$0xff]  }
 0x145   :  { %5387 = vmatpush1.bf16.msra.mxu0 %v7029_v17  ;;  %5060 = vmatprep.subr.bf16.mxu1 %v7034_v18  ;;  %v7106_v17 = vld [vmem:[#allocation5 + $0x30c] ss:$24 sps:$4 sm:$0xff]  }
 0x146   :  { %5388 = vmatprep.subr.bf16.mxu0 %v7037_v19  ;;  %v7109_v18 = vld [vmem:[#allocation5 + $0x314] ss:$24 sps:$4 sm:$0xff]   ;;  %v7104_v19 = vld [vmem:[#allocation5 + $0x308] ss:$24 sps:$4 sm:$0xff]  }
 0x148   :  { %5061 = vmatpush1.bf16.msra.mxu1 %v7032_v20  ;;  %v7107_v20 = vld [vmem:[#allocation5 + $0x310] ss:$24 sps:$4 sm:$0xff]  }
 0x149   :  { %5389 = vmatpush1.bf16.msra.mxu0 %v7035_v21  ;;  %5062 = vmatprep.subr.bf16.mxu1 %v7040_v48  ;;  %v7112_v21 = vld [vmem:[#allocation5 + $0x33c] ss:$24 sps:$4 sm:$0xff]  }
 0x14a   :  { %5390 = vmatprep.subr.bf16.mxu0 %v7043_v24  ;;  %v7115_v48 = vld [vmem:[#allocation5 + $0x344] ss:$24 sps:$4 sm:$0xff]   ;;  %v7110_v24 = vld [vmem:[#allocation5 + $0x338] ss:$24 sps:$4 sm:$0xff]  }
 0x14c   :  { %5063 = vmatpush1.bf16.msra.mxu1 %v7038_v25  ;;  %v7113_v25 = vld [vmem:[#allocation5 + $0x340] ss:$24 sps:$4 sm:$0xff]  }
 0x14d   :  { %5391 = vmatpush1.bf16.msra.mxu0 %v7041_v26  ;;  %5064 = vmatprep.subr.bf16.mxu1 %v7046_v27  ;;  %v7118_v26 = vld [vmem:[#allocation5 + $0x36c] ss:$24 sps:$4 sm:$0xff]  }
 0x14e   :  { %5392 = vmatprep.subr.bf16.mxu0 %v7049_v29  ;;  %v7121_v27 = vld [vmem:[#allocation5 + $0x374] ss:$24 sps:$4 sm:$0xff]   ;;  %v7116_v29 = vld [vmem:[#allocation5 + $0x368] ss:$24 sps:$4 sm:$0xff]  }
 0x150   :  { %5065 = vmatpush1.bf16.msra.mxu1 %v7044_v30  ;;  %v7119_v30 = vld [vmem:[#allocation5 + $0x370] ss:$24 sps:$4 sm:$0xff]  }
 0x151   :  { %5393 = vmatpush1.bf16.msra.mxu0 %v7047_v31  ;;  %5066 = vmatprep.subr.bf16.mxu1 %v7052_v32  ;;  %v7124_v31 = vld [vmem:[#allocation5 + $0x39c] ss:$24 sps:$4 sm:$0xff]   ;;  %v7122_v32 = vld [vmem:[#allocation5 + $0x398] ss:$24 sps:$4 sm:$0xff]  }
 0x152   :  { %5394 = vmatprep.subr.bf16.mxu0 %v7055_v34  ;;  %v7125_v34 = vld [vmem:[#allocation5 + $0x3a0] ss:$24 sps:$4 sm:$0xff]  }
 0x154   :  { %5067 = vmatpush1.bf16.msra.mxu1 %v7050_v35  ;;  %v7130_v35 = vld [vmem:[#allocation5 + $0x3cc] ss:$24 sps:$4 sm:$0xff]  }
 0x155   :  { %5395 = vmatpush1.bf16.msra.mxu0 %v7053_v37  ;;  %5068 = vmatprep.subr.bf16.mxu1 %v7058_v38  ;;  %v7133_v37 = vld [vmem:[#allocation5 + $0x3d4] ss:$24 sps:$4 sm:$0xff]   ;;  %v7128_v38 = vld [vmem:[#allocation5 + $0x3c8] ss:$24 sps:$4 sm:$0xff]  }
 0x156   :  { %5396 = vmatprep.subr.bf16.mxu0 %v7061_v39  ;;  %v7136_v39 = vld [vmem:[#allocation5 + $0x3fc] ss:$24 sps:$4 sm:$0xff]  }
 0x158   :  { %5069 = vmatpush1.bf16.msra.mxu1 %v7056_v40  ;;  %v7139_v40 = vld [vmem:[#allocation5 + $0x404] ss:$24 sps:$4 sm:$0xff]  }
 0x159   :  { %5397 = vmatpush1.bf16.msra.mxu0 %v7059_v44  ;;  %5070 = vmatprep.subr.bf16.mxu1 %v7064_v45  ;;  %v7134_v44 = vld [vmem:[#allocation5 + $0x3f8] ss:$24 sps:$4 sm:$0xff]  }
 0x15a   :  { %5398 = vmatprep.subr.bf16.mxu0 %v7067_v46  ;;  %v7137_v45 = vld [vmem:[#allocation5 + $0x400] ss:$24 sps:$4 sm:$0xff]   ;;  %v7142_v46 = vld [vmem:[#allocation5 + $0x42c] ss:$24 sps:$4 sm:$0xff]  }
 0x15c   :  { %5071 = vmatpush1.bf16.msra.mxu1 %v7062_v47  ;;  %v7145_v47 = vld [vmem:[#allocation5 + $0x434] ss:$24 sps:$4 sm:$0xff]  }
 0x15d   :  { %5399 = vmatpush1.bf16.msra.mxu0 %v7065_v51  ;;  %5072 = vmatprep.subr.bf16.mxu1 %v7070_v52  ;;  %v7140_v51 = vld [vmem:[#allocation5 + $0x428] ss:$24 sps:$4 sm:$0xff]  }
 0x15e   :  { %5400 = vmatprep.subr.bf16.mxu0 %v7073_v54  ;;  %v7143_v52 = vld [vmem:[#allocation5 + $0x430] ss:$24 sps:$4 sm:$0xff]   ;;  %v7148_v54 = vld [vmem:[#allocation5 + $0x45c] ss:$24 sps:$4 sm:$0xff]  }
 0x160   :  { %5073 = vmatpush1.bf16.msra.mxu1 %v7068_v55  ;;  %v7151_v55 = vld [vmem:[#allocation5 + $0x464] ss:$24 sps:$4 sm:$0xff]  }
 0x161   :  { %5401 = vmatpush1.bf16.msra.mxu0 %v7071_v56  ;;  %5074 = vmatprep.subr.bf16.mxu1 %v7076_v57  ;;  %v7146_v56 = vld [vmem:[#allocation5 + $0x458] ss:$24 sps:$4 sm:$0xff]  }
 0x162   :  { %5402 = vmatprep.subr.bf16.mxu0 %v7079_v58  ;;  %v7149_v57 = vld [vmem:[#allocation5 + $0x460] ss:$24 sps:$4 sm:$0xff]   ;;  %v7154_v58 = vld [vmem:[#allocation5 + $0x48c] ss:$24 sps:$4 sm:$0xff]  }
 0x164   :  { %5075 = vmatpush1.bf16.msra.mxu1 %v7074_v59  ;;  %v7157_v59 = vld [vmem:[#allocation5 + $0x494] ss:$24 sps:$4 sm:$0xff]  }
 0x165   :  { %5403 = vmatpush1.bf16.msra.mxu0 %v7077_v60  ;;  %5076 = vmatprep.subr.bf16.mxu1 %v7082_v61  ;;  %v7152_v60 = vld [vmem:[#allocation5 + $0x488] ss:$24 sps:$4 sm:$0xff]  }
 0x166   :  { %5404 = vmatprep.subr.bf16.mxu0 %v7085_v62  ;;  %v7155_v61 = vld [vmem:[#allocation5 + $0x490] ss:$24 sps:$4 sm:$0xff]   ;;  %v7160_v62 = vld [vmem:[#allocation5 + $0x4bc] ss:$24 sps:$4 sm:$0xff]  }
 0x168   :  { %5077 = vmatpush1.bf16.msra.mxu1 %v7080_v63  ;;  %v7163_v63 = vld [vmem:[#allocation5 + $0x4c4] ss:$24 sps:$4 sm:$0xff]  }
 0x169   :  { %5405 = vmatpush1.bf16.msra.mxu0 %v7083_v2  ;;  %5078 = vmatprep.subr.bf16.mxu1 %v7088_v3  ;;  %v7158_v2 = vld [vmem:[#allocation5 + $0x4b8] ss:$24 sps:$4 sm:$0xff]  }
 0x16a   :  { %5406 = vmatprep.subr.bf16.mxu0 %v7091_v4  ;;  %v7161_v3 = vld [vmem:[#allocation5 + $0x4c0] ss:$24 sps:$4 sm:$0xff]   ;;  %v7166_v4 = vld [vmem:[#allocation5 + $0x4ec] ss:$24 sps:$4 sm:$0xff]  }
 0x16c   :  { %5079 = vmatpush1.bf16.msra.mxu1 %v7086_v5  ;;  %v7169_v5 = vld [vmem:[#allocation5 + $0x4f4] ss:$24 sps:$4 sm:$0xff]  }
 0x16d   :  { %5407 = vmatpush1.bf16.msra.mxu0 %v7089_v6  ;;  %5080 = vmatprep.subr.bf16.mxu1 %v7094_v7  ;;  %v7164_v6 = vld [vmem:[#allocation5 + $0x4e8] ss:$24 sps:$4 sm:$0xff]  }
 0x16e   :  { %5408 = vmatprep.subr.bf16.mxu0 %v7097_v8  ;;  %v7167_v7 = vld [vmem:[#allocation5 + $0x4f0] ss:$24 sps:$4 sm:$0xff]   ;;  %v7172_v8 = vld [vmem:[#allocation5 + $0x51c] ss:$24 sps:$4 sm:$0xff]  }
 0x170   :  { %5081 = vmatpush1.bf16.msra.mxu1 %v7092_v9  ;;  %v7175_v9 = vld [vmem:[#allocation5 + $0x524] ss:$24 sps:$4 sm:$0xff]  }
 0x171   :  { %5409 = vmatpush1.bf16.msra.mxu0 %v7095_v12  ;;  %5082 = vmatprep.subr.bf16.mxu1 %v7100_v13  ;;  %v7170_v12 = vld [vmem:[#allocation5 + $0x518] ss:$24 sps:$4 sm:$0xff]  }
 0x172   :  { %5410 = vmatprep.subr.bf16.mxu0 %v7103_v14  ;;  %v7173_v13 = vld [vmem:[#allocation5 + $0x520] ss:$24 sps:$4 sm:$0xff]   ;;  %v7178_v14 = vld [vmem:[#allocation5 + $0x54c] ss:$24 sps:$4 sm:$0xff]  }
 0x174   :  { %5083 = vmatpush1.bf16.msra.mxu1 %v7098_v15  ;;  %v7181_v15 = vld [vmem:[#allocation5 + $0x554] ss:$24 sps:$4 sm:$0xff]  }
 0x175   :  { %5411 = vmatpush1.bf16.msra.mxu0 %v7101_v16  ;;  %5093 = vmatprep.subr.bf16.mxu1 %v7106_v17  ;;  %v7176_v16 = vld [vmem:[#allocation5 + $0x548] ss:$24 sps:$4 sm:$0xff]  }
 0x176   :  { %5421 = vmatprep.subr.bf16.mxu0 %v7109_v18  ;;  %v7179_v17 = vld [vmem:[#allocation5 + $0x550] ss:$24 sps:$4 sm:$0xff]   ;;  %v7184_v18 = vld [vmem:[#allocation5 + $0x57c] ss:$24 sps:$4 sm:$0xff]  }
 0x177   :  { %5085 = vmatmul.mubr.bf16.vlgmr.msra.gmra.mrb[4].mxu1 %v7963_v10 }
 0x178   :  { %5413 = vmatmul.mubr.bf16.vlgmr.msra.gmra.mrb[4].mxu0 %v7963_v10  ;;  %5094 = vmatpush1.bf16.msra.mxu1 %v7104_v19  ;;  %v7127_v10 = vld [vmem:[#allocation5 + $0x3a4] ss:$24 sps:$4 sm:$0xff]  }
 0x179   :  { %5422 = vmatpush1.bf16.msra.mxu0 %v7107_v20  ;;  %5095 = vmatprep.subr.bf16.mxu1 %v7112_v21  ;;  %v7187_v19 = vld [vmem:[#allocation5 + $0x584] ss:$24 sps:$4 sm:$0xff]   ;;  %v7182_v20 = vld [vmem:[#allocation5 + $0x578] ss:$24 sps:$4 sm:$0xff]  }
 0x17a   :  { %5423 = vmatprep.subr.bf16.mxu0 %v7115_v48  ;;  %5125 = vmatprep.mubr.bf16.mxu1 %v7969_v36  ;;  %v7185_v21 = vld [vmem:[#allocation5 + $0x580] ss:$24 sps:$4 sm:$0xff]   ;;  %v7190_v48 = vld [vmem:[#allocation5 + $0x5ac] ss:$24 sps:$4 sm:$0xff]  }
 0x17b   :  { %5453 = vmatprep.mubr.bf16.mxu0 %v7969_v36  ;;  %v7131_v36 = vld [vmem:[#allocation5 + $0x3d0] ss:$24 sps:$4 sm:$0xff]  }
 0x17c   :  { %5096 = vmatpush1.bf16.msra.mxu1 %v7110_v24  ;;  %v7193_v24 = vld [vmem:[#allocation5 + $0x5b4] ss:$24 sps:$4 sm:$0xff]  }
 0x17d   :  { %5424 = vmatpush1.bf16.msra.mxu0 %v7113_v25  ;;  %5097 = vmatprep.subr.bf16.mxu1 %v7118_v26  ;;  %v7188_v25 = vld [vmem:[#allocation5 + $0x5a8] ss:$24 sps:$4 sm:$0xff]  }
 0x17e   :  { %5425 = vmatprep.subr.bf16.mxu0 %v7121_v27  ;;  %v7191_v26 = vld [vmem:[#allocation5 + $0x5b0] ss:$24 sps:$4 sm:$0xff]   ;;  %v7196_v27 = vld [vmem:[#allocation5 + $0x5dc] ss:$24 sps:$4 sm:$0xff]  }
 0x180   :  { %5098 = vmatpush1.bf16.msra.mxu1 %v7116_v29  ;;  %v7199_v29 = vld [vmem:[#allocation5 + $0x5e4] ss:$24 sps:$4 sm:$0xff]  }
 0x181   :  { %5426 = vmatpush1.bf16.msra.mxu0 %v7119_v30  ;;  %5099 = vmatprep.subr.bf16.mxu1 %v7124_v31  ;;  %v7194_v30 = vld [vmem:[#allocation5 + $0x5d8] ss:$24 sps:$4 sm:$0xff]  }
 0x182   :  { %5427 = vmatprep.subr.bf16.mxu0 %v7127_v10  ;;  %v7197_v31 = vld [vmem:[#allocation5 + $0x5e0] ss:$24 sps:$4 sm:$0xff]   ;;  %v7202_v10 = vld [vmem:[#allocation5 + $0x60c] ss:$24 sps:$4 sm:$0xff]  }
 0x184   :  { %5100 = vmatpush1.bf16.msra.mxu1 %v7122_v32  ;;  %v7205_v32 = vld [vmem:[#allocation5 + $0x614] ss:$24 sps:$4 sm:$0xff]  }
 0x185   :  { %5428 = vmatpush1.bf16.msra.mxu0 %v7125_v34  ;;  %5101 = vmatprep.subr.bf16.mxu1 %v7130_v35  ;;  %v7200_v34 = vld [vmem:[#allocation5 + $0x608] ss:$24 sps:$4 sm:$0xff]  }
 0x186   :  { %5429 = vmatprep.subr.bf16.mxu0 %v7133_v37  ;;  %v7203_v35 = vld [vmem:[#allocation5 + $0x610] ss:$24 sps:$4 sm:$0xff]   ;;  %v7208_v37 = vld [vmem:[#allocation5 + $0x63c] ss:$24 sps:$4 sm:$0xff]  }
 0x188   :  { %5102 = vmatpush1.bf16.msra.mxu1 %v7128_v38  ;;  %v7211_v38 = vld [vmem:[#allocation5 + $0x644] ss:$24 sps:$4 sm:$0xff]  }
 0x189   :  { %5430 = vmatpush1.bf16.msra.mxu0 %v7131_v36  ;;  %5103 = vmatprep.subr.bf16.mxu1 %v7136_v39  ;;  %v7206_v36 = vld [vmem:[#allocation5 + $0x638] ss:$24 sps:$4 sm:$0xff]  }
 0x18a   :  { %5431 = vmatprep.subr.bf16.mxu0 %v7139_v40  ;;  %v7209_v39 = vld [vmem:[#allocation5 + $0x640] ss:$24 sps:$4 sm:$0xff]   ;;  %v7214_v40 = vld [vmem:[#allocation5 + $0x66c] ss:$24 sps:$4 sm:$0xff]  }
 0x18c   :  { %5104 = vmatpush1.bf16.msra.mxu1 %v7134_v44  ;;  %v7217_v44 = vld [vmem:[#allocation5 + $0x674] ss:$24 sps:$4 sm:$0xff]  }
 0x18d   :  { %5432 = vmatpush1.bf16.msra.mxu0 %v7137_v45  ;;  %5105 = vmatprep.subr.bf16.mxu1 %v7142_v46  ;;  %v7212_v45 = vld [vmem:[#allocation5 + $0x668] ss:$24 sps:$4 sm:$0xff]  }
 0x18e   :  { %5433 = vmatprep.subr.bf16.mxu0 %v7145_v47  ;;  %v7215_v46 = vld [vmem:[#allocation5 + $0x670] ss:$24 sps:$4 sm:$0xff]   ;;  %v7220_v47 = vld [vmem:[#allocation5 + $0x69c] ss:$24 sps:$4 sm:$0xff]  }
 0x190   :  { %5106 = vmatpush1.bf16.msra.mxu1 %v7140_v51  ;;  %v7218_v51 = vld [vmem:[#allocation5 + $0x698] ss:$24 sps:$4 sm:$0xff]  }
 0x191   :  { %5434 = vmatpush1.bf16.msra.mxu0 %v7143_v52  ;;  %5107 = vmatprep.subr.bf16.mxu1 %v7148_v54  ;;  %v7221_v52 = vld [vmem:[#allocation5 + $0x6a0] ss:$24 sps:$4 sm:$0xff]   ;;  %v7226_v54 = vld [vmem:[#allocation5 + $0x6cc] ss:$24 sps:$4 sm:$0xff]  }
 0x192   :  { %5435 = vmatprep.subr.bf16.mxu0 %v7151_v55  ;;  %v7229_v55 = vld [vmem:[#allocation5 + $0x6d4] ss:$24 sps:$4 sm:$0xff]  }
 0x194   :  { %5108 = vmatpush1.bf16.msra.mxu1 %v7146_v56  ;;  %v7224_v56 = vld [vmem:[#allocation5 + $0x6c8] ss:$24 sps:$4 sm:$0xff]  }
 0x195   :  { %5436 = vmatpush1.bf16.msra.mxu0 %v7149_v57  ;;  %5109 = vmatprep.subr.bf16.mxu1 %v7154_v58  ;;  %v7232_v57 = vld [vmem:[#allocation5 + $0x6fc] ss:$24 sps:$4 sm:$0xff]  }
 0x196   :  { %5437 = vmatprep.subr.bf16.mxu0 %v7157_v59  ;;  %v7235_v58 = vld [vmem:[#allocation5 + $0x704] ss:$24 sps:$4 sm:$0xff]   ;;  %v7230_v59 = vld [vmem:[#allocation5 + $0x6f8] ss:$24 sps:$4 sm:$0xff]  }
 0x198   :  { %5110 = vmatpush1.bf16.msra.mxu1 %v7152_v60  ;;  %v7233_v60 = vld [vmem:[#allocation5 + $0x700] ss:$24 sps:$4 sm:$0xff]  }
 0x199   :  { %5438 = vmatpush1.bf16.msra.mxu0 %v7155_v61  ;;  %5111 = vmatprep.subr.bf16.mxu1 %v7160_v62  ;;  %v7238_v61 = vld [vmem:[#allocation5 + $0x72c] ss:$24 sps:$4 sm:$0xff]  }
 0x19a   :  { %5439 = vmatprep.subr.bf16.mxu0 %v7163_v63  ;;  %v7241_v62 = vld [vmem:[#allocation5 + $0x734] ss:$24 sps:$4 sm:$0xff]   ;;  %v7236_v63 = vld [vmem:[#allocation5 + $0x728] ss:$24 sps:$4 sm:$0xff]  }
 0x19c   :  { %5112 = vmatpush1.bf16.msra.mxu1 %v7158_v2  ;;  %v7239_v2 = vld [vmem:[#allocation5 + $0x730] ss:$24 sps:$4 sm:$0xff]  }
 0x19d   :  { %5440 = vmatpush1.bf16.msra.mxu0 %v7161_v3  ;;  %5113 = vmatprep.subr.bf16.mxu1 %v7166_v4  ;;  %v7244_v3 = vld [vmem:[#allocation5 + $0x75c] ss:$24 sps:$4 sm:$0xff]  }
 0x19e   :  { %5441 = vmatprep.subr.bf16.mxu0 %v7169_v5  ;;  %v7247_v4 = vld [vmem:[#allocation5 + $0x764] ss:$24 sps:$4 sm:$0xff]   ;;  %v7242_v5 = vld [vmem:[#allocation5 + $0x758] ss:$24 sps:$4 sm:$0xff]  }
 0x1a0   :  { %5114 = vmatpush1.bf16.msra.mxu1 %v7164_v6  ;;  %v7245_v6 = vld [vmem:[#allocation5 + $0x760] ss:$24 sps:$4 sm:$0xff]  }
 0x1a1   :  { %5442 = vmatpush1.bf16.msra.mxu0 %v7167_v7  ;;  %5115 = vmatprep.subr.bf16.mxu1 %v7172_v8  ;;  %v7250_v7 = vld [vmem:[#allocation5 + $0x78c] ss:$24 sps:$4 sm:$0xff]  }
 0x1a2   :  { %5443 = vmatprep.subr.bf16.mxu0 %v7175_v9  ;;  %v7253_v8 = vld [vmem:[#allocation5 + $0x794] ss:$24 sps:$4 sm:$0xff]   ;;  %v7248_v9 = vld [vmem:[#allocation5 + $0x788] ss:$24 sps:$4 sm:$0xff]  }
 0x1a4   :  { %5116 = vmatpush1.bf16.msra.mxu1 %v7170_v12  ;;  %v7251_v12 = vld [vmem:[#allocation5 + $0x790] ss:$24 sps:$4 sm:$0xff]  }
 0x1a5   :  { %5444 = vmatpush1.bf16.msra.mxu0 %v7173_v13  ;;  %5117 = vmatprep.subr.bf16.mxu1 %v7178_v14  ;;  %v7256_v13 = vld [vmem:[#allocation5 + $0x7bc] ss:$24 sps:$4 sm:$0xff]  }
 0x1a6   :  { %5445 = vmatprep.subr.bf16.mxu0 %v7181_v15  ;;  %v7259_v14 = vld [vmem:[#allocation5 + $0x7c4] ss:$24 sps:$4 sm:$0xff]   ;;  %v7254_v15 = vld [vmem:[#allocation5 + $0x7b8] ss:$24 sps:$4 sm:$0xff]  }
 0x1a8   :  { %5118 = vmatpush1.bf16.msra.mxu1 %v7176_v16  ;;  %v7257_v16 = vld [vmem:[#allocation5 + $0x7c0] ss:$24 sps:$4 sm:$0xff]  }
 0x1a9   :  { %5446 = vmatpush1.bf16.msra.mxu0 %v7179_v17  ;;  %5119 = vmatprep.subr.bf16.mxu1 %v7184_v18  ;;  %v7262_v17 = vld [vmem:[#allocation5 + $0x7ec] ss:$24 sps:$4 sm:$0xff]  }
 0x1aa   :  { %5447 = vmatprep.subr.bf16.mxu0 %v7187_v19  ;;  %v7265_v18 = vld [vmem:[#allocation5 + $0x7f4] ss:$24 sps:$4 sm:$0xff]   ;;  %v7260_v19 = vld [vmem:[#allocation5 + $0x7e8] ss:$24 sps:$4 sm:$0xff]  }
 0x1ac   :  { %5120 = vmatpush1.bf16.msra.mxu1 %v7182_v20  ;;  %v7263_v20 = vld [vmem:[#allocation5 + $0x7f0] ss:$24 sps:$4 sm:$0xff]  }
 0x1ad   :  { %5448 = vmatpush1.bf16.msra.mxu0 %v7185_v21  ;;  %5121 = vmatprep.subr.bf16.mxu1 %v7190_v48  ;;  %v7268_v21 = vld [vmem:[#allocation5 + $0x81c] ss:$24 sps:$4 sm:$0xff]  }
 0x1ae   :  { %5449 = vmatprep.subr.bf16.mxu0 %v7193_v24  ;;  %v7271_v48 = vld [vmem:[#allocation5 + $0x824] ss:$24 sps:$4 sm:$0xff]   ;;  %v7266_v24 = vld [vmem:[#allocation5 + $0x818] ss:$24 sps:$4 sm:$0xff]  }
 0x1b0   :  { %5122 = vmatpush1.bf16.msra.mxu1 %v7188_v25  ;;  %v7269_v25 = vld [vmem:[#allocation5 + $0x820] ss:$24 sps:$4 sm:$0xff]  }
 0x1b1   :  { %5450 = vmatpush1.bf16.msra.mxu0 %v7191_v26  ;;  %5123 = vmatprep.subr.bf16.mxu1 %v7196_v27  ;;  %v7274_v26 = vld [vmem:[#allocation5 + $0x84c] ss:$24 sps:$4 sm:$0xff]  }
 0x1b2   :  { %5451 = vmatprep.subr.bf16.mxu0 %v7199_v29  ;;  %v7277_v27 = vld [vmem:[#allocation5 + $0x854] ss:$24 sps:$4 sm:$0xff]   ;;  %v7272_v29 = vld [vmem:[#allocation5 + $0x848] ss:$24 sps:$4 sm:$0xff]  }
 0x1b4   :  { %5124 = vmatpush1.bf16.msra.mxu1 %v7194_v30  ;;  %v7275_v30 = vld [vmem:[#allocation5 + $0x850] ss:$24 sps:$4 sm:$0xff]  }
 0x1b5   :  { %5452 = vmatpush1.bf16.msra.mxu0 %v7197_v31  ;;  %5134 = vmatprep.subr.bf16.mxu1 %v7202_v10  ;;  %v7280_v31 = vld [vmem:[#allocation5 + $0x87c] ss:$24 sps:$4 sm:$0xff]  }
 0x1b6   :  { %5462 = vmatprep.subr.bf16.mxu0 %v7205_v32  ;;  %v7283_v10 = vld [vmem:[#allocation5 + $0x884] ss:$24 sps:$4 sm:$0xff]   ;;  %v7278_v32 = vld [vmem:[#allocation5 + $0x878] ss:$24 sps:$4 sm:$0xff]  }
 0x1b7   :  { %5126 = vmatmul.mubr.bf16.vlgmr.msra.gmra.mrb[4].mxu1 %v7975_v22 }
 0x1b8   :  { %5454 = vmatmul.mubr.bf16.vlgmr.msra.gmra.mrb[4].mxu0 %v7975_v22  ;;  %5135 = vmatpush1.bf16.msra.mxu1 %v7200_v34  ;;  %v7223_v22 = vld [vmem:[#allocation5 + $0x6a4] ss:$24 sps:$4 sm:$0xff]   ;;  %v7281_v34 = vld [vmem:[#allocation5 + $0x880] ss:$24 sps:$4 sm:$0xff]  }
 0x1b9   :  { %5463 = vmatpush1.bf16.msra.mxu0 %v7203_v35  ;;  %5136 = vmatprep.subr.bf16.mxu1 %v7208_v37  ;;  %v7286_v35 = vld [vmem:[#allocation5 + $0x8ac] ss:$24 sps:$4 sm:$0xff]  }
 0x1ba   :  { %5464 = vmatprep.subr.bf16.mxu0 %v7211_v38  ;;  %5166 = vmatprep.mubr.bf16.mxu1 %v7981_v28  ;;  %v7289_v37 = vld [vmem:[#allocation5 + $0x8b4] ss:$24 sps:$4 sm:$0xff]   ;;  %v7284_v38 = vld [vmem:[#allocation5 + $0x8a8] ss:$24 sps:$4 sm:$0xff]  }
 0x1bb   :  { %5494 = vmatprep.mubr.bf16.mxu0 %v7981_v28  ;;  %v7227_v28 = vld [vmem:[#allocation5 + $0x6d0] ss:$24 sps:$4 sm:$0xff]  }
 0x1bc   :  { %5137 = vmatpush1.bf16.msra.mxu1 %v7206_v36  ;;  %v7287_v36 = vld [vmem:[#allocation5 + $0x8b0] ss:$24 sps:$4 sm:$0xff]  }
 0x1bd   :  { %5465 = vmatpush1.bf16.msra.mxu0 %v7209_v39  ;;  %5138 = vmatprep.subr.bf16.mxu1 %v7214_v40  ;;  %v7292_v39 = vld [vmem:[#allocation5 + $0x8dc] ss:$24 sps:$4 sm:$0xff]  }
 0x1be   :  { %5466 = vmatprep.subr.bf16.mxu0 %v7217_v44  ;;  %v7295_v40 = vld [vmem:[#allocation5 + $0x8e4] ss:$24 sps:$4 sm:$0xff]   ;;  %v7290_v44 = vld [vmem:[#allocation5 + $0x8d8] ss:$24 sps:$4 sm:$0xff]  }
 0x1c0   :  { %5139 = vmatpush1.bf16.msra.mxu1 %v7212_v45  ;;  %v7293_v45 = vld [vmem:[#allocation5 + $0x8e0] ss:$24 sps:$4 sm:$0xff]  }
 0x1c1   :  { %5467 = vmatpush1.bf16.msra.mxu0 %v7215_v46  ;;  %5140 = vmatprep.subr.bf16.mxu1 %v7220_v47  ;;  %v7298_v46 = vld [vmem:[#allocation5 + $0x90c] ss:$24 sps:$4 sm:$0xff]  }
 0x1c2   :  { %5468 = vmatprep.subr.bf16.mxu0 %v7223_v22  ;;  %v7301_v47 = vld [vmem:[#allocation5 + $0x914] ss:$24 sps:$4 sm:$0xff]   ;;  %v7296_v22 = vld [vmem:[#allocation5 + $0x908] ss:$24 sps:$4 sm:$0xff]  }
 0x1c4   :  { %5141 = vmatpush1.bf16.msra.mxu1 %v7218_v51  ;;  %v7299_v51 = vld [vmem:[#allocation5 + $0x910] ss:$24 sps:$4 sm:$0xff]  }
 0x1c5   :  { %5469 = vmatpush1.bf16.msra.mxu0 %v7221_v52  ;;  %5142 = vmatprep.subr.bf16.mxu1 %v7226_v54  ;;  %v7304_v52 = vld [vmem:[#allocation5 + $0x93c] ss:$24 sps:$4 sm:$0xff]  }
 0x1c6   :  { %5470 = vmatprep.subr.bf16.mxu0 %v7229_v55  ;;  %v7307_v54 = vld [vmem:[#allocation5 + $0x944] ss:$24 sps:$4 sm:$0xff]   ;;  %v7302_v55 = vld [vmem:[#allocation5 + $0x938] ss:$24 sps:$4 sm:$0xff]  }
 0x1c8   :  { %5143 = vmatpush1.bf16.msra.mxu1 %v7224_v56  ;;  %v7305_v56 = vld [vmem:[#allocation5 + $0x940] ss:$24 sps:$4 sm:$0xff]  }
 0x1c9   :  { %5471 = vmatpush1.bf16.msra.mxu0 %v7227_v28  ;;  %5144 = vmatprep.subr.bf16.mxu1 %v7232_v57  ;;  %v7310_v28 = vld [vmem:[#allocation5 + $0x96c] ss:$24 sps:$4 sm:$0xff]  }
 0x1ca   :  { %5472 = vmatprep.subr.bf16.mxu0 %v7235_v58  ;;  %v7313_v57 = vld [vmem:[#allocation5 + $0x974] ss:$24 sps:$4 sm:$0xff]   ;;  %v854_v58 = vlaneseq }
 0x1cc   :  { %5145 = vmatpush1.bf16.msra.mxu1 %v7230_v59  ;;  %v7308_v59 = vld [vmem:[#allocation5 + $0x968] ss:$24 sps:$4 sm:$0xff]  }
 0x1cd   :  { %5473 = vmatpush1.bf16.msra.mxu0 %v7233_v60  ;;  %5146 = vmatprep.subr.bf16.mxu1 %v7238_v61  ;;  %v7311_v60 = vld [vmem:[#allocation5 + $0x970] ss:$24 sps:$4 sm:$0xff]   ;;  %v7319_v61 = vld [vmem:[#allocation5 + $0x9a4] ss:$24 sps:$4 sm:$0xff]  }
 0x1ce   :  { %5474 = vmatprep.subr.bf16.mxu0 %v7241_v62  ;;  %v8019_v62 = vshrl.u32 %v854_v58, 7  ;;  %v7359_v58 = vld [vmem:[#allocation5 + $0xaf0] ss:$24 sps:$4 sm:$0xff]  }
 0x1d0   :  { %5147 = vmatpush1.bf16.msra.mxu1 %v7236_v63  ;;  %v7314_v63 = vld [vmem:[#allocation5 + $0x998] ss:$24 sps:$4 sm:$0xff]  }
 0x1d1   :  { %5475 = vmatpush1.bf16.msra.mxu0 %v7239_v2  ;;  %5148 = vmatprep.subr.bf16.mxu1 %v7244_v3  ;;  %v7317_v2 = vld [vmem:[#allocation5 + $0x9a0] ss:$24 sps:$4 sm:$0xff]   ;;  %v7322_v3 = vld [vmem:[#allocation5 + $0x9cc] ss:$24 sps:$4 sm:$0xff]  }
 0x1d2   :  { %5476 = vmatprep.subr.bf16.mxu0 %v7247_v4  ;;  %v7325_v4 = vld [vmem:[#allocation5 + $0x9d4] ss:$24 sps:$4 sm:$0xff]  }
 0x1d4   :  { %5149 = vmatpush1.bf16.msra.mxu1 %v7242_v5  ;;  %v856_v5 = vsub.s32 0, %v8019_v62 }
 0x1d5   :  { %5477 = vmatpush1.bf16.msra.mxu0 %v7245_v6  ;;  %5150 = vmatprep.subr.bf16.mxu1 %v7250_v7  ;;  %v7323_v6 = vld [vmem:[#allocation5 + $0x9d0] ss:$24 sps:$4 sm:$0xff]   ;;  %v852_v7 = vld [vmem:[#allocation7] sm:$0x3f] }
 0x1d6   :  { %5478 = vmatprep.subr.bf16.mxu0 %v7253_v8  ;;  %v860_v8 = vsub.s32 1, %v8019_v62 }
 0x1d8   :  { %5151 = vmatpush1.bf16.msra.mxu1 %v7248_v9  ;;  %v7328_v9 = vld [vmem:[#allocation5 + $0x9fc] ss:$24 sps:$4 sm:$0xff]  }
 0x1d9   :  { %5479 = vmatpush1.bf16.msra.mxu0 %v7251_v12  ;;  %5152 = vmatprep.subr.bf16.mxu1 %v7256_v13  ;;  %v7331_v12 = vld [vmem:[#allocation5 + $0xa04] ss:$24 sps:$4 sm:$0xff]   ;;  %v857_v13 = vrot.slane %v852_v7, %v856_v5 }
 0x1da   :  { %5480 = vmatprep.subr.bf16.mxu0 %v7259_v14  ;;  %v861_v14 = vrot.slane %v852_v7, %v860_v8  ;;  %v7379_v5 = vld [vmem:[#allocation5 + $0xb84] ss:$24 sps:$4 sm:$0xff]   ;;  %v7374_v8 = vld [vmem:[#allocation5 + $0xb78] ss:$24 sps:$4 sm:$0xff]  }
 0x1dc   :  { %5153 = vmatpush1.bf16.msra.mxu1 %v7254_v15  ;;  %v7326_v15 = vld [vmem:[#allocation5 + $0x9f8] ss:$24 sps:$4 sm:$0xff]  }
 0x1dd   :  { %5481 = vmatpush1.bf16.msra.mxu0 %v7257_v16  ;;  %5154 = vmatprep.subr.bf16.mxu1 %v7262_v17  ;;  %v7329_v16 = vld [vmem:[#allocation5 + $0xa00] ss:$24 sps:$4 sm:$0xff]   ;;  %v7334_v17 = vld [vmem:[#allocation5 + $0xa2c] ss:$24 sps:$4 sm:$0xff]  }
 0x1de   :  { %5482 = vmatprep.subr.bf16.mxu0 %v7265_v18  ;;  %v7337_v18 = vld [vmem:[#allocation5 + $0xa34] ss:$24 sps:$4 sm:$0xff]  }
 0x1e0   :  { %5155 = vmatpush1.bf16.msra.mxu1 %v7260_v19 }
 0x1e1   :  { %5483 = vmatpush1.bf16.msra.mxu0 %v7263_v20  ;;  %5156 = vmatprep.subr.bf16.mxu1 %v7268_v21 }
 0x1e2   :  { %5484 = vmatprep.subr.bf16.mxu0 %v7271_v48 }
 0x1e4   :  { %5157 = vmatpush1.bf16.msra.mxu1 %v7266_v24 }
 0x1e5   :  { %5485 = vmatpush1.bf16.msra.mxu0 %v7269_v25  ;;  %5158 = vmatprep.subr.bf16.mxu1 %v7274_v26 }
 0x1e6   :  { %5486 = vmatprep.subr.bf16.mxu0 %v7277_v27 }
 0x1e8   :  { %5159 = vmatpush1.bf16.msra.mxu1 %v7272_v29  ;;  %v7332_v29 = vld [vmem:[#allocation5 + $0xa28] ss:$24 sps:$4 sm:$0xff]  }
 0x1e9   :  { %5487 = vmatpush1.bf16.msra.mxu0 %v7275_v30  ;;  %5160 = vmatprep.subr.bf16.mxu1 %v7280_v31  ;;  %v7335_v30 = vld [vmem:[#allocation5 + $0xa30] ss:$24 sps:$4 sm:$0xff]  }
 0x1ea   :  { %5488 = vmatprep.subr.bf16.mxu0 %v7283_v10 }
 0x1ec   :  { %5161 = vmatpush1.bf16.msra.mxu1 %v7278_v32 }
 0x1ed   :  { %5489 = vmatpush1.bf16.msra.mxu0 %v7281_v34  ;;  %5162 = vmatprep.subr.bf16.mxu1 %v7286_v35  ;;  %v7340_v34 = vld [vmem:[#allocation5 + $0xa5c] ss:$24 sps:$4 sm:$0xff]  }
 0x1ee   :  { %5490 = vmatprep.subr.bf16.mxu0 %v7289_v37  ;;  %v7343_v35 = vld [vmem:[#allocation5 + $0xa64] ss:$24 sps:$4 sm:$0xff]  }
 0x1f0   :  { %5163 = vmatpush1.bf16.msra.mxu1 %v7284_v38 }
 0x1f1   :  { %5491 = vmatpush1.bf16.msra.mxu0 %v7287_v36  ;;  %5164 = vmatprep.subr.bf16.mxu1 %v7292_v39  ;;  %v7338_v36 = vld [vmem:[#allocation5 + $0xa58] ss:$24 sps:$4 sm:$0xff]  }
 0x1f2   :  { %5492 = vmatprep.subr.bf16.mxu0 %v7295_v40  ;;  %v7341_v39 = vld [vmem:[#allocation5 + $0xa60] ss:$24 sps:$4 sm:$0xff]   ;;  %v7346_v40 = vld [vmem:[#allocation5 + $0xa8c] ss:$24 sps:$4 sm:$0xff]  }
 0x1f4   :  { %5165 = vmatpush1.bf16.msra.mxu1 %v7290_v44  ;;  %v7349_v44 = vld [vmem:[#allocation5 + $0xa94] ss:$24 sps:$4 sm:$0xff]  }
 0x1f5   :  { %5493 = vmatpush1.bf16.msra.mxu0 %v7293_v45  ;;  %5175 = vmatprep.subr.bf16.mxu1 %v7298_v46  ;;  %v7344_v45 = vld [vmem:[#allocation5 + $0xa88] ss:$24 sps:$4 sm:$0xff]  }
 0x1f6   :  { %5503 = vmatprep.subr.bf16.mxu0 %v7301_v47  ;;  %v7347_v46 = vld [vmem:[#allocation5 + $0xa90] ss:$24 sps:$4 sm:$0xff]   ;;  %v7352_v47 = vld [vmem:[#allocation5 + $0xabc] ss:$24 sps:$4 sm:$0xff]  }
 0x1f7   :  { %5167 = vmatmul.mubr.bf16.vlgmr.msra.gmra.mrb[4].mxu1 %v7987_v42 }
 0x1f8   :  { %5495 = vmatmul.mubr.bf16.vlgmr.msra.gmra.mrb[4].mxu0 %v7987_v42  ;;  %5176 = vmatpush1.bf16.msra.mxu1 %v7296_v22  ;;  %v7316_v42 = vld [vmem:[#allocation5 + $0x99c] ss:$24 sps:$4 sm:$0xff]  }
 0x1f9   :  { %5504 = vmatpush1.bf16.msra.mxu0 %v7299_v51  ;;  %5177 = vmatprep.subr.bf16.mxu1 %v7304_v52  ;;  %v7355_v22 = vld [vmem:[#allocation5 + $0xac4] ss:$24 sps:$4 sm:$0xff]   ;;  %v7350_v51 = vld [vmem:[#allocation5 + $0xab8] ss:$24 sps:$4 sm:$0xff]  }
 0x1fa   :  { %5505 = vmatprep.subr.bf16.mxu0 %v7307_v54  ;;  %5207 = vmatprep.mubr.bf16.mxu1 %v7991_v49  ;;  %v7353_v52 = vld [vmem:[#allocation5 + $0xac0] ss:$24 sps:$4 sm:$0xff]   ;;  %v7358_v54 = vld [vmem:[#allocation5 + $0xaec] ss:$24 sps:$4 sm:$0xff]  }
 0x1fb   :  { %5535 = vmatprep.mubr.bf16.mxu0 %v7991_v49  ;;  %v7320_v49 = vld [vmem:[#allocation5 + $0x9c8] ss:$24 sps:$4 sm:$0xff]  }
 0x1fc   :  { %5178 = vmatpush1.bf16.msra.mxu1 %v7302_v55  ;;  %v7361_v55 = vld [vmem:[#allocation5 + $0xaf4] ss:$24 sps:$4 sm:$0xff]  }
 0x1fd   :  { %5506 = vmatpush1.bf16.msra.mxu0 %v7305_v56  ;;  %5179 = vmatprep.subr.bf16.mxu1 %v7310_v28 }
 0x1fe   :  { %5507 = vmatprep.subr.bf16.mxu0 %v7313_v57  ;;  %v7356_v57 = vld [vmem:[#allocation5 + $0xae8] ss:$24 sps:$4 sm:$0xff]  }
 0x200   :  { %5180 = vmatpush1.bf16.msra.mxu1 %v7308_v59  ;;  %v7364_v59 = vld [vmem:[#allocation5 + $0xb1c] ss:$24 sps:$4 sm:$0xff]  }
 0x201   :  { %5508 = vmatpush1.bf16.msra.mxu0 %v7311_v60  ;;  %5181 = vmatprep.subr.bf16.mxu1 %v7316_v42  ;;  %v7367_v60 = vld [vmem:[#allocation5 + $0xb24] ss:$24 sps:$4 sm:$0xff]   ;;  %v7362_v42 = vld [vmem:[#allocation5 + $0xb18] ss:$24 sps:$4 sm:$0xff]  }
 0x202   :  { %5509 = vmatprep.subr.bf16.mxu0 %v7319_v61  ;;  %v7365_v61 = vld [vmem:[#allocation5 + $0xb20] ss:$24 sps:$4 sm:$0xff]  }
 0x204   :  { %5182 = vmatpush1.bf16.msra.mxu1 %v7314_v63  ;;  %v7370_v63 = vld [vmem:[#allocation5 + $0xb4c] ss:$24 sps:$4 sm:$0xff]  }
 0x205   :  { %5510 = vmatpush1.bf16.msra.mxu0 %v7317_v2  ;;  %5183 = vmatprep.subr.bf16.mxu1 %v7322_v3  ;;  %v7373_v2 = vld [vmem:[#allocation5 + $0xb54] ss:$24 sps:$4 sm:$0xff]   ;;  %v7368_v3 = vld [vmem:[#allocation5 + $0xb48] ss:$24 sps:$4 sm:$0xff]  }
 0x206   :  { %5511 = vmatprep.subr.bf16.mxu0 %v7325_v4  ;;  %v7371_v4 = vld [vmem:[#allocation5 + $0xb50] ss:$24 sps:$4 sm:$0xff]  }
 0x208   :  { %5184 = vmatpush1.bf16.msra.mxu1 %v7320_v49  ;;  %v7376_v49 = vld [vmem:[#allocation5 + $0xb7c] ss:$24 sps:$4 sm:$0xff]  }
 0x209   :  { %5512 = vmatpush1.bf16.msra.mxu0 %v7323_v6  ;;  %5185 = vmatprep.subr.bf16.mxu1 %v7328_v9  ;;  %v7377_v9 = vld [vmem:[#allocation5 + $0xb80] ss:$24 sps:$4 sm:$0xff]  }
 0x20a   :  { %5513 = vmatprep.subr.bf16.mxu0 %v7331_v12  ;;  %v4881_v19 = vpop.f32.mrb[0].mxu1 }
 0x20b   :  { %v5045_v20 = vpop.f32.mrb[0].mxu0  ;;  %v6530_v21 = vadd.f32 %v4881_v19, %v857_v13  ;;  %v4883_v48 = vpop.f32.mrb[1].mxu1  ;;  %v7382_v13 = vld [vmem:[#allocation5 + $0xbac] ss:$24 sps:$4 sm:$0xff]   ;;  %v7386_v19 = vld [vmem:[#allocation5 + $0xbd8] ss:$24 sps:$4 sm:$0xff]  }
 0x20c   :  { %v5047_v24 = vpop.f32.mrb[1].mxu0  ;;  %v6532_v25 = vadd.f32 %v4883_v48, %v861_v14  ;;  %v4885_v26 = vpop.f32.mrb[2].mxu1  ;;  %5186 = vmatpush1.bf16.msra.mxu1 %v7326_v15  ;;  %v7385_v14 = vld [vmem:[#allocation5 + $0xbb4] ss:$24 sps:$4 sm:$0xff]   ;;  %v7380_v15 = vld [vmem:[#allocation5 + $0xba8] ss:$24 sps:$4 sm:$0xff]  }
 0x20d   :  { %v5049_v27 = vpop.f32.mrb[2].mxu0  ;;  %5514 = vmatpush1.bf16.msra.mxu0 %v7329_v16  ;;  %v6531_v31 = vadd.f32 %v6530_v21, %v5045_v20  ;;  %v4886_v10 = vpop.f32.mrb[3].mxu1  ;;  %5187 = vmatprep.subr.bf16.mxu1 %v7334_v17  ;;  %v7383_v16 = vld [vmem:[#allocation5 + $0xbb0] ss:$24 sps:$4 sm:$0xff]   ;;  %v7388_v17 = vld [vmem:[#allocation5 + $0xbdc] ss:$24 sps:$4 sm:$0xff]  }
 0x20e   :  { %v5050_v32 = vpop.f32.mrb[3].mxu0  ;;  %5515 = vmatprep.subr.bf16.mxu0 %v7337_v18  ;;  %v6533_v37 = vadd.f32 %v6532_v25, %v5047_v24  ;;  %v7391_v18 = vld [vmem:[#allocation5 + $0xbe4] ss:$24 sps:$4 sm:$0xff]   ;;  %v7389_v20 = vld [vmem:[#allocation5 + $0xbe0] ss:$24 sps:$4 sm:$0xff]  }
 0x20f   :  { %v6526_v38 = vmul.f32 -1.442695, %v6531_v31  ;;  %v7394_v21 = vld [vmem:[#allocation5 + $0xc0c] ss:$24 sps:$4 sm:$0xff]   ;;  %v7392_v24 = vld [vmem:[#allocation5 + $0xc08] ss:$24 sps:$4 sm:$0xff]  }
 0x210   :  { %5188 = vmatpush1.bf16.msra.mxu1 %v7332_v29  ;;  %v7397_v48 = vld [vmem:[#allocation5 + $0xc14] ss:$24 sps:$4 sm:$0xff]   ;;  %v7395_v25 = vld [vmem:[#allocation5 + $0xc10] ss:$24 sps:$4 sm:$0xff]   ;;  %v7403_v27 = vld [vmem:[#allocation5 + $0xc44] ss:$24 sps:$4 sm:$0xff]  }
 0x211   :  { %5516 = vmatpush1.bf16.msra.mxu0 %v7335_v30  ;;  %7776 = vpow2.f32 %v6526_v38  ;;  %5189 = vmatprep.subr.bf16.mxu1 %v7340_v34  ;;  %v7400_v26 = vld [vmem:[#allocation5 + $0xc3c] ss:$24 sps:$4 sm:$0xff]   ;;  %v7398_v29 = vld [vmem:[#allocation5 + $0xc38] ss:$24 sps:$4 sm:$0xff]   ;;  %v7406_v31 = vld [vmem:[#allocation5 + $0xc6c] ss:$24 sps:$4 sm:$0xff]  }
 0x212   :  { %5517 = vmatprep.subr.bf16.mxu0 %v7343_v35  ;;  %7778 = vtanh.f32 %v6533_v37  ;;  %v7401_v30 = vld [vmem:[#allocation5 + $0xc40] ss:$24 sps:$4 sm:$0xff]   ;;  %v7409_v10 = vld [vmem:[#allocation5 + $0xc74] ss:$24 sps:$4 sm:$0xff]   ;;  %v7407_v34 = vld [vmem:[#allocation5 + $0xc70] ss:$24 sps:$4 sm:$0xff]  }
 0x213   :  { %v7404_v32 = vld [vmem:[#allocation5 + $0xc68] ss:$24 sps:$4 sm:$0xff]   ;;  %v7412_v35 = vld [vmem:[#allocation5 + $0xc9c] ss:$24 sps:$4 sm:$0xff]   ;;  %v7410_v37 = vld [vmem:[#allocation5 + $0xc98] ss:$24 sps:$4 sm:$0xff]  }
 0x214   :  { %5190 = vmatpush1.bf16.msra.mxu1 %v7338_v36  ;;  %v7413_v38 = vld [vmem:[#allocation5 + $0xca0] ss:$24 sps:$4 sm:$0xff]   ;;  %v7418_v36 = vld [vmem:[#allocation5 + $0xccc] ss:$24 sps:$4 sm:$0xff]  }
 0x215   :  { %5518 = vmatpush1.bf16.msra.mxu0 %v7341_v39  ;;  %5191 = vmatprep.subr.bf16.mxu1 %v7346_v40  ;;  %v7421_v39 = vld [vmem:[#allocation5 + $0xcd4] ss:$24 sps:$4 sm:$0xff]   ;;  %v7416_v40 = vld [vmem:[#allocation5 + $0xcc8] ss:$24 sps:$4 sm:$0xff]  }
 0x216   :  { %5519 = vmatprep.subr.bf16.mxu0 %v7349_v44  ;;  %v7424_v44 = vld [vmem:[#allocation5 + $0xcfc] ss:$24 sps:$4 sm:$0xff]  }
 0x218   :  { %5192 = vmatpush1.bf16.msra.mxu1 %v7344_v45  ;;  %v7427_v45 = vld [vmem:[#allocation5 + $0xd04] ss:$24 sps:$4 sm:$0xff]  }
 0x219   :  { %5520 = vmatpush1.bf16.msra.mxu0 %v7347_v46  ;;  %5193 = vmatprep.subr.bf16.mxu1 %v7352_v47  ;;  %v7422_v46 = vld [vmem:[#allocation5 + $0xcf8] ss:$24 sps:$4 sm:$0xff]  }
 0x21a   :  { %5521 = vmatprep.subr.bf16.mxu0 %v7355_v22  ;;  %v7425_v47 = vld [vmem:[#allocation5 + $0xd00] ss:$24 sps:$4 sm:$0xff]   ;;  %v7430_v22 = vld [vmem:[#allocation5 + $0xd2c] ss:$24 sps:$4 sm:$0xff]  }
 0x21b   :  { %v7777_v56 = vpop.eup %7776 }
 0x21c   :  { %v5711_v28 = vadd.f32 1.0, %v7777_v56  ;;  %5194 = vmatpush1.bf16.msra.mxu1 %v7350_v51  ;;  %v7779_v6 = vpop.eup %7778  ;;  %v7433_v51 = vld [vmem:[#allocation5 + $0xd34] ss:$24 sps:$4 sm:$0xff]   ;;  %v7439_v56 = vld [vmem:[#allocation5 + $0xd64] ss:$24 sps:$4 sm:$0xff]  }
 0x21d   :  { %5522 = vmatpush1.bf16.msra.mxu0 %v7353_v52  ;;  %5195 = vmatprep.subr.bf16.mxu1 %v7358_v54  ;;  %v7428_v52 = vld [vmem:[#allocation5 + $0xd28] ss:$24 sps:$4 sm:$0xff]  }
 0x21e   :  { %5523 = vmatprep.subr.bf16.mxu0 %v7361_v55  ;;  %7780 = vrcp.f32 %v5711_v28  ;;  %v7431_v54 = vld [vmem:[#allocation5 + $0xd30] ss:$24 sps:$4 sm:$0xff]   ;;  %v7436_v55 = vld [vmem:[#allocation5 + $0xd5c] ss:$24 sps:$4 sm:$0xff]  }
 0x21f   :  { %v7434_v28 = vld [vmem:[#allocation5 + $0xd58] ss:$24 sps:$4 sm:$0xff]  }
 0x220   :  { %5196 = vmatpush1.bf16.msra.mxu1 %v7356_v57  ;;  %v7437_v57 = vld [vmem:[#allocation5 + $0xd60] ss:$24 sps:$4 sm:$0xff]  }
 0x221   :  { %5524 = vmatpush1.bf16.msra.mxu0 %v7359_v58  ;;  %5197 = vmatprep.subr.bf16.mxu1 %v7364_v59  ;;  %v7442_v58 = vld [vmem:[#allocation5 + $0xd8c] ss:$24 sps:$4 sm:$0xff]  }
 0x222   :  { %5525 = vmatprep.subr.bf16.mxu0 %v7367_v60  ;;  %v7445_v59 = vld [vmem:[#allocation5 + $0xd94] ss:$24 sps:$4 sm:$0xff]   ;;  %v7440_v60 = vld [vmem:[#allocation5 + $0xd88] ss:$24 sps:$4 sm:$0xff]  }
 0x224   :  { %5198 = vmatpush1.bf16.msra.mxu1 %v7362_v42  ;;  %v7443_v42 = vld [vmem:[#allocation5 + $0xd90] ss:$24 sps:$4 sm:$0xff]  }
 0x225   :  { %5526 = vmatpush1.bf16.msra.mxu0 %v7365_v61  ;;  %5199 = vmatprep.subr.bf16.mxu1 %v7370_v63  ;;  %v7448_v61 = vld [vmem:[#allocation5 + $0xdbc] ss:$24 sps:$4 sm:$0xff]  }
 0x226   :  { %5527 = vmatprep.subr.bf16.mxu0 %v7373_v2  ;;  %v7451_v63 = vld [vmem:[#allocation5 + $0xdc4] ss:$24 sps:$4 sm:$0xff]   ;;  %v7446_v2 = vld [vmem:[#allocation5 + $0xdb8] ss:$24 sps:$4 sm:$0xff]  }
 0x228   :  { %v7781_v7 = vpop.eup %7780  ;;  %5200 = vmatpush1.bf16.msra.mxu1 %v7368_v3  ;;  %v7449_v3 = vld [vmem:[#allocation5 + $0xdc0] ss:$24 sps:$4 sm:$0xff]  }
 0x229   :  { %5528 = vmatpush1.bf16.msra.mxu0 %v7371_v4  ;;  %v8023_v12 = vmul.f32 %v7781_v7, %v7779_v6  ;;  %5201 = vmatprep.subr.bf16.mxu1 %v7376_v49  ;;  %v7454_v4 = vld [vmem:[#allocation5 + $0xdec] ss:$24 sps:$4 sm:$0xff]   ;;  %v7455_v6 = vld [vmem:[#allocation5 + $0xdf0] ss:$24 sps:$4 sm:$0xff]   ;;  %v7460_v7 = vld [vmem:[#allocation5 + $0xe1c] ss:$24 sps:$4 sm:$0xff]  }
 0x22a   :  { %5529 = vmatprep.subr.bf16.mxu0 %v7379_v5  ;;  %v7457_v49 = vld [vmem:[#allocation5 + $0xdf4] ss:$24 sps:$4 sm:$0xff]   ;;  %v7452_v5 = vld [vmem:[#allocation5 + $0xde8] ss:$24 sps:$4 sm:$0xff]  }
 0x22c   :  { %5202 = vmatpush1.bf16.msra.mxu1 %v7374_v8  ;;  %v7463_v8 = vld [vmem:[#allocation5 + $0xe24] ss:$24 sps:$4 sm:$0xff]  }
 0x22d   :  { %5530 = vmatpush1.bf16.msra.mxu0 %v7377_v9  ;;  %5203 = vmatprep.subr.bf16.mxu1 %v7382_v13  ;;  %v7458_v9 = vld [vmem:[#allocation5 + $0xe18] ss:$24 sps:$4 sm:$0xff]  }
 0x22e   :  { %5531 = vmatprep.subr.bf16.mxu0 %v7385_v14  ;;  %v7461_v13 = vld [vmem:[#allocation5 + $0xe20] ss:$24 sps:$4 sm:$0xff]   ;;  %v7466_v14 = vld [vmem:[#allocation5 + $0xe4c] ss:$24 sps:$4 sm:$0xff]  }
 0x230   :  { %5204 = vmatpush1.bf16.msra.mxu1 %v7380_v15  ;;  %v7469_v15 = vld [vmem:[#allocation5 + $0xe54] ss:$24 sps:$4 sm:$0xff]  }
 0x231   :  { %5532 = vmatpush1.bf16.msra.mxu0 %v7383_v16  ;;  %5205 = vmatprep.subr.bf16.mxu1 %v7388_v17  ;;  %v7464_v16 = vld [vmem:[#allocation5 + $0xe48] ss:$24 sps:$4 sm:$0xff]  }
 0x232   :  { %5533 = vmatprep.subr.bf16.mxu0 %v7391_v18  ;;  %v7467_v17 = vld [vmem:[#allocation5 + $0xe50] ss:$24 sps:$4 sm:$0xff]   ;;  %v7472_v18 = vld [vmem:[#allocation5 + $0xe7c] ss:$24 sps:$4 sm:$0xff]  }
 0x234   :  { %5206 = vmatpush1.bf16.msra.mxu1 %v7386_v19  ;;  %v7475_v19 = vld [vmem:[#allocation5 + $0xe84] ss:$24 sps:$4 sm:$0xff]  }
 0x235   :  { %5534 = vmatpush1.bf16.msra.mxu0 %v7389_v20  ;;  %5216 = vmatprep.subr.bf16.mxu1 %v7394_v21  ;;  %v7470_v20 = vld [vmem:[#allocation5 + $0xe78] ss:$24 sps:$4 sm:$0xff]  }
 0x236   :  { %5544 = vmatprep.subr.bf16.mxu0 %v7397_v48  ;;  %v7473_v21 = vld [vmem:[#allocation5 + $0xe80] ss:$24 sps:$4 sm:$0xff]   ;;  %v7478_v48 = vld [vmem:[#allocation5 + $0xeac] ss:$24 sps:$4 sm:$0xff]  }
 0x237   :  { %5208 = vmatmul.mubr.bf16.vlgmr.msra.gmra.mrb[4].mxu1 %v7999_v0 }
 0x238   :  { %5536 = vmatmul.mubr.bf16.vlgmr.msra.gmra.mrb[4].mxu0 %v7999_v0  ;;  %5217 = vmatpush1.bf16.msra.mxu1 %v7392_v24  ;;  %v7415_v0 = vld [vmem:[#allocation5 + $0xca4] ss:$24 sps:$4 sm:$0xff]   ;;  %v7481_v24 = vld [vmem:[#allocation5 + $0xeb4] ss:$24 sps:$4 sm:$0xff]  }
 0x239   :  { %5545 = vmatpush1.bf16.msra.mxu0 %v7395_v25  ;;  %5218 = vmatprep.subr.bf16.mxu1 %v7400_v26  ;;  %v7476_v25 = vld [vmem:[#allocation5 + $0xea8] ss:$24 sps:$4 sm:$0xff]  }
 0x23a   :  { %5546 = vmatprep.subr.bf16.mxu0 %v7403_v27  ;;  %5248 = vmatprep.mubr.bf16.mxu1 %v7959_v53  ;;  %v7479_v26 = vld [vmem:[#allocation5 + $0xeb0] ss:$24 sps:$4 sm:$0xff]   ;;  %v7484_v27 = vld [vmem:[#allocation5 + $0xedc] ss:$24 sps:$4 sm:$0xff]  }
 0x23b   :  { %5576 = vmatprep.mubr.bf16.mxu0 %v7959_v53  ;;  %v7419_v53 = vld [vmem:[#allocation5 + $0xcd0] ss:$24 sps:$4 sm:$0xff]  }
 0x23c   :  { %5219 = vmatpush1.bf16.msra.mxu1 %v7398_v29  ;;  %v7487_v29 = vld [vmem:[#allocation5 + $0xee4] ss:$24 sps:$4 sm:$0xff]  }
 0x23d   :  { %5547 = vmatpush1.bf16.msra.mxu0 %v7401_v30  ;;  %5220 = vmatprep.subr.bf16.mxu1 %v7406_v31  ;;  %v7482_v30 = vld [vmem:[#allocation5 + $0xed8] ss:$24 sps:$4 sm:$0xff]  }
 0x23e   :  { %5548 = vmatprep.subr.bf16.mxu0 %v7409_v10  ;;  %v7485_v31 = vld [vmem:[#allocation5 + $0xee0] ss:$24 sps:$4 sm:$0xff]   ;;  %v7490_v10 = vld [vmem:[#allocation5 + $0xf0c] ss:$24 sps:$4 sm:$0xff]  }
 0x240   :  { %5221 = vmatpush1.bf16.msra.mxu1 %v7404_v32  ;;  %v7493_v32 = vld [vmem:[#allocation5 + $0xf14] ss:$24 sps:$4 sm:$0xff]  }
 0x241   :  { %5549 = vmatpush1.bf16.msra.mxu0 %v7407_v34  ;;  %5222 = vmatprep.subr.bf16.mxu1 %v7412_v35  ;;  %v7488_v34 = vld [vmem:[#allocation5 + $0xf08] ss:$24 sps:$4 sm:$0xff]  }
 0x242   :  { %5550 = vmatprep.subr.bf16.mxu0 %v7415_v0  ;;  %v7491_v35 = vld [vmem:[#allocation5 + $0xf10] ss:$24 sps:$4 sm:$0xff]   ;;  %v7496_v0 = vld [vmem:[#allocation5 + $0xf3c] ss:$24 sps:$4 sm:$0xff]  }
 0x244   :  { %5223 = vmatpush1.bf16.msra.mxu1 %v7410_v37  ;;  %v7499_v37 = vld [vmem:[#allocation5 + $0xf44] ss:$24 sps:$4 sm:$0xff]  }
 0x245   :  { %5551 = vmatpush1.bf16.msra.mxu0 %v7413_v38  ;;  %5224 = vmatprep.subr.bf16.mxu1 %v7418_v36  ;;  %v7494_v38 = vld [vmem:[#allocation5 + $0xf38] ss:$24 sps:$4 sm:$0xff]  }
 0x246   :  { %5552 = vmatprep.subr.bf16.mxu0 %v7421_v39  ;;  %v7497_v36 = vld [vmem:[#allocation5 + $0xf40] ss:$24 sps:$4 sm:$0xff]   ;;  %v7502_v39 = vld [vmem:[#allocation5 + $0xf6c] ss:$24 sps:$4 sm:$0xff]  }
 0x248   :  { %5225 = vmatpush1.bf16.msra.mxu1 %v7416_v40  ;;  %v7505_v40 = vld [vmem:[#allocation5 + $0xf74] ss:$24 sps:$4 sm:$0xff]  }
 0x249   :  { %5553 = vmatpush1.bf16.msra.mxu0 %v7419_v53  ;;  %5226 = vmatprep.subr.bf16.mxu1 %v7424_v44  ;;  %v7500_v53 = vld [vmem:[#allocation5 + $0xf68] ss:$24 sps:$4 sm:$0xff]  }
 0x24a   :  { %5554 = vmatprep.subr.bf16.mxu0 %v7427_v45  ;;  %v7503_v44 = vld [vmem:[#allocation5 + $0xf70] ss:$24 sps:$4 sm:$0xff]   ;;  %v7508_v45 = vld [vmem:[#allocation5 + $0xf9c] ss:$24 sps:$4 sm:$0xff]  }
 0x24c   :  { %5227 = vmatpush1.bf16.msra.mxu1 %v7422_v46  ;;  %v7506_v46 = vld [vmem:[#allocation5 + $0xf98] ss:$24 sps:$4 sm:$0xff]  }
 0x24d   :  { %5555 = vmatpush1.bf16.msra.mxu0 %v7425_v47  ;;  %5228 = vmatprep.subr.bf16.mxu1 %v7430_v22  ;;  %v7509_v47 = vld [vmem:[#allocation5 + $0xfa0] ss:$24 sps:$4 sm:$0xff]   ;;  %v7514_v22 = vld [vmem:[#allocation5 + $0xfcc] ss:$24 sps:$4 sm:$0xff]  }
 0x24e   :  { %5556 = vmatprep.subr.bf16.mxu0 %v7433_v51  ;;  %v7517_v51 = vld [vmem:[#allocation5 + $0xfd4] ss:$24 sps:$4 sm:$0xff]  }
 0x250   :  { %5229 = vmatpush1.bf16.msra.mxu1 %v7428_v52  ;;  %v7512_v52 = vld [vmem:[#allocation5 + $0xfc8] ss:$24 sps:$4 sm:$0xff]  }
 0x251   :  { %5557 = vmatpush1.bf16.msra.mxu0 %v7431_v54  ;;  %5230 = vmatprep.subr.bf16.mxu1 %v7436_v55  ;;  %v7520_v54 = vld [vmem:[#allocation5 + $0xffc] ss:$24 sps:$4 sm:$0xff]  }
 0x252   :  { %5558 = vmatprep.subr.bf16.mxu0 %v7439_v56  ;;  %v7523_v55 = vld [vmem:[#allocation5 + $0x1004] ss:$24 sps:$4 sm:$0xff]   ;;  %v7518_v56 = vld [vmem:[#allocation5 + $0xff8] ss:$24 sps:$4 sm:$0xff]  }
 0x254   :  { %5231 = vmatpush1.bf16.msra.mxu1 %v7434_v28  ;;  %v7521_v28 = vld [vmem:[#allocation5 + $0x1000] ss:$24 sps:$4 sm:$0xff]  }
 0x255   :  { %5559 = vmatpush1.bf16.msra.mxu0 %v7437_v57  ;;  %5232 = vmatprep.subr.bf16.mxu1 %v7442_v58  ;;  %v7526_v57 = vld [vmem:[#allocation5 + $0x102c] ss:$24 sps:$4 sm:$0xff]  }
 0x256   :  { %5560 = vmatprep.subr.bf16.mxu0 %v7445_v59  ;;  %v7529_v58 = vld [vmem:[#allocation5 + $0x1034] ss:$24 sps:$4 sm:$0xff]   ;;  %v7524_v59 = vld [vmem:[#allocation5 + $0x1028] ss:$24 sps:$4 sm:$0xff]  }
 0x258   :  { %5233 = vmatpush1.bf16.msra.mxu1 %v7440_v60  ;;  %v7527_v60 = vld [vmem:[#allocation5 + $0x1030] ss:$24 sps:$4 sm:$0xff]  }
 0x259   :  { %5561 = vmatpush1.bf16.msra.mxu0 %v7443_v42  ;;  %5234 = vmatprep.subr.bf16.mxu1 %v7448_v61  ;;  %v7532_v42 = vld [vmem:[#allocation5 + $0x105c] ss:$24 sps:$4 sm:$0xff]  }
 0x25a   :  { %5562 = vmatprep.subr.bf16.mxu0 %v7451_v63  ;;  %v7535_v61 = vld [vmem:[#allocation5 + $0x1064] ss:$24 sps:$4 sm:$0xff]   ;;  %v7530_v63 = vld [vmem:[#allocation5 + $0x1058] ss:$24 sps:$4 sm:$0xff]  }
 0x25c   :  { %5235 = vmatpush1.bf16.msra.mxu1 %v7446_v2  ;;  %v7533_v2 = vld [vmem:[#allocation5 + $0x1060] ss:$24 sps:$4 sm:$0xff]  }
 0x25d   :  { %5563 = vmatpush1.bf16.msra.mxu0 %v7449_v3  ;;  %5236 = vmatprep.subr.bf16.mxu1 %v7454_v4  ;;  %v7538_v3 = vld [vmem:[#allocation5 + $0x108c] ss:$24 sps:$4 sm:$0xff]  }
 0x25e   :  { %5564 = vmatprep.subr.bf16.mxu0 %v7457_v49  ;;  %v7541_v4 = vld [vmem:[#allocation5 + $0x1094] ss:$24 sps:$4 sm:$0xff]   ;;  %v7536_v49 = vld [vmem:[#allocation5 + $0x1088] ss:$24 sps:$4 sm:$0xff]  }
 0x260   :  { %5237 = vmatpush1.bf16.msra.mxu1 %v7452_v5  ;;  %v7539_v5 = vld [vmem:[#allocation5 + $0x1090] ss:$24 sps:$4 sm:$0xff]  }
 0x261   :  { %5565 = vmatpush1.bf16.msra.mxu0 %v7455_v6  ;;  %5238 = vmatprep.subr.bf16.mxu1 %v7460_v7  ;;  %v7544_v6 = vld [vmem:[#allocation5 + $0x10bc] ss:$24 sps:$4 sm:$0xff]  }
 0x262   :  { %5566 = vmatprep.subr.bf16.mxu0 %v7463_v8  ;;  %v7547_v7 = vld [vmem:[#allocation5 + $0x10c4] ss:$24 sps:$4 sm:$0xff]   ;;  %v7542_v8 = vld [vmem:[#allocation5 + $0x10b8] ss:$24 sps:$4 sm:$0xff]  }
 0x264   :  { %5239 = vmatpush1.bf16.msra.mxu1 %v7458_v9  ;;  %v7545_v9 = vld [vmem:[#allocation5 + $0x10c0] ss:$24 sps:$4 sm:$0xff]  }
 0x265   :  { %5567 = vmatpush1.bf16.msra.mxu0 %v7461_v13  ;;  %5240 = vmatprep.subr.bf16.mxu1 %v7466_v14  ;;  %v7550_v13 = vld [vmem:[#allocation5 + $0x10ec] ss:$24 sps:$4 sm:$0xff]  }
 0x266   :  { %5568 = vmatprep.subr.bf16.mxu0 %v7469_v15  ;;  %v7553_v14 = vld [vmem:[#allocation5 + $0x10f4] ss:$24 sps:$4 sm:$0xff]   ;;  %v7548_v15 = vld [vmem:[#allocation5 + $0x10e8] ss:$24 sps:$4 sm:$0xff]  }
 0x268   :  { %5241 = vmatpush1.bf16.msra.mxu1 %v7464_v16  ;;  %v7551_v16 = vld [vmem:[#allocation5 + $0x10f0] ss:$24 sps:$4 sm:$0xff]  }
 0x269   :  { %5569 = vmatpush1.bf16.msra.mxu0 %v7467_v17  ;;  %5242 = vmatprep.subr.bf16.mxu1 %v7472_v18  ;;  %v7556_v17 = vld [vmem:[#allocation5 + $0x111c] ss:$24 sps:$4 sm:$0xff]  }
 0x26a   :  { %5570 = vmatprep.subr.bf16.mxu0 %v7475_v19  ;;  %v7559_v18 = vld [vmem:[#allocation5 + $0x1124] ss:$24 sps:$4 sm:$0xff]   ;;  %v7554_v19 = vld [vmem:[#allocation5 + $0x1118] ss:$24 sps:$4 sm:$0xff]  }
 0x26c   :  { %5243 = vmatpush1.bf16.msra.mxu1 %v7470_v20  ;;  %v7557_v20 = vld [vmem:[#allocation5 + $0x1120] ss:$24 sps:$4 sm:$0xff]  }
 0x26d   :  { %5571 = vmatpush1.bf16.msra.mxu0 %v7473_v21  ;;  %5244 = vmatprep.subr.bf16.mxu1 %v7478_v48  ;;  %v7562_v21 = vld [vmem:[#allocation5 + $0x114c] ss:$24 sps:$4 sm:$0xff]  }
 0x26e   :  { %5572 = vmatprep.subr.bf16.mxu0 %v7481_v24  ;;  %v7565_v48 = vld [vmem:[#allocation5 + $0x1154] ss:$24 sps:$4 sm:$0xff]   ;;  %v7560_v24 = vld [vmem:[#allocation5 + $0x1148] ss:$24 sps:$4 sm:$0xff]  }
 0x270   :  { %5245 = vmatpush1.bf16.msra.mxu1 %v7476_v25  ;;  %v7563_v25 = vld [vmem:[#allocation5 + $0x1150] ss:$24 sps:$4 sm:$0xff]  }
 0x271   :  { %5573 = vmatpush1.bf16.msra.mxu0 %v7479_v26  ;;  %5246 = vmatprep.subr.bf16.mxu1 %v7484_v27  ;;  %v7568_v26 = vld [vmem:[#allocation5 + $0x117c] ss:$24 sps:$4 sm:$0xff]  }
 0x272   :  { %5574 = vmatprep.subr.bf16.mxu0 %v7487_v29  ;;  %v7571_v27 = vld [vmem:[#allocation5 + $0x1184] ss:$24 sps:$4 sm:$0xff]   ;;  %v7566_v29 = vld [vmem:[#allocation5 + $0x1178] ss:$24 sps:$4 sm:$0xff]  }
 0x274   :  { %5247 = vmatpush1.bf16.msra.mxu1 %v7482_v30  ;;  %v7569_v30 = vld [vmem:[#allocation5 + $0x1180] ss:$24 sps:$4 sm:$0xff]  }
 0x275   :  { %5575 = vmatpush1.bf16.msra.mxu0 %v7485_v31  ;;  %5257 = vmatprep.subr.bf16.mxu1 %v7490_v10  ;;  %v7574_v31 = vld [vmem:[#allocation5 + $0x11ac] ss:$24 sps:$4 sm:$0xff]  }
 0x276   :  { %5585 = vmatprep.subr.bf16.mxu0 %v7493_v32  ;;  %v7577_v10 = vld [vmem:[#allocation5 + $0x11b4] ss:$24 sps:$4 sm:$0xff]   ;;  %v7572_v32 = vld [vmem:[#allocation5 + $0x11a8] ss:$24 sps:$4 sm:$0xff]  }
 0x277   :  { %5249 = vmatmul.mubr.bf16.vlgmr.msra.gmra.mrb[4].mxu1 %v7965_v11 }
 0x278   :  { %5577 = vmatmul.mubr.bf16.vlgmr.msra.gmra.mrb[4].mxu0 %v7965_v11  ;;  %5258 = vmatpush1.bf16.msra.mxu1 %v7488_v34  ;;  %v7511_v11 = vld [vmem:[#allocation5 + $0xfa4] ss:$24 sps:$4 sm:$0xff]   ;;  %v7575_v34 = vld [vmem:[#allocation5 + $0x11b0] ss:$24 sps:$4 sm:$0xff]  }
 0x279   :  { %5586 = vmatpush1.bf16.msra.mxu0 %v7491_v35  ;;  %5259 = vmatprep.subr.bf16.mxu1 %v7496_v0  ;;  %v7580_v35 = vld [vmem:[#allocation5 + $0x11dc] ss:$24 sps:$4 sm:$0xff]  }
 0x27a   :  { %5587 = vmatprep.subr.bf16.mxu0 %v7499_v37  ;;  %5289 = vmatprep.mubr.bf16.mxu1 %v7971_v41  ;;  %v7583_v0 = vld [vmem:[#allocation5 + $0x11e4] ss:$24 sps:$4 sm:$0xff]   ;;  %v7578_v37 = vld [vmem:[#allocation5 + $0x11d8] ss:$24 sps:$4 sm:$0xff]  }
 0x27b   :  { %5617 = vmatprep.mubr.bf16.mxu0 %v7971_v41  ;;  %v7515_v41 = vld [vmem:[#allocation5 + $0xfd0] ss:$24 sps:$4 sm:$0xff]  }
 0x27c   :  { %5260 = vmatpush1.bf16.msra.mxu1 %v7494_v38  ;;  %v7581_v38 = vld [vmem:[#allocation5 + $0x11e0] ss:$24 sps:$4 sm:$0xff]  }
 0x27d   :  { %5588 = vmatpush1.bf16.msra.mxu0 %v7497_v36  ;;  %5261 = vmatprep.subr.bf16.mxu1 %v7502_v39  ;;  %v7586_v36 = vld [vmem:[#allocation5 + $0x120c] ss:$24 sps:$4 sm:$0xff]  }
 0x27e   :  { %5589 = vmatprep.subr.bf16.mxu0 %v7505_v40  ;;  %v7589_v39 = vld [vmem:[#allocation5 + $0x1214] ss:$24 sps:$4 sm:$0xff]   ;;  %v7584_v40 = vld [vmem:[#allocation5 + $0x1208] ss:$24 sps:$4 sm:$0xff]  }
 0x280   :  { %5262 = vmatpush1.bf16.msra.mxu1 %v7500_v53  ;;  %v7587_v53 = vld [vmem:[#allocation5 + $0x1210] ss:$24 sps:$4 sm:$0xff]  }
 0x281   :  { %5590 = vmatpush1.bf16.msra.mxu0 %v7503_v44  ;;  %5263 = vmatprep.subr.bf16.mxu1 %v7508_v45  ;;  %v7592_v44 = vld [vmem:[#allocation5 + $0x123c] ss:$24 sps:$4 sm:$0xff]  }
 0x282   :  { %5591 = vmatprep.subr.bf16.mxu0 %v7511_v11  ;;  %v7595_v45 = vld [vmem:[#allocation5 + $0x1244] ss:$24 sps:$4 sm:$0xff]   ;;  %v7590_v11 = vld [vmem:[#allocation5 + $0x1238] ss:$24 sps:$4 sm:$0xff]  }
 0x284   :  { %5264 = vmatpush1.bf16.msra.mxu1 %v7506_v46  ;;  %v7593_v46 = vld [vmem:[#allocation5 + $0x1240] ss:$24 sps:$4 sm:$0xff]  }
 0x285   :  { %5592 = vmatpush1.bf16.msra.mxu0 %v7509_v47  ;;  %5265 = vmatprep.subr.bf16.mxu1 %v7514_v22  ;;  %v7598_v47 = vld [vmem:[#allocation5 + $0x126c] ss:$24 sps:$4 sm:$0xff]  }
 0x286   :  { %5593 = vmatprep.subr.bf16.mxu0 %v7517_v51  ;;  %v7601_v22 = vld [vmem:[#allocation5 + $0x1274] ss:$24 sps:$4 sm:$0xff]   ;;  %v7596_v51 = vld [vmem:[#allocation5 + $0x1268] ss:$24 sps:$4 sm:$0xff]  }
 0x288   :  { %5266 = vmatpush1.bf16.msra.mxu1 %v7512_v52  ;;  %v7599_v52 = vld [vmem:[#allocation5 + $0x1270] ss:$24 sps:$4 sm:$0xff]  }
 0x289   :  { %5594 = vmatpush1.bf16.msra.mxu0 %v7515_v41  ;;  %5267 = vmatprep.subr.bf16.mxu1 %v7520_v54  ;;  %v7604_v41 = vld [vmem:[#allocation5 + $0x129c] ss:$24 sps:$4 sm:$0xff]   ;;  %v7602_v54 = vld [vmem:[#allocation5 + $0x1298] ss:$24 sps:$4 sm:$0xff]  }
 0x28a   :  { %5595 = vmatprep.subr.bf16.mxu0 %v7523_v55  ;;  %v7605_v55 = vld [vmem:[#allocation5 + $0x12a0] ss:$24 sps:$4 sm:$0xff]  }
 0x28c   :  { %5268 = vmatpush1.bf16.msra.mxu1 %v7518_v56  ;;  %v7610_v56 = vld [vmem:[#allocation5 + $0x12cc] ss:$24 sps:$4 sm:$0xff]  }
 0x28d   :  { %5596 = vmatpush1.bf16.msra.mxu0 %v7521_v28  ;;  %5269 = vmatprep.subr.bf16.mxu1 %v7526_v57  ;;  %v7613_v28 = vld [vmem:[#allocation5 + $0x12d4] ss:$24 sps:$4 sm:$0xff]   ;;  %v7608_v57 = vld [vmem:[#allocation5 + $0x12c8] ss:$24 sps:$4 sm:$0xff]  }
 0x28e   :  { %5597 = vmatprep.subr.bf16.mxu0 %v7529_v58  ;;  %v7616_v58 = vld [vmem:[#allocation5 + $0x12fc] ss:$24 sps:$4 sm:$0xff]  }
 0x290   :  { %5270 = vmatpush1.bf16.msra.mxu1 %v7524_v59  ;;  %v7619_v59 = vld [vmem:[#allocation5 + $0x1304] ss:$24 sps:$4 sm:$0xff]  }
 0x291   :  { %5598 = vmatpush1.bf16.msra.mxu0 %v7527_v60  ;;  %5271 = vmatprep.subr.bf16.mxu1 %v7532_v42  ;;  %v7614_v60 = vld [vmem:[#allocation5 + $0x12f8] ss:$24 sps:$4 sm:$0xff]  }
 0x292   :  { %5599 = vmatprep.subr.bf16.mxu0 %v7535_v61  ;;  %v7617_v42 = vld [vmem:[#allocation5 + $0x1300] ss:$24 sps:$4 sm:$0xff]   ;;  %v7622_v61 = vld [vmem:[#allocation5 + $0x132c] ss:$24 sps:$4 sm:$0xff]  }
 0x294   :  { %5272 = vmatpush1.bf16.msra.mxu1 %v7530_v63  ;;  %v7625_v63 = vld [vmem:[#allocation5 + $0x1334] ss:$24 sps:$4 sm:$0xff]  }
 0x295   :  { %5600 = vmatpush1.bf16.msra.mxu0 %v7533_v2  ;;  %5273 = vmatprep.subr.bf16.mxu1 %v7538_v3  ;;  %v7620_v2 = vld [vmem:[#allocation5 + $0x1328] ss:$24 sps:$4 sm:$0xff]  }
 0x296   :  { %5601 = vmatprep.subr.bf16.mxu0 %v7541_v4  ;;  %v7623_v3 = vld [vmem:[#allocation5 + $0x1330] ss:$24 sps:$4 sm:$0xff]   ;;  %v7628_v4 = vld [vmem:[#allocation5 + $0x135c] ss:$24 sps:$4 sm:$0xff]  }
 0x298   :  { %5274 = vmatpush1.bf16.msra.mxu1 %v7536_v49  ;;  %v7631_v49 = vld [vmem:[#allocation5 + $0x1364] ss:$24 sps:$4 sm:$0xff]  }
 0x299   :  { %5602 = vmatpush1.bf16.msra.mxu0 %v7539_v5  ;;  %5275 = vmatprep.subr.bf16.mxu1 %v7544_v6  ;;  %v7626_v5 = vld [vmem:[#allocation5 + $0x1358] ss:$24 sps:$4 sm:$0xff]  }
 0x29a   :  { %5603 = vmatprep.subr.bf16.mxu0 %v7547_v7  ;;  %v7629_v6 = vld [vmem:[#allocation5 + $0x1360] ss:$24 sps:$4 sm:$0xff]   ;;  %v7634_v7 = vld [vmem:[#allocation5 + $0x138c] ss:$24 sps:$4 sm:$0xff]  }
 0x29c   :  { %5276 = vmatpush1.bf16.msra.mxu1 %v7542_v8  ;;  %v7637_v8 = vld [vmem:[#allocation5 + $0x1394] ss:$24 sps:$4 sm:$0xff]  }
 0x29d   :  { %5604 = vmatpush1.bf16.msra.mxu0 %v7545_v9  ;;  %5277 = vmatprep.subr.bf16.mxu1 %v7550_v13  ;;  %v7632_v9 = vld [vmem:[#allocation5 + $0x1388] ss:$24 sps:$4 sm:$0xff]  }
 0x29e   :  { %5605 = vmatprep.subr.bf16.mxu0 %v7553_v14  ;;  %v7635_v13 = vld [vmem:[#allocation5 + $0x1390] ss:$24 sps:$4 sm:$0xff]   ;;  %v7640_v14 = vld [vmem:[#allocation5 + $0x13bc] ss:$24 sps:$4 sm:$0xff]  }
 0x2a0   :  { %5278 = vmatpush1.bf16.msra.mxu1 %v7548_v15  ;;  %v7643_v15 = vld [vmem:[#allocation5 + $0x13c4] ss:$24 sps:$4 sm:$0xff]  }
 0x2a1   :  { %5606 = vmatpush1.bf16.msra.mxu0 %v7551_v16  ;;  %5279 = vmatprep.subr.bf16.mxu1 %v7556_v17  ;;  %v7638_v16 = vld [vmem:[#allocation5 + $0x13b8] ss:$24 sps:$4 sm:$0xff]  }
 0x2a2   :  { %5607 = vmatprep.subr.bf16.mxu0 %v7559_v18  ;;  %v7641_v17 = vld [vmem:[#allocation5 + $0x13c0] ss:$24 sps:$4 sm:$0xff]   ;;  %v7646_v18 = vld [vmem:[#allocation5 + $0x13ec] ss:$24 sps:$4 sm:$0xff]  }
 0x2a4   :  { %5280 = vmatpush1.bf16.msra.mxu1 %v7554_v19  ;;  %v7649_v19 = vld [vmem:[#allocation5 + $0x13f4] ss:$24 sps:$4 sm:$0xff]  }
 0x2a5   :  { %5608 = vmatpush1.bf16.msra.mxu0 %v7557_v20  ;;  %5281 = vmatprep.subr.bf16.mxu1 %v7562_v21  ;;  %v7644_v20 = vld [vmem:[#allocation5 + $0x13e8] ss:$24 sps:$4 sm:$0xff]  }
 0x2a6   :  { %5609 = vmatprep.subr.bf16.mxu0 %v7565_v48  ;;  %v7647_v21 = vld [vmem:[#allocation5 + $0x13f0] ss:$24 sps:$4 sm:$0xff]   ;;  %v7652_v48 = vld [vmem:[#allocation5 + $0x141c] ss:$24 sps:$4 sm:$0xff]  }
 0x2a8   :  { %5282 = vmatpush1.bf16.msra.mxu1 %v7560_v24  ;;  %v7655_v24 = vld [vmem:[#allocation5 + $0x1424] ss:$24 sps:$4 sm:$0xff]  }
 0x2a9   :  { %5610 = vmatpush1.bf16.msra.mxu0 %v7563_v25  ;;  %5283 = vmatprep.subr.bf16.mxu1 %v7568_v26  ;;  %v7650_v25 = vld [vmem:[#allocation5 + $0x1418] ss:$24 sps:$4 sm:$0xff]  }
 0x2aa   :  { %5611 = vmatprep.subr.bf16.mxu0 %v7571_v27  ;;  %v7653_v26 = vld [vmem:[#allocation5 + $0x1420] ss:$24 sps:$4 sm:$0xff]   ;;  %v7658_v27 = vld [vmem:[#allocation5 + $0x144c] ss:$24 sps:$4 sm:$0xff]  }
 0x2ac   :  { %5284 = vmatpush1.bf16.msra.mxu1 %v7566_v29  ;;  %v7661_v29 = vld [vmem:[#allocation5 + $0x1454] ss:$24 sps:$4 sm:$0xff]  }
 0x2ad   :  { %5612 = vmatpush1.bf16.msra.mxu0 %v7569_v30  ;;  %5285 = vmatprep.subr.bf16.mxu1 %v7574_v31  ;;  %v7656_v30 = vld [vmem:[#allocation5 + $0x1448] ss:$24 sps:$4 sm:$0xff]  }
 0x2ae   :  { %5613 = vmatprep.subr.bf16.mxu0 %v7577_v10  ;;  %v7659_v31 = vld [vmem:[#allocation5 + $0x1450] ss:$24 sps:$4 sm:$0xff]   ;;  %v7664_v10 = vld [vmem:[#allocation5 + $0x147c] ss:$24 sps:$4 sm:$0xff]  }
 0x2b0   :  { %5286 = vmatpush1.bf16.msra.mxu1 %v7572_v32  ;;  %v7667_v32 = vld [vmem:[#allocation5 + $0x1484] ss:$24 sps:$4 sm:$0xff]  }
 0x2b1   :  { %5614 = vmatpush1.bf16.msra.mxu0 %v7575_v34  ;;  %5287 = vmatprep.subr.bf16.mxu1 %v7580_v35  ;;  %v7662_v34 = vld [vmem:[#allocation5 + $0x1478] ss:$24 sps:$4 sm:$0xff]  }
 0x2b2   :  { %5615 = vmatprep.subr.bf16.mxu0 %v7583_v0  ;;  %v7665_v35 = vld [vmem:[#allocation5 + $0x1480] ss:$24 sps:$4 sm:$0xff]   ;;  %v7670_v0 = vld [vmem:[#allocation5 + $0x14ac] ss:$24 sps:$4 sm:$0xff]  }
 0x2b4   :  { %5288 = vmatpush1.bf16.msra.mxu1 %v7578_v37  ;;  %v7673_v37 = vld [vmem:[#allocation5 + $0x14b4] ss:$24 sps:$4 sm:$0xff]  }
 0x2b5   :  { %5616 = vmatpush1.bf16.msra.mxu0 %v7581_v38  ;;  %5298 = vmatprep.subr.bf16.mxu1 %v7586_v36  ;;  %v7668_v38 = vld [vmem:[#allocation5 + $0x14a8] ss:$24 sps:$4 sm:$0xff]  }
 0x2b6   :  { %5626 = vmatprep.subr.bf16.mxu0 %v7589_v39  ;;  %v7671_v36 = vld [vmem:[#allocation5 + $0x14b0] ss:$24 sps:$4 sm:$0xff]   ;;  %v7676_v39 = vld [vmem:[#allocation5 + $0x14dc] ss:$24 sps:$4 sm:$0xff]  }
 0x2b7   :  { %5290 = vmatmul.mubr.bf16.vlgmr.msra.gmra.mrb[4].mxu1 %v7977_v23 }
 0x2b8   :  { %5618 = vmatmul.mubr.bf16.vlgmr.msra.gmra.mrb[4].mxu0 %v7977_v23  ;;  %5299 = vmatpush1.bf16.msra.mxu1 %v7584_v40  ;;  %v7607_v23 = vld [vmem:[#allocation5 + $0x12a4] ss:$24 sps:$4 sm:$0xff]  }
 0x2b9   :  { %5627 = vmatpush1.bf16.msra.mxu0 %v7587_v53  ;;  %5300 = vmatprep.subr.bf16.mxu1 %v7592_v44  ;;  %v7679_v40 = vld [vmem:[#allocation5 + $0x14e4] ss:$24 sps:$4 sm:$0xff]   ;;  %v7674_v53 = vld [vmem:[#allocation5 + $0x14d8] ss:$24 sps:$4 sm:$0xff]  }
 0x2ba   :  { %5628 = vmatprep.subr.bf16.mxu0 %v7595_v45  ;;  %5330 = vmatprep.mubr.bf16.mxu1 %v7983_v33  ;;  %v7677_v44 = vld [vmem:[#allocation5 + $0x14e0] ss:$24 sps:$4 sm:$0xff]   ;;  %v7682_v45 = vld [vmem:[#allocation5 + $0x150c] ss:$24 sps:$4 sm:$0xff]  }
 0x2bb   :  { %5658 = vmatprep.mubr.bf16.mxu0 %v7983_v33  ;;  %v7611_v33 = vld [vmem:[#allocation5 + $0x12d0] ss:$24 sps:$4 sm:$0xff]  }
 0x2bc   :  { %5301 = vmatpush1.bf16.msra.mxu1 %v7590_v11  ;;  %v7685_v11 = vld [vmem:[#allocation5 + $0x1514] ss:$24 sps:$4 sm:$0xff]  }
 0x2bd   :  { %5629 = vmatpush1.bf16.msra.mxu0 %v7593_v46  ;;  %5302 = vmatprep.subr.bf16.mxu1 %v7598_v47  ;;  %v7680_v46 = vld [vmem:[#allocation5 + $0x1508] ss:$24 sps:$4 sm:$0xff]  }
 0x2be   :  { %5630 = vmatprep.subr.bf16.mxu0 %v7601_v22  ;;  %v7683_v47 = vld [vmem:[#allocation5 + $0x1510] ss:$24 sps:$4 sm:$0xff]   ;;  %v7688_v22 = vld [vmem:[#allocation5 + $0x153c] ss:$24 sps:$4 sm:$0xff]  }
 0x2c0   :  { %5303 = vmatpush1.bf16.msra.mxu1 %v7596_v51  ;;  %v7691_v51 = vld [vmem:[#allocation5 + $0x1544] ss:$24 sps:$4 sm:$0xff]  }
 0x2c1   :  { %5631 = vmatpush1.bf16.msra.mxu0 %v7599_v52  ;;  %5304 = vmatprep.subr.bf16.mxu1 %v7604_v41  ;;  %v7686_v52 = vld [vmem:[#allocation5 + $0x1538] ss:$24 sps:$4 sm:$0xff]  }
 0x2c2   :  { %5632 = vmatprep.subr.bf16.mxu0 %v7607_v23  ;;  %v7689_v41 = vld [vmem:[#allocation5 + $0x1540] ss:$24 sps:$4 sm:$0xff]   ;;  %v7694_v23 = vld [vmem:[#allocation5 + $0x156c] ss:$24 sps:$4 sm:$0xff]  }
 0x2c4   :  { %5305 = vmatpush1.bf16.msra.mxu1 %v7602_v54  ;;  %v7697_v54 = vld [vmem:[#allocation5 + $0x1574] ss:$24 sps:$4 sm:$0xff]  }
 0x2c5   :  { %5633 = vmatpush1.bf16.msra.mxu0 %v7605_v55  ;;  %5306 = vmatprep.subr.bf16.mxu1 %v7610_v56  ;;  %v7692_v55 = vld [vmem:[#allocation5 + $0x1568] ss:$24 sps:$4 sm:$0xff]  }
 0x2c6   :  { %5634 = vmatprep.subr.bf16.mxu0 %v7613_v28  ;;  %v7695_v56 = vld [vmem:[#allocation5 + $0x1570] ss:$24 sps:$4 sm:$0xff]   ;;  %v7700_v28 = vld [vmem:[#allocation5 + $0x159c] ss:$24 sps:$4 sm:$0xff]  }
 0x2c8   :  { %5307 = vmatpush1.bf16.msra.mxu1 %v7608_v57  ;;  %v7698_v57 = vld [vmem:[#allocation5 + $0x1598] ss:$24 sps:$4 sm:$0xff]  }
 0x2c9   :  { %5635 = vmatpush1.bf16.msra.mxu0 %v7611_v33  ;;  %5308 = vmatprep.subr.bf16.mxu1 %v7616_v58  ;;  %v7701_v33 = vld [vmem:[#allocation5 + $0x15a0] ss:$24 sps:$4 sm:$0xff]   ;;  %v7706_v58 = vld [vmem:[#allocation5 + $0x15cc] ss:$24 sps:$4 sm:$0xff]  }
 0x2ca   :  { %5636 = vmatprep.subr.bf16.mxu0 %v7619_v59  ;;  %v7709_v59 = vld [vmem:[#allocation5 + $0x15d4] ss:$24 sps:$4 sm:$0xff]  }
 0x2cc   :  { %5309 = vmatpush1.bf16.msra.mxu1 %v7614_v60  ;;  %v7704_v60 = vld [vmem:[#allocation5 + $0x15c8] ss:$24 sps:$4 sm:$0xff]  }
 0x2cd   :  { %5637 = vmatpush1.bf16.msra.mxu0 %v7617_v42  ;;  %5310 = vmatprep.subr.bf16.mxu1 %v7622_v61  ;;  %v7712_v42 = vld [vmem:[#allocation5 + $0x15fc] ss:$24 sps:$4 sm:$0xff]  }
 0x2ce   :  { %5638 = vmatprep.subr.bf16.mxu0 %v7625_v63  ;;  %v7715_v61 = vld [vmem:[#allocation5 + $0x1604] ss:$24 sps:$4 sm:$0xff]   ;;  %v7710_v63 = vld [vmem:[#allocation5 + $0x15f8] ss:$24 sps:$4 sm:$0xff]  }
 0x2d0   :  { %5311 = vmatpush1.bf16.msra.mxu1 %v7620_v2  ;;  %v7713_v2 = vld [vmem:[#allocation5 + $0x1600] ss:$24 sps:$4 sm:$0xff]  }
 0x2d1   :  { %5639 = vmatpush1.bf16.msra.mxu0 %v7623_v3  ;;  %5312 = vmatprep.subr.bf16.mxu1 %v7628_v4  ;;  %v7718_v3 = vld [vmem:[#allocation5 + $0x162c] ss:$24 sps:$4 sm:$0xff]  }
 0x2d2   :  { %5640 = vmatprep.subr.bf16.mxu0 %v7631_v49  ;;  %v7721_v4 = vld [vmem:[#allocation5 + $0x1634] ss:$24 sps:$4 sm:$0xff]   ;;  %v7716_v49 = vld [vmem:[#allocation5 + $0x1628] ss:$24 sps:$4 sm:$0xff]  }
 0x2d4   :  { %5313 = vmatpush1.bf16.msra.mxu1 %v7626_v5  ;;  %v7719_v5 = vld [vmem:[#allocation5 + $0x1630] ss:$24 sps:$4 sm:$0xff]  }
 0x2d5   :  { %5641 = vmatpush1.bf16.msra.mxu0 %v7629_v6  ;;  %5314 = vmatprep.subr.bf16.mxu1 %v7634_v7  ;;  %v7724_v6 = vld [vmem:[#allocation5 + $0x165c] ss:$24 sps:$4 sm:$0xff]  }
 0x2d6   :  { %5642 = vmatprep.subr.bf16.mxu0 %v7637_v8  ;;  %v7727_v7 = vld [vmem:[#allocation5 + $0x1664] ss:$24 sps:$4 sm:$0xff]   ;;  %v7722_v8 = vld [vmem:[#allocation5 + $0x1658] ss:$24 sps:$4 sm:$0xff]  }
 0x2d8   :  { %5315 = vmatpush1.bf16.msra.mxu1 %v7632_v9  ;;  %v7725_v9 = vld [vmem:[#allocation5 + $0x1660] ss:$24 sps:$4 sm:$0xff]  }
 0x2d9   :  { %5643 = vmatpush1.bf16.msra.mxu0 %v7635_v13  ;;  %5316 = vmatprep.subr.bf16.mxu1 %v7640_v14  ;;  %v7730_v13 = vld [vmem:[#allocation5 + $0x168c] ss:$24 sps:$4 sm:$0xff]  }
 0x2da   :  { %5644 = vmatprep.subr.bf16.mxu0 %v7643_v15  ;;  %v7733_v14 = vld [vmem:[#allocation5 + $0x1694] ss:$24 sps:$4 sm:$0xff]   ;;  %v7728_v15 = vld [vmem:[#allocation5 + $0x1688] ss:$24 sps:$4 sm:$0xff]  }
 0x2dc   :  { %5317 = vmatpush1.bf16.msra.mxu1 %v7638_v16  ;;  %v7731_v16 = vld [vmem:[#allocation5 + $0x1690] ss:$24 sps:$4 sm:$0xff]  }
 0x2dd   :  { %5645 = vmatpush1.bf16.msra.mxu0 %v7641_v17  ;;  %5318 = vmatprep.subr.bf16.mxu1 %v7646_v18  ;;  %v7736_v17 = vld [vmem:[#allocation5 + $0x16bc] ss:$24 sps:$4 sm:$0xff]  }
 0x2de   :  { %5646 = vmatprep.subr.bf16.mxu0 %v7649_v19  ;;  %v7739_v18 = vld [vmem:[#allocation5 + $0x16c4] ss:$24 sps:$4 sm:$0xff]   ;;  %v7734_v19 = vld [vmem:[#allocation5 + $0x16b8] ss:$24 sps:$4 sm:$0xff]  }
 0x2e0   :  { %5319 = vmatpush1.bf16.msra.mxu1 %v7644_v20  ;;  %v7737_v20 = vld [vmem:[#allocation5 + $0x16c0] ss:$24 sps:$4 sm:$0xff]  }
 0x2e1   :  { %5647 = vmatpush1.bf16.msra.mxu0 %v7647_v21  ;;  %5320 = vmatprep.subr.bf16.mxu1 %v7652_v48  ;;  %v7742_v21 = vld [vmem:[#allocation5 + $0x16ec] ss:$24 sps:$4 sm:$0xff]  }
 0x2e2   :  { %5648 = vmatprep.subr.bf16.mxu0 %v7655_v24  ;;  %v7745_v48 = vld [vmem:[#allocation5 + $0x16f4] ss:$24 sps:$4 sm:$0xff]   ;;  %v7740_v24 = vld [vmem:[#allocation5 + $0x16e8] ss:$24 sps:$4 sm:$0xff]  }
 0x2e4   :  { %5321 = vmatpush1.bf16.msra.mxu1 %v7650_v25  ;;  %v7743_v25 = vld [vmem:[#allocation5 + $0x16f0] ss:$24 sps:$4 sm:$0xff]  }
 0x2e5   :  { %5649 = vmatpush1.bf16.msra.mxu0 %v7653_v26  ;;  %5322 = vmatprep.subr.bf16.mxu1 %v7658_v27  ;;  %v7748_v26 = vld [vmem:[#allocation5 + $0x171c] ss:$24 sps:$4 sm:$0xff]  }
 0x2e6   :  { %5650 = vmatprep.subr.bf16.mxu0 %v7661_v29  ;;  %v7751_v27 = vld [vmem:[#allocation5 + $0x1724] ss:$24 sps:$4 sm:$0xff]   ;;  %v7746_v29 = vld [vmem:[#allocation5 + $0x1718] ss:$24 sps:$4 sm:$0xff]  }
 0x2e8   :  { %5323 = vmatpush1.bf16.msra.mxu1 %v7656_v30  ;;  %v7749_v30 = vld [vmem:[#allocation5 + $0x1720] ss:$24 sps:$4 sm:$0xff]  }
 0x2e9   :  { %5651 = vmatpush1.bf16.msra.mxu0 %v7659_v31  ;;  %5324 = vmatprep.subr.bf16.mxu1 %v7664_v10  ;;  %v7754_v31 = vld [vmem:[#allocation5 + $0x174c] ss:$24 sps:$4 sm:$0xff]  }
 0x2ea   :  { %5652 = vmatprep.subr.bf16.mxu0 %v7667_v32  ;;  %v7757_v10 = vld [vmem:[#allocation5 + $0x1754] ss:$24 sps:$4 sm:$0xff]   ;;  %v7752_v32 = vld [vmem:[#allocation5 + $0x1748] ss:$24 sps:$4 sm:$0xff]  }
 0x2ec   :  { %5325 = vmatpush1.bf16.msra.mxu1 %v7662_v34  ;;  %v7755_v34 = vld [vmem:[#allocation5 + $0x1750] ss:$24 sps:$4 sm:$0xff]  }
 0x2ed   :  { %5653 = vmatpush1.bf16.msra.mxu0 %v7665_v35  ;;  %5326 = vmatprep.subr.bf16.mxu1 %v7670_v0  ;;  %v7760_v35 = vld [vmem:[#allocation5 + $0x177c] ss:$24 sps:$4 sm:$0xff]  }
 0x2ee   :  { %5654 = vmatprep.subr.bf16.mxu0 %v7673_v37  ;;  %v7763_v0 = vld [vmem:[#allocation5 + $0x1784] ss:$24 sps:$4 sm:$0xff]   ;;  %v7758_v37 = vld [vmem:[#allocation5 + $0x1778] ss:$24 sps:$4 sm:$0xff]  }
 0x2f0   :  { %5327 = vmatpush1.bf16.msra.mxu1 %v7668_v38  ;;  %v7761_v38 = vld [vmem:[#allocation5 + $0x1780] ss:$24 sps:$4 sm:$0xff]  }
 0x2f1   :  { %5655 = vmatpush1.bf16.msra.mxu0 %v7671_v36  ;;  %5328 = vmatprep.subr.bf16.mxu1 %v7676_v39  ;;  %v7766_v36 = vld [vmem:[#allocation5 + $0x17ac] ss:$24 sps:$4 sm:$0xff]  }
 0x2f2   :  { %5656 = vmatprep.subr.bf16.mxu0 %v7679_v40  ;;  %v7769_v39 = vld [vmem:[#allocation5 + $0x17b4] ss:$24 sps:$4 sm:$0xff]   ;;  %v7764_v40 = vld [vmem:[#allocation5 + $0x17a8] ss:$24 sps:$4 sm:$0xff]  }
 0x2f4   :  { %5329 = vmatpush1.bf16.msra.mxu1 %v7674_v53  ;;  %v7767_v53 = vld [vmem:[#allocation5 + $0x17b0] ss:$24 sps:$4 sm:$0xff]  }
 0x2f5   :  { %5657 = vmatpush1.bf16.msra.mxu0 %v7677_v44  ;;  %5339 = vmatprep.subr.bf16.mxu1 %v7682_v45  ;;  %v7772_v44 = vld [vmem:[#allocation5 + $0x17dc] ss:$24 sps:$4 sm:$0xff]  }
 0x2f6   :  { %5667 = vmatprep.subr.bf16.mxu0 %v7685_v11  ;;  %v7775_v45 = vld [vmem:[#allocation5 + $0x17e4] ss:$24 sps:$4 sm:$0xff]   ;;  %v7770_v11 = vld [vmem:[#allocation5 + $0x17d8] ss:$24 sps:$4 sm:$0xff]  }
 0x2f7   :  { %5331 = vmatmul.mubr.bf16.vlgmr.msra.gmra.mrb[4].mxu1 %v7989_v43 }
 0x2f8   :  { %5659 = vmatmul.mubr.bf16.vlgmr.msra.gmra.mrb[4].mxu0 %v7989_v43  ;;  %5340 = vmatpush1.bf16.msra.mxu1 %v7680_v46  ;;  %v7703_v43 = vld [vmem:[#allocation5 + $0x15a4] ss:$24 sps:$4 sm:$0xff]   ;;  %v7773_v46 = vld [vmem:[#allocation5 + $0x17e0] ss:$24 sps:$4 sm:$0xff]  }
 0x2f9   :  { %5668 = vmatpush1.bf16.msra.mxu0 %v7683_v47  ;;  %5341 = vmatprep.subr.bf16.mxu1 %v7688_v22  ;;  %v864_v47 = vsub.s32 2, %v8019_v62  ;;  %v868_v22 = vsub.s32 3, %v8019_v62 }
 0x2fa   :  { %5669 = vmatprep.subr.bf16.mxu0 %v7691_v51  ;;  %5371 = vmatprep.mubr.bf16.mxu1 %v7993_v50  ;;  %v7800_v51 = vld [vmem:[#allocation7] sm:$0x3f] }
 0x2fb   :  { %5699 = vmatprep.mubr.bf16.mxu0 %v7993_v50  ;;  %v7707_v50 = vld [vmem:[#allocation5 + $0x15d0] ss:$24 sps:$4 sm:$0xff]  }
 0x2fc   :  { %5342 = vmatpush1.bf16.msra.mxu1 %v7686_v52  ;;  %v865_v52 = vrot.slane %v7800_v51, %v864_v47 }
 0x2fd   :  { %5670 = vmatpush1.bf16.msra.mxu0 %v7689_v41  ;;  %5343 = vmatprep.subr.bf16.mxu1 %v7694_v23  ;;  %v869_v41 = vrot.slane %v7800_v51, %v868_v22  ;;  %v876_v23 = vsub.s32 5, %v8019_v62 }
 0x2fe   :  { %5671 = vmatprep.subr.bf16.mxu0 %v7697_v54 }
 0x300   :  { %5344 = vmatpush1.bf16.msra.mxu1 %v7692_v55 }
 0x301   :  { %5672 = vmatpush1.bf16.msra.mxu0 %v7695_v56  ;;  %5345 = vmatprep.subr.bf16.mxu1 %v7700_v28 }
 0x302   :  { %5673 = vmatprep.subr.bf16.mxu0 %v7703_v43 }
 0x304   :  { %5346 = vmatpush1.bf16.msra.mxu1 %v7698_v57 }
 0x305   :  { %5674 = vmatpush1.bf16.msra.mxu0 %v7701_v33  ;;  %5347 = vmatprep.subr.bf16.mxu1 %v7706_v58  ;;  %v877_v33 = vrot.slane %v7800_v51, %v876_v23 }
 0x306   :  { %5675 = vmatprep.subr.bf16.mxu0 %v7709_v59 }
 0x308   :  { %5348 = vmatpush1.bf16.msra.mxu1 %v7704_v60 }
 0x309   :  { %5676 = vmatpush1.bf16.msra.mxu0 %v7707_v50  ;;  %5349 = vmatprep.subr.bf16.mxu1 %v7712_v42 }
 0x30a   :  { %5677 = vmatprep.subr.bf16.mxu0 %v7715_v61  ;;  %v872_v61 = vsub.s32 4, %v8019_v62 }
 0x30c   :  { %5350 = vmatpush1.bf16.msra.mxu1 %v7710_v63 }
 0x30d   :  { %5678 = vmatpush1.bf16.msra.mxu0 %v7713_v2  ;;  %5351 = vmatprep.subr.bf16.mxu1 %v7718_v3  ;;  %v873_v2 = vrot.slane %v7800_v51, %v872_v61 }
 0x30e   :  { %5679 = vmatprep.subr.bf16.mxu0 %v7721_v4 }
 0x310   :  { %5352 = vmatpush1.bf16.msra.mxu1 %v7716_v49 }
 0x311   :  { %5680 = vmatpush1.bf16.msra.mxu0 %v7719_v5  ;;  %5353 = vmatprep.subr.bf16.mxu1 %v7724_v6 }
 0x312   :  { %5681 = vmatprep.subr.bf16.mxu0 %v7727_v7 }
 0x314   :  { %5354 = vmatpush1.bf16.msra.mxu1 %v7722_v8 }
 0x315   :  { %5682 = vmatpush1.bf16.msra.mxu0 %v7725_v9  ;;  %5355 = vmatprep.subr.bf16.mxu1 %v7730_v13 }
 0x316   :  { %5683 = vmatprep.subr.bf16.mxu0 %v7733_v14 }
 0x318   :  { %5356 = vmatpush1.bf16.msra.mxu1 %v7728_v15 }
 0x319   :  { %5684 = vmatpush1.bf16.msra.mxu0 %v7731_v16  ;;  %5357 = vmatprep.subr.bf16.mxu1 %v7736_v17 }
 0x31a   :  { %5685 = vmatprep.subr.bf16.mxu0 %v7739_v18 }
 0x31c   :  { %5358 = vmatpush1.bf16.msra.mxu1 %v7734_v19 }
 0x31d   :  { %5686 = vmatpush1.bf16.msra.mxu0 %v7737_v20  ;;  %5359 = vmatprep.subr.bf16.mxu1 %v7742_v21 }
 0x31e   :  { %5687 = vmatprep.subr.bf16.mxu0 %v7745_v48 }
 0x320   :  { %5360 = vmatpush1.bf16.msra.mxu1 %v7740_v24 }
 0x321   :  { %5688 = vmatpush1.bf16.msra.mxu0 %v7743_v25  ;;  %5361 = vmatprep.subr.bf16.mxu1 %v7748_v26 }
 0x322   :  { %5689 = vmatprep.subr.bf16.mxu0 %v7751_v27 }
 0x324   :  { %5362 = vmatpush1.bf16.msra.mxu1 %v7746_v29 }
 0x325   :  { %5690 = vmatpush1.bf16.msra.mxu0 %v7749_v30  ;;  %5363 = vmatprep.subr.bf16.mxu1 %v7754_v31 }
 0x326   :  { %5691 = vmatprep.subr.bf16.mxu0 %v7757_v10 }
 0x328   :  { %5364 = vmatpush1.bf16.msra.mxu1 %v7752_v32 }
 0x329   :  { %5692 = vmatpush1.bf16.msra.mxu0 %v7755_v34  ;;  %5365 = vmatprep.subr.bf16.mxu1 %v7760_v35 }
 0x32a   :  { %5693 = vmatprep.subr.bf16.mxu0 %v7763_v0 }
 0x32c   :  { %5366 = vmatpush1.bf16.msra.mxu1 %v7758_v37 }
 0x32d   :  { %5694 = vmatpush1.bf16.msra.mxu0 %v7761_v38  ;;  %5367 = vmatprep.subr.bf16.mxu1 %v7766_v36 }
 0x32e   :  { %5695 = vmatprep.subr.bf16.mxu0 %v7769_v39 }
 0x330   :  { %5368 = vmatpush1.bf16.msra.mxu1 %v7764_v40 }
 0x331   :  { %5696 = vmatpush1.bf16.msra.mxu0 %v7767_v53  ;;  %5369 = vmatprep.subr.bf16.mxu1 %v7772_v44 }
 0x332   :  { %5697 = vmatprep.subr.bf16.mxu0 %v7775_v45 }
 0x334   :  { %5370 = vmatpush1.bf16.msra.mxu1 %v7770_v11 }
 0x335   :  { %5698 = vmatpush1.bf16.msra.mxu0 %v7773_v46 }
 0x337   :  { %5372 = vmatmul.mubr.bf16.vlgmr.msra.gmra.mrb[4].mxu1 %v8001_v1 }
 0x338   :  { %5700 = vmatmul.mubr.bf16.vlgmr.msra.gmra.mrb[4].mxu0 %v8001_v1 }
 0x40a   :  { %v5373_v54 = vpop.f32.mrb[4].mxu1 }
 0x40b   :  { %v5701_v55 = vpop.f32.mrb[4].mxu0  ;;  %v6534_v56 = vadd.f32 %v5373_v54, %v865_v52  ;;  %v5375_v28 = vpop.f32.mrb[5].mxu1 }
 0x40c   :  { %v5703_v43 = vpop.f32.mrb[5].mxu0  ;;  %v6535_v57 = vadd.f32 %v5375_v28, %v869_v41  ;;  %v5377_v58 = vpop.f32.mrb[6].mxu1  ;;  %v6536_v4 = vadd.f32 %v5701_v55, %v873_v2 }
 0x40d   :  { %v5705_v59 = vpop.f32.mrb[6].mxu0  ;;  %v6527_v60 = vmul.f32 -1.442695, %v6534_v56  ;;  %v5378_v1 = vpop.f32.mrb[7].mxu1  ;;  %v6537_v63 = vadd.f32 %v5703_v43, %v877_v33 }
 0x40e   :  { %v5706_v50 = vpop.f32.mrb[7].mxu0  ;;  %v6528_v42 = vmul.f32 -1.442695, %v6535_v57 }
 0x40f   :  { %7782 = vpow2.f32 %v6527_v60  ;;  %v6529_v3 = vmul.f32 -1.442695, %v6537_v63 }
 0x410   :  { %7784 = vpow2.f32 %v6528_v42 }
 0x411   :  { %7786 = vpow2.f32 %v6529_v3 }
 0x412   :  { %7788 = vtanh.f32 %v8023_v12 }
 0x413   :  { %7790 = vtanh.f32 %v6536_v4 }
 0x419   :  { %v7783_v49 = vpop.eup %7782 }
 0x41a   :  { %v7785_v5 = vpop.eup %7784  ;;  %v5718_v6 = vadd.f32 1.0, %v7783_v49 }
 0x41b   :  { %v5727_v7 = vadd.f32 1.0, %v7785_v5  ;;  %v7787_v8 = vpop.eup %7786 }
 0x41c   :  { %7792 = vrcp.f32 %v5718_v6  ;;  %v7789_v9 = vpop.eup %7788  ;;  %v5734_v14 = vadd.f32 1.0, %v7787_v8 }
 0x41d   :  { %7794 = vrcp.f32 %v5727_v7  ;;  %v7791_v13 = vpop.eup %7790 }
 0x41e   :  { %7796 = vrcp.f32 %v5734_v14 }
 0x426   :  { %v7793_v62 = vpop.eup %7792 }
 0x427   :  { %v7795_v15 = vpop.eup %7794  ;;  %v5723_v16 = vmul.f32 %v7793_v62, %v7789_v9 }
 0x428   :  { %v5737_v17 = vmul.f32 %v7795_v15, %v7791_v13  ;;  %v7797_v18 = vpop.eup %7796 }
 0x429   :  { %5740 = vst [vmem:[#allocation8] sm:$0xff] %v5723_v16 }
 0x42a   :  { %7798 = vtanh.f32 %v5737_v17 }
 0x434   :  { %v7799_v12 = vpop.eup %7798 }
 0x435   :  { %v5739_v19 = vmul.f32 %v7799_v12, %v7797_v18 }
 0x437   :  { %5741 = vst [vmem:[#allocation8 + $0x8] sm:$0xff] %v5739_v19 }
 0x438   :  { %7878 = shalt.err (!%p7875_p0)
}
 0x439   :  { %s7879_s25 = scalar_lea.hbm %s8063_s3, 256 }
 0x43a   :  { %p7880_p1 = scmp.ne.s32.totalorder %s8063_s3, %s7879_s25  ;;  %p7883_p2 = scmp.lt.u32.totalorder %s7879_s25, %s8063_s3 }
 0x43c   :  { %p7885_p3 = pnand %p7883_p2, %p7880_p1 }
 0x43e   :  { %7888 = shalt.err (!%p7885_p3)
}
 0x43f   :  { %5751 = dma.vmem_to_hbm [thread:$0]  %s5749_s21, 256, %s8063_s3, [#allocation4]  }
 0x440   :  { %7893 = dma.done.wait [#allocation4], 256  }
 0x441   :  { %7894 = vsyncadd [#allocation4], 4294967040 }
 0x442   :  { %5755 = vsyncpa [#allocation3], 1 }
 0x443   :  { %5756 = vsyncpa [#allocation6], 1 }
 0x444   :  { %5757 = vsyncpa [#allocation4], 1 }

</bundles_post_ra>
